<compile_context>
chip_gen: v7x
topology: tpu7x:2x2x1
jax: 0.10.0
libtpu: 0.0.40
codegen_flags: <defaults>
</compile_context>

<pallas_src>
import jax
import jax.numpy as jnp
from jax.experimental import pallas as pl
from jax.experimental.pallas import tpu as pltpu

NEG_SLOPE = 0.01            # nn.LeakyReLU default negative_slope
_VMEM_BUDGET = 48 << 20     # safe under v7x's 64 MiB and v5e/v6e's 128 MiB


def _round_up(x, m):
    return ((x + m - 1) // m) * m


# ----------------------------------------------------------------------------
# Fused kernel: 4 quadrant matmuls -> running max -> +bias -> LeakyReLU
# ----------------------------------------------------------------------------
def _conv_pool_kernel(q_ref, w_ref, b_ref, o_ref):
    w = w_ref[...]
    # Running fold keeps at most two live (tm, cout_p) f32 results (vreg/VMEM
    # pressure) instead of materializing all four before the max tree.
    acc = jnp.dot(q_ref[0], w, preferred_element_type=jnp.float32)
    acc = jnp.maximum(acc, jnp.dot(q_ref[1], w, preferred_element_type=jnp.float32))
    acc = jnp.maximum(acc, jnp.dot(q_ref[2], w, preferred_element_type=jnp.float32))
    acc = jnp.maximum(acc, jnp.dot(q_ref[3], w, preferred_element_type=jnp.float32))
    # Bias + LeakyReLU hoisted out of the per-quadrant path (exact: bias is
    # shared across quadrants and LeakyReLU is monotone). Padded lanes stay 0.
    acc = acc + b_ref[...]
    o_ref[...] = jnp.where(acc >= 0, acc, NEG_SLOPE * acc).astype(o_ref.dtype)


def _choose_tile(m2, k_dim_p, cout_p):
    """Pick (tm, m2_padded): fits VMEM budget, prefers a divisor of m2 (no
    row-pad copy), and keeps grid >= 2 so both v7x TensorCores get work."""
    # Double-buffered per-row bytes (bf16 quads + bf16 out tile).
    per_row = 2 * (4 * k_dim_p * 2 + cout_p * 2)
    fixed = 2 * (k_dim_p * cout_p * 2 + cout_p * 4)     # weights + bias blocks
    tm_fit = max(128, ((3 * _VMEM_BUDGET) // 4 - fixed) // per_row)
    if m2 <= 256:
        return m2, m2                   # tiny stage: one full-array block
    cap = min(tm_fit, m2 // 2)          # grid >= 2 (megacore / v7x 2 TCs)
    for tm in (1024, 512, 256, 128):
        if tm <= cap and m2 % tm == 0:
            return tm, m2               # divisor -> no row-padding copy
    for tm in (1024, 512, 256, 128):
        if tm <= cap:
            return tm, _round_up(m2, tm)
    return 128, _round_up(m2, 128)


def conv_pool_lrelu(x, w, b, stride):
    """Fused Conv2d(k, stride, pad=k//2) + LeakyReLU + MaxPool2d(2).

    x: (N, H, W, Cin) NHWC (bf16 or f32); Cin may carry zero-padded lanes.
    w: (kh, kw, Cin_real, Cout) f32; b: (Cout,) f32.
    Returns (N, Ho//2, Wo//2, Cout_padded) bf16; Cout padded to a multiple of
    128 with padded lanes exactly 0.
    """
    n, h, wd, cin = x.shape
    kh, kw, cin_w, cout = w.shape
    pad = kh // 2
    ho = (h + 2 * pad - kh) // stride + 1
    wo = (wd + 2 * pad - kw) // stride + 1
    ho2, wo2 = ho // 2, wo // 2            # floor, like nn.MaxPool2d(2)
    cout_p = _round_up(cout, 128)

    # Weights: pad Cin to the lane-padded activation channels, pad K and Cout
    # to lane-dense multiples of 128, cast to bf16 (MXU-native on v5e/v6e/v7x,
    # halves DMA bytes).  Accumulation stays f32 in-kernel.
    if cin_w < cin:
        w = jnp.pad(w, ((0, 0), (0, 0), (0, cin - cin_w), (0, 0)))
    k_dim = kh * kw * cin
    k_dim_p = _round_up(k_dim, 128)
    w2 = jnp.pad(w.reshape(k_dim, cout),
                 ((0, k_dim_p - k_dim), (0, cout_p - cout))).astype(jnp.bfloat16)
    b2 = jnp.pad(b, (0, cout_p - cout)).reshape(1, cout_p).astype(jnp.float32)

    xp = jnp.pad(x.astype(jnp.bfloat16),
                 ((0, 0), (pad, pad), (pad, pad), (0, 0)))

    # One bf16 im2col patch matrix per 2x2 pool quadrant, stacked into a
    # single (4, M, K) array (one DMA stream / BlockSpec).  K-padding is
    # folded into the concat to avoid a second full-array pad copy; the pool
    # reduces to an in-VMEM running max inside the matmul epilogue.
    # TODO(synk): replace the materialized im2col with a K-grid over the
    # kh*kw taps indexed via BlockSpec index_map on the padded NHWC input.
    m2 = n * ho2 * wo2
    quads = []
    for p in range(2):
        for q in range(2):
            cols = []
            for i in range(kh):
                for j in range(kw):
                    hs = i + stride * p
                    ws = j + stride * q
                    cols.append(
                        xp[:, hs:hs + 2 * stride * ho2:2 * stride,
                              ws:ws + 2 * stride * wo2:2 * stride, :])
            if k_dim_p > k_dim:
                cols.append(jnp.zeros((n, ho2, wo2, k_dim_p - k_dim),
                                      jnp.bfloat16))
            quads.append(jnp.concatenate(cols, axis=-1).reshape(m2, k_dim_p))
    quads = jnp.stack(quads, axis=0)       # (4, m2, k_dim_p) bf16

    tm, m2_p = _choose_tile(m2, k_dim_p, cout_p)
    if m2_p > m2:
        quads = jnp.pad(quads, ((0, 0), (0, m2_p - m2), (0, 0)))

    # Explicit VMEM limit derived from the double-buffered tile footprint
    # (defaults: 16 MiB v5e / 32 MiB v6e+v7x can collapse the pipeline).
    footprint = (2 * (4 * tm * k_dim_p * 2 + tm * cout_p * 2)
                 + 2 * (k_dim_p * cout_p * 2 + cout_p * 4))
    vmem_limit = min(_VMEM_BUDGET,
                     max(32 << 20, int(footprint * 1.25) + (4 << 20)))

    out = pl.pallas_call(
        _conv_pool_kernel,
        out_shape=jax.ShapeDtypeStruct((m2_p, cout_p), jnp.bfloat16),
        grid=(m2_p // tm,),
        in_specs=[
            pl.BlockSpec((4, tm, k_dim_p), lambda i: (0, i, 0)),
            pl.BlockSpec((k_dim_p, cout_p), lambda i: (0, 0)),
            pl.BlockSpec((1, cout_p), lambda i: (0, 0)),
        ],
        out_specs=pl.BlockSpec((tm, cout_p), lambda i: (i, 0)),
        compiler_params=pltpu.CompilerParams(
            dimension_semantics=("parallel",),
            vmem_limit_bytes=vmem_limit),
    )(quads, w2, b2)
    return out[:m2].reshape(n, ho2, wo2, cout_p)


# ----------------------------------------------------------------------------
# Full Block forward
# ----------------------------------------------------------------------------
def _block_forward(x_nchw, conv_ws, conv_bs, lin_w, lin_b, *, strides):
    x = jnp.transpose(x_nchw, (0, 2, 3, 1))             # NCHW -> NHWC
    for w, b, s in zip(conv_ws, conv_bs, strides):
        x = conv_pool_lrelu(x, w, b, s)
    cout = conv_ws[-1].shape[-1]
    # AdaptiveAvgPool2d((1,1)) + flatten; strip zero-padded lanes; f32 head.
    pooled = jnp.mean(x[..., :cout].astype(jnp.float32), axis=(1, 2))
    # nn.Dropout(0.5): identity in eval/inference mode (no RNG mask applied).
    # TODO(synk): apply an inverted-dropout mask if training parity is needed.
    # Tiny Linear head stays in plain jnp (a pallas_call would be pure
    # launch/DMA overhead at this size).
    return pooled @ lin_w + lin_b


block_forward = jax.jit(_block_forward, static_argnames=("strides",))


def init_params(key, num_classes, in_channels=3, hidden_dims=(48, 96, 192),
                kernel_sizes=(3, 3, 3), strides=(1, 2, 2)):
    ws, bs = [], []
    cin = in_channels
    for hd, k, _s in zip(hidden_dims, kernel_sizes, strides):
        key, kw_, kb_ = jax.random.split(key, 3)
        fan_in = cin * k * k
        w = (jax.random.normal(kw_, (k, k, cin, hd), jnp.float32)
             / jnp.sqrt(float(fan_in)))
        b = jax.random.normal(kb_, (hd,), jnp.float32) * 0.01
        ws.append(w)
        bs.append(b)
        cin = hd
    key, kw_ = jax.random.split(key)
    lin_w = (jax.random.normal(kw_, (cin, num_classes), jnp.float32)
             / jnp.sqrt(float(cin)))
    lin_b = jnp.zeros((num_classes,), jnp.float32)
    return tuple(ws), tuple(bs), lin_w, lin_b, tuple(strides)


if __name__ == "__main__":
    key = jax.random.PRNGKey(0)
    kx, kp = jax.random.split(key)
    # PyTorch-style NCHW input; spatial=32 keeps all three conv+pool stages valid.
    x = jax.random.normal(kx, (2, 3, 32, 32), jnp.float32)
    conv_ws, conv_bs, lin_w, lin_b, strides = init_params(kp, num_classes=10)

    out = block_forward(x, conv_ws, conv_bs, lin_w, lin_b, strides=strides)
    out = jax.block_until_ready(out)

    assert out.shape == (2, 10), out.shape
    assert bool(jnp.all(jnp.isfinite(out)))
    print("KERNEL_OK")
</pallas_src>

<mosaic_0001>
module attributes {stable_mosaic.version = 11 : i64} {
  func.func @_conv_pool_kernel(%arg0: i32, %arg1: memref<4x256x128xbf16, #tpu.memory_space<vmem>>, %arg2: memref<128x128xbf16, #tpu.memory_space<vmem>>, %arg3: memref<1x128xf32, #tpu.memory_space<vmem>>, %arg4: memref<256x128xbf16, #tpu.memory_space<vmem>>) attributes {dimension_semantics = [#tpu.dimension_semantics<parallel>], iteration_bounds = array<i64: 2>, scalar_prefetch = 0 : i64, scratch_operands = 0 : i64, tpu.core_type = #tpu.core_type<tc>, window_params = [{transform_indices = @transform_0, window_bounds = array<i64: 4, 256, 128>}, {pipeline_mode = #tpu.pipeline_mode<synchronous>, transform_indices = @transform_1, window_bounds = array<i64: 128, 128>}, {pipeline_mode = #tpu.pipeline_mode<synchronous>, transform_indices = @transform_2, window_bounds = array<i64: 1, 128>}, {transform_indices = @transform_3, window_bounds = array<i64: 256, 128>}]} {
    %c0 = arith.constant 0 : index
    %c0_0 = arith.constant 0 : index
    %0 = vector.load %arg2[%c0, %c0_0] : memref<128x128xbf16, #tpu.memory_space<vmem>>, vector<128x128xbf16>
    %c0_1 = arith.constant 0 : index
    %c0_2 = arith.constant 0 : index
    %c0_3 = arith.constant 0 : index
    %1 = vector.load %arg1[%c0_1, %c0_2, %c0_3] : memref<4x256x128xbf16, #tpu.memory_space<vmem>>, vector<1x256x128xbf16>
    %2 = vector.shape_cast %1 : vector<1x256x128xbf16> to vector<256x128xbf16>
    %cst = arith.constant dense<0.000000e+00> : vector<256x128xf32>
    %3 = tpu.matmul %2, %0, %cst {dimension_numbers = #tpu.dot_dimension_numbers<[1], [0], [0], [1], [0, 0, 1, 1], [], []>} : vector<256x128xbf16>, vector<128x128xbf16>, vector<256x128xf32> -> vector<256x128xf32>
    %c1 = arith.constant 1 : index
    %c0_4 = arith.constant 0 : index
    %c0_5 = arith.constant 0 : index
    %4 = vector.load %arg1[%c1, %c0_4, %c0_5] : memref<4x256x128xbf16, #tpu.memory_space<vmem>>, vector<1x256x128xbf16>
    %5 = vector.shape_cast %4 : vector<1x256x128xbf16> to vector<256x128xbf16>
    %cst_6 = arith.constant dense<0.000000e+00> : vector<256x128xf32>
    %6 = tpu.matmul %5, %0, %cst_6 {dimension_numbers = #tpu.dot_dimension_numbers<[1], [0], [0], [1], [0, 0, 1, 1], [], []>} : vector<256x128xbf16>, vector<128x128xbf16>, vector<256x128xf32> -> vector<256x128xf32>
    %7 = arith.maximumf %3, %6 : vector<256x128xf32>
    %c2 = arith.constant 2 : index
    %c0_7 = arith.constant 0 : index
    %c0_8 = arith.constant 0 : index
    %8 = vector.load %arg1[%c2, %c0_7, %c0_8] : memref<4x256x128xbf16, #tpu.memory_space<vmem>>, vector<1x256x128xbf16>
    %9 = vector.shape_cast %8 : vector<1x256x128xbf16> to vector<256x128xbf16>
    %cst_9 = arith.constant dense<0.000000e+00> : vector<256x128xf32>
    %10 = tpu.matmul %9, %0, %cst_9 {dimension_numbers = #tpu.dot_dimension_numbers<[1], [0], [0], [1], [0, 0, 1, 1], [], []>} : vector<256x128xbf16>, vector<128x128xbf16>, vector<256x128xf32> -> vector<256x128xf32>
    %11 = arith.maximumf %7, %10 : vector<256x128xf32>
    %c3 = arith.constant 3 : index
    %c0_10 = arith.constant 0 : index
    %c0_11 = arith.constant 0 : index
    %12 = vector.load %arg1[%c3, %c0_10, %c0_11] : memref<4x256x128xbf16, #tpu.memory_space<vmem>>, vector<1x256x128xbf16>
    %13 = vector.shape_cast %12 : vector<1x256x128xbf16> to vector<256x128xbf16>
    %cst_12 = arith.constant dense<0.000000e+00> : vector<256x128xf32>
    %14 = tpu.matmul %13, %0, %cst_12 {dimension_numbers = #tpu.dot_dimension_numbers<[1], [0], [0], [1], [0, 0, 1, 1], [], []>} : vector<256x128xbf16>, vector<128x128xbf16>, vector<256x128xf32> -> vector<256x128xf32>
    %15 = arith.maximumf %11, %14 : vector<256x128xf32>
    %c0_13 = arith.constant 0 : index
    %c0_14 = arith.constant 0 : index
    %16 = vector.load %arg3[%c0_13, %c0_14] : memref<1x128xf32, #tpu.memory_space<vmem>>, vector<1x128xf32>
    %17 = vector.broadcast %16 : vector<1x128xf32> to vector<256x128xf32>
    %18 = arith.addf %15, %17 : vector<256x128xf32>
    %cst_15 = arith.constant 0.000000e+00 : f32
    %19 = vector.broadcast %cst_15 : f32 to vector<256x128xf32>
    %20 = arith.cmpf oge, %18, %19 : vector<256x128xf32>
    %cst_16 = arith.constant 0.00999999977 : f32
    %21 = vector.broadcast %cst_16 : f32 to vector<256x128xf32>
    %22 = arith.mulf %21, %18 : vector<256x128xf32>
    %23 = arith.select %20, %18, %22 : vector<256x128xi1>, vector<256x128xf32>
    %24 = arith.truncf %23 : vector<256x128xf32> to vector<256x128xbf16>
    %c0_17 = arith.constant 0 : index
    %c0_18 = arith.constant 0 : index
    %25 = vector.load %arg4[%c0_17, %c0_18] : memref<256x128xbf16, #tpu.memory_space<vmem>>, vector<256x128xbf16>
    tpu.vector_store %arg4[%c0_17, %c0_18], %24 {strides = array<i32>} : memref<256x128xbf16, #tpu.memory_space<vmem>>, vector<256x128xbf16>,
    return
  }
  func.func @transform_0(%arg0: i32) -> (i32, i32, i32) {
    %c0_i32 = arith.constant 0 : i32
    %c0_i32_0 = arith.constant 0 : i32
    %c0_i32_1 = arith.constant 0 : i32
    return %c0_i32, %arg0, %c0_i32_0 : i32, i32, i32
  }
  func.func @transform_1(%arg0: i32) -> (i32, i32) {
    %c0_i32 = arith.constant 0 : i32
    %c0_i32_0 = arith.constant 0 : i32
    %c0_i32_1 = arith.constant 0 : i32
    return %c0_i32, %c0_i32_0 : i32, i32
  }
  func.func @transform_2(%arg0: i32) -> (i32, i32) {
    %c0_i32 = arith.constant 0 : i32
    %c0_i32_0 = arith.constant 0 : i32
    %c0_i32_1 = arith.constant 0 : i32
    return %c0_i32, %c0_i32_0 : i32, i32
  }
  func.func @transform_3(%arg0: i32) -> (i32, i32) {
    %c0_i32 = arith.constant 0 : i32
    %c0_i32_0 = arith.constant 0 : i32
    return %arg0, %c0_i32 : i32, i32
  }
}

module attributes {stable_mosaic.version = 11 : i64} {
  func.func @_conv_pool_kernel(%arg0: i32, %arg1: memref<4x32x1152xbf16, #tpu.memory_space<vmem>>, %arg2: memref<1152x128xbf16, #tpu.memory_space<vmem>>, %arg3: memref<1x128xf32, #tpu.memory_space<vmem>>, %arg4: memref<32x128xbf16, #tpu.memory_space<vmem>>) attributes {dimension_semantics = [#tpu.dimension_semantics<parallel>], iteration_bounds = array<i64: 1>, scalar_prefetch = 0 : i64, scratch_operands = 0 : i64, tpu.core_type = #tpu.core_type<tc>, window_params = [{transform_indices = @transform_0, window_bounds = array<i64: 4, 32, 1152>}, {pipeline_mode = #tpu.pipeline_mode<synchronous>, transform_indices = @transform_1, window_bounds = array<i64: 1152, 128>}, {pipeline_mode = #tpu.pipeline_mode<synchronous>, transform_indices = @transform_2, window_bounds = array<i64: 1, 128>}, {transform_indices = @transform_3, window_bounds = array<i64: 32, 128>}]} {
    %c0 = arith.constant 0 : index
    %c0_0 = arith.constant 0 : index
    %0 = vector.load %arg2[%c0, %c0_0] : memref<1152x128xbf16, #tpu.memory_space<vmem>>, vector<1152x128xbf16>
    %c0_1 = arith.constant 0 : index
    %c0_2 = arith.constant 0 : index
    %c0_3 = arith.constant 0 : index
    %1 = vector.load %arg1[%c0_1, %c0_2, %c0_3] : memref<4x32x1152xbf16, #tpu.memory_space<vmem>>, vector<1x32x1152xbf16>
    %2 = vector.shape_cast %1 : vector<1x32x1152xbf16> to vector<32x1152xbf16>
    %cst = arith.constant dense<0.000000e+00> : vector<32x128xf32>
    %3 = tpu.matmul %2, %0, %cst {dimension_numbers = #tpu.dot_dimension_numbers<[1], [0], [0], [1], [0, 0, 1, 1], [], []>} : vector<32x1152xbf16>, vector<1152x128xbf16>, vector<32x128xf32> -> vector<32x128xf32>
    %c1 = arith.constant 1 : index
    %c0_4 = arith.constant 0 : index
    %c0_5 = arith.constant 0 : index
    %4 = vector.load %arg1[%c1, %c0_4, %c0_5] : memref<4x32x1152xbf16, #tpu.memory_space<vmem>>, vector<1x32x1152xbf16>
    %5 = vector.shape_cast %4 : vector<1x32x1152xbf16> to vector<32x1152xbf16>
    %cst_6 = arith.constant dense<0.000000e+00> : vector<32x128xf32>
    %6 = tpu.matmul %5, %0, %cst_6 {dimension_numbers = #tpu.dot_dimension_numbers<[1], [0], [0], [1], [0, 0, 1, 1], [], []>} : vector<32x1152xbf16>, vector<1152x128xbf16>, vector<32x128xf32> -> vector<32x128xf32>
    %7 = arith.maximumf %3, %6 : vector<32x128xf32>
    %c2 = arith.constant 2 : index
    %c0_7 = arith.constant 0 : index
    %c0_8 = arith.constant 0 : index
    %8 = vector.load %arg1[%c2, %c0_7, %c0_8] : memref<4x32x1152xbf16, #tpu.memory_space<vmem>>, vector<1x32x1152xbf16>
    %9 = vector.shape_cast %8 : vector<1x32x1152xbf16> to vector<32x1152xbf16>
    %cst_9 = arith.constant dense<0.000000e+00> : vector<32x128xf32>
    %10 = tpu.matmul %9, %0, %cst_9 {dimension_numbers = #tpu.dot_dimension_numbers<[1], [0], [0], [1], [0, 0, 1, 1], [], []>} : vector<32x1152xbf16>, vector<1152x128xbf16>, vector<32x128xf32> -> vector<32x128xf32>
    %11 = arith.maximumf %7, %10 : vector<32x128xf32>
    %c3 = arith.constant 3 : index
    %c0_10 = arith.constant 0 : index
    %c0_11 = arith.constant 0 : index
    %12 = vector.load %arg1[%c3, %c0_10, %c0_11] : memref<4x32x1152xbf16, #tpu.memory_space<vmem>>, vector<1x32x1152xbf16>
    %13 = vector.shape_cast %12 : vector<1x32x1152xbf16> to vector<32x1152xbf16>
    %cst_12 = arith.constant dense<0.000000e+00> : vector<32x128xf32>
    %14 = tpu.matmul %13, %0, %cst_12 {dimension_numbers = #tpu.dot_dimension_numbers<[1], [0], [0], [1], [0, 0, 1, 1], [], []>} : vector<32x1152xbf16>, vector<1152x128xbf16>, vector<32x128xf32> -> vector<32x128xf32>
    %15 = arith.maximumf %11, %14 : vector<32x128xf32>
    %c0_13 = arith.constant 0 : index
    %c0_14 = arith.constant 0 : index
    %16 = vector.load %arg3[%c0_13, %c0_14] : memref<1x128xf32, #tpu.memory_space<vmem>>, vector<1x128xf32>
    %17 = vector.broadcast %16 : vector<1x128xf32> to vector<32x128xf32>
    %18 = arith.addf %15, %17 : vector<32x128xf32>
    %cst_15 = arith.constant 0.000000e+00 : f32
    %19 = vector.broadcast %cst_15 : f32 to vector<32x128xf32>
    %20 = arith.cmpf oge, %18, %19 : vector<32x128xf32>
    %cst_16 = arith.constant 0.00999999977 : f32
    %21 = vector.broadcast %cst_16 : f32 to vector<32x128xf32>
    %22 = arith.mulf %21, %18 : vector<32x128xf32>
    %23 = arith.select %20, %18, %22 : vector<32x128xi1>, vector<32x128xf32>
    %24 = arith.truncf %23 : vector<32x128xf32> to vector<32x128xbf16>
    %c0_17 = arith.constant 0 : index
    %c0_18 = arith.constant 0 : index
    %25 = vector.load %arg4[%c0_17, %c0_18] : memref<32x128xbf16, #tpu.memory_space<vmem>>, vector<32x128xbf16>
    tpu.vector_store %arg4[%c0_17, %c0_18], %24 {strides = array<i32>} : memref<32x128xbf16, #tpu.memory_space<vmem>>, vector<32x128xbf16>,
    return
  }
  func.func @transform_0(%arg0: i32) -> (i32, i32, i32) {
    %c0_i32 = arith.constant 0 : i32
    %c0_i32_0 = arith.constant 0 : i32
    %c0_i32_1 = arith.constant 0 : i32
    return %c0_i32, %arg0, %c0_i32_0 : i32, i32, i32
  }
  func.func @transform_1(%arg0: i32) -> (i32, i32) {
    %c0_i32 = arith.constant 0 : i32
    %c0_i32_0 = arith.constant 0 : i32
    %c0_i32_1 = arith.constant 0 : i32
    return %c0_i32, %c0_i32_0 : i32, i32
  }
  func.func @transform_2(%arg0: i32) -> (i32, i32) {
    %c0_i32 = arith.constant 0 : i32
    %c0_i32_0 = arith.constant 0 : i32
    %c0_i32_1 = arith.constant 0 : i32
    return %c0_i32, %c0_i32_0 : i32, i32
  }
  func.func @transform_3(%arg0: i32) -> (i32, i32) {
    %c0_i32 = arith.constant 0 : i32
    %c0_i32_0 = arith.constant 0 : i32
    return %arg0, %c0_i32 : i32, i32
  }
}

module attributes {stable_mosaic.version = 11 : i64} {
  func.func @_conv_pool_kernel(%arg0: i32, %arg1: memref<4x2x1152xbf16, #tpu.memory_space<vmem>>, %arg2: memref<1152x256xbf16, #tpu.memory_space<vmem>>, %arg3: memref<1x256xf32, #tpu.memory_space<vmem>>, %arg4: memref<2x256xbf16, #tpu.memory_space<vmem>>) attributes {dimension_semantics = [#tpu.dimension_semantics<parallel>], iteration_bounds = array<i64: 1>, scalar_prefetch = 0 : i64, scratch_operands = 0 : i64, tpu.core_type = #tpu.core_type<tc>, window_params = [{transform_indices = @transform_0, window_bounds = array<i64: 4, 2, 1152>}, {pipeline_mode = #tpu.pipeline_mode<synchronous>, transform_indices = @transform_1, window_bounds = array<i64: 1152, 256>}, {pipeline_mode = #tpu.pipeline_mode<synchronous>, transform_indices = @transform_2, window_bounds = array<i64: 1, 256>}, {transform_indices = @transform_3, window_bounds = array<i64: 2, 256>}]} {
    %c0 = arith.constant 0 : index
    %c0_0 = arith.constant 0 : index
    %0 = vector.load %arg2[%c0, %c0_0] : memref<1152x256xbf16, #tpu.memory_space<vmem>>, vector<1152x256xbf16>
    %c0_1 = arith.constant 0 : index
    %c0_2 = arith.constant 0 : index
    %c0_3 = arith.constant 0 : index
    %1 = vector.load %arg1[%c0_1, %c0_2, %c0_3] : memref<4x2x1152xbf16, #tpu.memory_space<vmem>>, vector<1x2x1152xbf16>
    %2 = vector.shape_cast %1 : vector<1x2x1152xbf16> to vector<2x1152xbf16>
    %cst = arith.constant dense<0.000000e+00> : vector<2x256xf32>
    %3 = tpu.matmul %2, %0, %cst {dimension_numbers = #tpu.dot_dimension_numbers<[1], [0], [0], [1], [0, 0, 1, 1], [], []>} : vector<2x1152xbf16>, vector<1152x256xbf16>, vector<2x256xf32> -> vector<2x256xf32>
    %c1 = arith.constant 1 : index
    %c0_4 = arith.constant 0 : index
    %c0_5 = arith.constant 0 : index
    %4 = vector.load %arg1[%c1, %c0_4, %c0_5] : memref<4x2x1152xbf16, #tpu.memory_space<vmem>>, vector<1x2x1152xbf16>
    %5 = vector.shape_cast %4 : vector<1x2x1152xbf16> to vector<2x1152xbf16>
    %cst_6 = arith.constant dense<0.000000e+00> : vector<2x256xf32>
    %6 = tpu.matmul %5, %0, %cst_6 {dimension_numbers = #tpu.dot_dimension_numbers<[1], [0], [0], [1], [0, 0, 1, 1], [], []>} : vector<2x1152xbf16>, vector<1152x256xbf16>, vector<2x256xf32> -> vector<2x256xf32>
    %7 = arith.maximumf %3, %6 : vector<2x256xf32>
    %c2 = arith.constant 2 : index
    %c0_7 = arith.constant 0 : index
    %c0_8 = arith.constant 0 : index
    %8 = vector.load %arg1[%c2, %c0_7, %c0_8] : memref<4x2x1152xbf16, #tpu.memory_space<vmem>>, vector<1x2x1152xbf16>
    %9 = vector.shape_cast %8 : vector<1x2x1152xbf16> to vector<2x1152xbf16>
    %cst_9 = arith.constant dense<0.000000e+00> : vector<2x256xf32>
    %10 = tpu.matmul %9, %0, %cst_9 {dimension_numbers = #tpu.dot_dimension_numbers<[1], [0], [0], [1], [0, 0, 1, 1], [], []>} : vector<2x1152xbf16>, vector<1152x256xbf16>, vector<2x256xf32> -> vector<2x256xf32>
    %11 = arith.maximumf %7, %10 : vector<2x256xf32>
    %c3 = arith.constant 3 : index
    %c0_10 = arith.constant 0 : index
    %c0_11 = arith.constant 0 : index
    %12 = vector.load %arg1[%c3, %c0_10, %c0_11] : memref<4x2x1152xbf16, #tpu.memory_space<vmem>>, vector<1x2x1152xbf16>
    %13 = vector.shape_cast %12 : vector<1x2x1152xbf16> to vector<2x1152xbf16>
    %cst_12 = arith.constant dense<0.000000e+00> : vector<2x256xf32>
    %14 = tpu.matmul %13, %0, %cst_12 {dimension_numbers = #tpu.dot_dimension_numbers<[1], [0], [0], [1], [0, 0, 1, 1], [], []>} : vector<2x1152xbf16>, vector<1152x256xbf16>, vector<2x256xf32> -> vector<2x256xf32>
    %15 = arith.maximumf %11, %14 : vector<2x256xf32>
    %c0_13 = arith.constant 0 : index
    %c0_14 = arith.constant 0 : index
    %16 = vector.load %arg3[%c0_13, %c0_14] : memref<1x256xf32, #tpu.memory_space<vmem>>, vector<1x256xf32>
    %17 = vector.broadcast %16 : vector<1x256xf32> to vector<2x256xf32>
    %18 = arith.addf %15, %17 : vector<2x256xf32>
    %cst_15 = arith.constant 0.000000e+00 : f32
    %19 = vector.broadcast %cst_15 : f32 to vector<2x256xf32>
    %20 = arith.cmpf oge, %18, %19 : vector<2x256xf32>
    %cst_16 = arith.constant 0.00999999977 : f32
    %21 = vector.broadcast %cst_16 : f32 to vector<2x256xf32>
    %22 = arith.mulf %21, %18 : vector<2x256xf32>
    %23 = arith.select %20, %18, %22 : vector<2x256xi1>, vector<2x256xf32>
    %24 = arith.truncf %23 : vector<2x256xf32> to vector<2x256xbf16>
    %c0_17 = arith.constant 0 : index
    %c0_18 = arith.constant 0 : index
    %25 = vector.load %arg4[%c0_17, %c0_18] : memref<2x256xbf16, #tpu.memory_space<vmem>>, vector<2x256xbf16>
    tpu.vector_store %arg4[%c0_17, %c0_18], %24 {strides = array<i32>} : memref<2x256xbf16, #tpu.memory_space<vmem>>, vector<2x256xbf16>,
    return
  }
  func.func @transform_0(%arg0: i32) -> (i32, i32, i32) {
    %c0_i32 = arith.constant 0 : i32
    %c0_i32_0 = arith.constant 0 : i32
    %c0_i32_1 = arith.constant 0 : i32
    return %c0_i32, %arg0, %c0_i32_0 : i32, i32, i32
  }
  func.func @transform_1(%arg0: i32) -> (i32, i32) {
    %c0_i32 = arith.constant 0 : i32
    %c0_i32_0 = arith.constant 0 : i32
    %c0_i32_1 = arith.constant 0 : i32
    return %c0_i32, %c0_i32_0 : i32, i32
  }
  func.func @transform_2(%arg0: i32) -> (i32, i32) {
    %c0_i32 = arith.constant 0 : i32
    %c0_i32_0 = arith.constant 0 : i32
    %c0_i32_1 = arith.constant 0 : i32
    return %c0_i32, %c0_i32_0 : i32, i32
  }
  func.func @transform_3(%arg0: i32) -> (i32, i32) {
    %c0_i32 = arith.constant 0 : i32
    %c0_i32_0 = arith.constant 0 : i32
    return %arg0, %c0_i32 : i32, i32
  }
}

</mosaic_0001>

<bundles_post_ra>
// kernel: _block_forward.3
= control target key start
LH: loop header
LB: loop body
LE: loop exit
PB: predicated region body
PF: predicated region fallthrough
CT: control target
= control target key end

     0   :  { %s3170_s12 = smov 0   ;;  %s3172_s13 = smov 0   ;;  %s3854_s0 = inlined_call_operand.vmem [shape: bf16[4,512,128], index: 0, kind: input, shape index: {}]   ;;  %s3855_s1 = inlined_call_operand.vmem [shape: bf16[128,128], index: 1, kind: input, shape index: {}]   ;;  %s3856_s2 = inlined_call_operand.vmem [shape: f32[1,128], index: 2, kind: input, shape index: {}]   ;;  %s3857_s3 = inlined_call_operand.vmem [shape: bf16[512,128], index: 3, kind: output, shape index: {}]  }
   0x1   :  { %s3174_s14 = smov 0  }
   0x2 LB: > { %s2400_s15 = sadd.s32 4294967295, %s3148_s14   ;;  %s3187_s16 = sadd.s32 1, %s3148_s14   ;;  %s3148_s14 = sphi %s3174_s14, %s3943_s14   ;;  %s3144_s13 = sphi %s3172_s13, %s3942_s13   ;;  %s3140_s12 = sphi %s3170_s12, %s3941_s12  }
   0x3   : > { %s17_s17 = ssub.s32 %s3148_s14, %s3187_s16  ;;  %s20_s18 = sadd.s32 1, %s3144_s13 }
   0x4   : > { %p18_p0 = scmp.eq.s32.totalorder %s17_s17, 0  ;;  %p27_p1 = scmp.ne.s32.totalorder %s3144_s13, %s3140_s12 }
   0x5   : > { %p28_p2 = scmp.eq.s32.totalorder %s3148_s14, 0  ;;  %p2403_p4 = scmp.ge.s32.totalorder %s3148_s14, 2 }
   0x6   : > { %s3196_s19 = scalar_select %p18_p0, %s3144_s13, %s20_s18  }
   0x7   : > { %p29_p3 = por %p28_p2, %p27_p1  ;;  %127 = sbr.rel (%p2403_p4) target bundleno = 50 (0x32), region = 24 }
   0xe   : > { %130 = sbr.rel (!%p29_p3) target bundleno = 50 (0x32), region = 28  ;;  %s132_s20 = sand.u32 (%p29_p3), 1, %s3144_s13  }
   0xf   : > { %s2614_s21 = sshll.u32 (%p29_p3), %s3148_s14, 7  ;;  %s2404_s22 = sshll.u32 (%p29_p3), %s132_s20, 9 }
  0x10   : > { %s3204_s25 = scalar_lea.vmem (%p29_p3), %s3854_s0, %s2614_s21  ;;  %s3209_s26 = scalar_lea.vmem (%p29_p3), [#allocation2], %s2404_s22 }
  0x11   : > { %v153_v0 = vld [vmem:[%s3204_s25] sm:$0xff] (%p29_p3)   ;;  %v157_v1 = vld [vmem:[%s3204_s25 + $0x8] sm:$0xff] (%p29_p3)   ;;  %v161_v2 = vld [vmem:[%s3204_s25 + $0x10] sm:$0xff] (%p29_p3)  }
  0x12   : > { %154 = vst [vmem:[%s3209_s26] sm:$0xff] (%p29_p3), %v153_v0   ;;  %158 = vst [vmem:[%s3209_s26 + $0x8] sm:$0xff] (%p29_p3), %v157_v1   ;;  %v165_v3 = vld [vmem:[%s3204_s25 + $0x18] sm:$0xff] (%p29_p3)   ;;  %v169_v4 = vld [vmem:[%s3204_s25 + $0x20] sm:$0xff] (%p29_p3)  }
  0x13   : > { %162 = vst [vmem:[%s3209_s26 + $0x10] sm:$0xff] (%p29_p3), %v161_v2   ;;  %v173_v5 = vld [vmem:[%s3204_s25 + $0x28] sm:$0xff] (%p29_p3)   ;;  %166 = vst [vmem:[%s3209_s26 + $0x18] sm:$0xff] (%p29_p3), %v165_v3   ;;  %v177_v6 = vld [vmem:[%s3204_s25 + $0x30] sm:$0xff] (%p29_p3)  }
  0x14   : > { %170 = vst [vmem:[%s3209_s26 + $0x20] sm:$0xff] (%p29_p3), %v169_v4   ;;  %174 = vst [vmem:[%s3209_s26 + $0x28] sm:$0xff] (%p29_p3), %v173_v5   ;;  %v181_v7 = vld [vmem:[%s3204_s25 + $0x38] sm:$0xff] (%p29_p3)   ;;  %v185_v8 = vld [vmem:[%s3204_s25 + $0x40] sm:$0xff] (%p29_p3)  }
  0x15   : > { %178 = vst [vmem:[%s3209_s26 + $0x30] sm:$0xff] %v177_v6   ;;  %182 = vst [vmem:[%s3209_s26 + $0x38] sm:$0xff] %v181_v7   ;;  %v189_v9 = vld [vmem:[%s3204_s25 + $0x48] sm:$0xff]   ;;  %v193_v10 = vld [vmem:[%s3204_s25 + $0x50] sm:$0xff]  }
  0x16   : > { %186 = vst [vmem:[%s3209_s26 + $0x40] sm:$0xff] %v185_v8   ;;  %v197_v11 = vld [vmem:[%s3204_s25 + $0x58] sm:$0xff]   ;;  %190 = vst [vmem:[%s3209_s26 + $0x48] sm:$0xff] %v189_v9   ;;  %v201_v12 = vld [vmem:[%s3204_s25 + $0x60] sm:$0xff]  }
  0x17   : > { %194 = vst [vmem:[%s3209_s26 + $0x50] sm:$0xff] %v193_v10   ;;  %198 = vst [vmem:[%s3209_s26 + $0x58] sm:$0xff] %v197_v11   ;;  %v205_v13 = vld [vmem:[%s3204_s25 + $0x68] sm:$0xff]   ;;  %v209_v14 = vld [vmem:[%s3204_s25 + $0x70] sm:$0xff]  }
  0x18   : > { %202 = vst [vmem:[%s3209_s26 + $0x60] sm:$0xff] %v201_v12   ;;  %206 = vst [vmem:[%s3209_s26 + $0x68] sm:$0xff] %v205_v13   ;;  %v213_v15 = vld [vmem:[%s3204_s25 + $0x78] sm:$0xff]   ;;  %v217_v16 = vld [vmem:[%s3204_s25 + $0x100] sm:$0xff]  }
  0x19   : > { %210 = vst [vmem:[%s3209_s26 + $0x70] sm:$0xff] %v209_v14   ;;  %v221_v17 = vld [vmem:[%s3204_s25 + $0x108] sm:$0xff]   ;;  %214 = vst [vmem:[%s3209_s26 + $0x78] sm:$0xff] %v213_v15   ;;  %v225_v18 = vld [vmem:[%s3204_s25 + $0x110] sm:$0xff]  }
  0x1a   : > { %218 = vst [vmem:[%s3209_s26 + $0x80] sm:$0xff] %v217_v16   ;;  %222 = vst [vmem:[%s3209_s26 + $0x88] sm:$0xff] %v221_v17   ;;  %v229_v19 = vld [vmem:[%s3204_s25 + $0x118] sm:$0xff]   ;;  %v233_v20 = vld [vmem:[%s3204_s25 + $0x120] sm:$0xff]  }
  0x1b   : > { %226 = vst [vmem:[%s3209_s26 + $0x90] sm:$0xff] %v225_v18   ;;  %230 = vst [vmem:[%s3209_s26 + $0x98] sm:$0xff] %v229_v19   ;;  %v237_v21 = vld [vmem:[%s3204_s25 + $0x128] sm:$0xff]   ;;  %v241_v22 = vld [vmem:[%s3204_s25 + $0x130] sm:$0xff]  }
  0x1c   : > { %234 = vst [vmem:[%s3209_s26 + $0xa0] sm:$0xff] %v233_v20   ;;  %v245_v23 = vld [vmem:[%s3204_s25 + $0x138] sm:$0xff]   ;;  %238 = vst [vmem:[%s3209_s26 + $0xa8] sm:$0xff] %v237_v21   ;;  %v249_v24 = vld [vmem:[%s3204_s25 + $0x140] sm:$0xff]  }
  0x1d   : > { %242 = vst [vmem:[%s3209_s26 + $0xb0] sm:$0xff] %v241_v22   ;;  %246 = vst [vmem:[%s3209_s26 + $0xb8] sm:$0xff] %v245_v23   ;;  %v253_v25 = vld [vmem:[%s3204_s25 + $0x148] sm:$0xff]   ;;  %v257_v26 = vld [vmem:[%s3204_s25 + $0x150] sm:$0xff]  }
  0x1e   : > { %250 = vst [vmem:[%s3209_s26 + $0xc0] sm:$0xff] %v249_v24   ;;  %254 = vst [vmem:[%s3209_s26 + $0xc8] sm:$0xff] %v253_v25   ;;  %v261_v27 = vld [vmem:[%s3204_s25 + $0x158] sm:$0xff]   ;;  %v265_v28 = vld [vmem:[%s3204_s25 + $0x160] sm:$0xff]  }
  0x1f   : > { %258 = vst [vmem:[%s3209_s26 + $0xd0] sm:$0xff] %v257_v26   ;;  %v269_v29 = vld [vmem:[%s3204_s25 + $0x168] sm:$0xff]   ;;  %262 = vst [vmem:[%s3209_s26 + $0xd8] sm:$0xff] %v261_v27   ;;  %v273_v30 = vld [vmem:[%s3204_s25 + $0x170] sm:$0xff]  }
  0x20   : > { %266 = vst [vmem:[%s3209_s26 + $0xe0] sm:$0xff] %v265_v28   ;;  %270 = vst [vmem:[%s3209_s26 + $0xe8] sm:$0xff] %v269_v29   ;;  %v277_v31 = vld [vmem:[%s3204_s25 + $0x178] sm:$0xff]   ;;  %v281_v32 = vld [vmem:[%s3204_s25 + $0x200] sm:$0xff]  }
  0x21   : > { %274 = vst [vmem:[%s3209_s26 + $0xf0] sm:$0xff] %v273_v30   ;;  %278 = vst [vmem:[%s3209_s26 + $0xf8] sm:$0xff] %v277_v31   ;;  %v285_v33 = vld [vmem:[%s3204_s25 + $0x208] sm:$0xff]   ;;  %v289_v34 = vld [vmem:[%s3204_s25 + $0x210] sm:$0xff]  }
  0x22   : > { %282 = vst [vmem:[%s3209_s26 + $0x100] sm:$0xff] %v281_v32   ;;  %v293_v35 = vld [vmem:[%s3204_s25 + $0x218] sm:$0xff]   ;;  %286 = vst [vmem:[%s3209_s26 + $0x108] sm:$0xff] %v285_v33   ;;  %v297_v36 = vld [vmem:[%s3204_s25 + $0x220] sm:$0xff]  }
  0x23   : > { %290 = vst [vmem:[%s3209_s26 + $0x110] sm:$0xff] %v289_v34   ;;  %294 = vst [vmem:[%s3209_s26 + $0x118] sm:$0xff] %v293_v35   ;;  %v301_v37 = vld [vmem:[%s3204_s25 + $0x228] sm:$0xff]   ;;  %v305_v38 = vld [vmem:[%s3204_s25 + $0x230] sm:$0xff]  }
  0x24   : > { %298 = vst [vmem:[%s3209_s26 + $0x120] sm:$0xff] %v297_v36   ;;  %302 = vst [vmem:[%s3209_s26 + $0x128] sm:$0xff] %v301_v37   ;;  %v309_v39 = vld [vmem:[%s3204_s25 + $0x238] sm:$0xff]   ;;  %v313_v40 = vld [vmem:[%s3204_s25 + $0x240] sm:$0xff]  }
  0x25   : > { %306 = vst [vmem:[%s3209_s26 + $0x130] sm:$0xff] %v305_v38   ;;  %v317_v41 = vld [vmem:[%s3204_s25 + $0x248] sm:$0xff]   ;;  %310 = vst [vmem:[%s3209_s26 + $0x138] sm:$0xff] %v309_v39   ;;  %v321_v42 = vld [vmem:[%s3204_s25 + $0x250] sm:$0xff]  }
  0x26   : > { %314 = vst [vmem:[%s3209_s26 + $0x140] sm:$0xff] %v313_v40   ;;  %318 = vst [vmem:[%s3209_s26 + $0x148] sm:$0xff] %v317_v41   ;;  %v325_v43 = vld [vmem:[%s3204_s25 + $0x258] sm:$0xff]   ;;  %v329_v44 = vld [vmem:[%s3204_s25 + $0x260] sm:$0xff]  }
  0x27   : > { %322 = vst [vmem:[%s3209_s26 + $0x150] sm:$0xff] %v321_v42   ;;  %326 = vst [vmem:[%s3209_s26 + $0x158] sm:$0xff] %v325_v43   ;;  %v333_v45 = vld [vmem:[%s3204_s25 + $0x268] sm:$0xff]   ;;  %v337_v46 = vld [vmem:[%s3204_s25 + $0x270] sm:$0xff]  }
  0x28   : > { %330 = vst [vmem:[%s3209_s26 + $0x160] sm:$0xff] %v329_v44   ;;  %v341_v47 = vld [vmem:[%s3204_s25 + $0x278] sm:$0xff]   ;;  %334 = vst [vmem:[%s3209_s26 + $0x168] sm:$0xff] %v333_v45   ;;  %v345_v48 = vld [vmem:[%s3204_s25 + $0x300] sm:$0xff]  }
  0x29   : > { %338 = vst [vmem:[%s3209_s26 + $0x170] sm:$0xff] %v337_v46   ;;  %342 = vst [vmem:[%s3209_s26 + $0x178] sm:$0xff] %v341_v47   ;;  %v349_v49 = vld [vmem:[%s3204_s25 + $0x308] sm:$0xff]   ;;  %v353_v50 = vld [vmem:[%s3204_s25 + $0x310] sm:$0xff]  }
  0x2a   : > { %346 = vst [vmem:[%s3209_s26 + $0x180] sm:$0xff] %v345_v48   ;;  %350 = vst [vmem:[%s3209_s26 + $0x188] sm:$0xff] %v349_v49   ;;  %v357_v51 = vld [vmem:[%s3204_s25 + $0x318] sm:$0xff]   ;;  %v361_v52 = vld [vmem:[%s3204_s25 + $0x320] sm:$0xff]  }
  0x2b   : > { %354 = vst [vmem:[%s3209_s26 + $0x190] sm:$0xff] %v353_v50   ;;  %v365_v53 = vld [vmem:[%s3204_s25 + $0x328] sm:$0xff]   ;;  %358 = vst [vmem:[%s3209_s26 + $0x198] sm:$0xff] %v357_v51   ;;  %v369_v54 = vld [vmem:[%s3204_s25 + $0x330] sm:$0xff]  }
  0x2c   : > { %362 = vst [vmem:[%s3209_s26 + $0x1a0] sm:$0xff] %v361_v52   ;;  %366 = vst [vmem:[%s3209_s26 + $0x1a8] sm:$0xff] %v365_v53   ;;  %v373_v55 = vld [vmem:[%s3204_s25 + $0x338] sm:$0xff]   ;;  %v377_v56 = vld [vmem:[%s3204_s25 + $0x340] sm:$0xff]  }
  0x2d   : > { %370 = vst [vmem:[%s3209_s26 + $0x1b0] sm:$0xff] %v369_v54   ;;  %374 = vst [vmem:[%s3209_s26 + $0x1b8] sm:$0xff] %v373_v55   ;;  %v381_v57 = vld [vmem:[%s3204_s25 + $0x348] sm:$0xff]   ;;  %v385_v58 = vld [vmem:[%s3204_s25 + $0x350] sm:$0xff]  }
  0x2e   : > { %378 = vst [vmem:[%s3209_s26 + $0x1c0] sm:$0xff] %v377_v56   ;;  %v389_v59 = vld [vmem:[%s3204_s25 + $0x358] sm:$0xff]   ;;  %382 = vst [vmem:[%s3209_s26 + $0x1c8] sm:$0xff] %v381_v57   ;;  %v393_v60 = vld [vmem:[%s3204_s25 + $0x360] sm:$0xff]  }
  0x2f   : > { %386 = vst [vmem:[%s3209_s26 + $0x1d0] sm:$0xff] %v385_v58   ;;  %390 = vst [vmem:[%s3209_s26 + $0x1d8] sm:$0xff] %v389_v59   ;;  %v397_v61 = vld [vmem:[%s3204_s25 + $0x368] sm:$0xff]   ;;  %v401_v62 = vld [vmem:[%s3204_s25 + $0x370] sm:$0xff]  }
  0x30   : > { %394 = vst [vmem:[%s3209_s26 + $0x1e0] sm:$0xff] %v393_v60   ;;  %398 = vst [vmem:[%s3209_s26 + $0x1e8] sm:$0xff] %v397_v61   ;;  %v405_v63 = vld [vmem:[%s3204_s25 + $0x378] sm:$0xff]  }
  0x31   : > { %402 = vst [vmem:[%s3209_s26 + $0x1f0] sm:$0xff] %v401_v62   ;;  %406 = vst [vmem:[%s3209_s26 + $0x1f8] sm:$0xff] %v405_v63  }
  0x32 PF: > { %p2407_p5 = scmp.ge.s32.totalorder %s3148_s14, 1  ;;  %p686_p6 = scmp.lt.s32.totalorder %s3148_s14, 3 }
  0x34   : > { %p687_p7 = pnand %p2407_p5, %p686_p6 }
  0x36   : > { %690 = sbr.rel (%p687_p7) target bundleno = 441 (0x1b9), region = 69 }
  0x3d   : > { %v3054_v0 = vld [vmem:[%s3855_s1] sm:$0xff]   ;;  %s693_s29 = sand.u32 1, %s3140_s12   ;;  %v3055_v1 = vld [vmem:[%s3855_s1 + $0x8] sm:$0xff]   ;;  %v3348_v2 = vld [vmem:[%s3855_s1 + $0x10] sm:$0xff]   ;;  %s2409_s24 = sshll.u32 %s2400_s15, 5 }
  0x3e   : > { %2838 = vmatprep.subr.bf16.mxu0 %v3054_v0  ;;  %2886 = vmatprep.subr.bf16.mxu1 %v3054_v0  ;;  %s2408_s5 = sshll.u32 %s693_s29, 9  ;;  %v3353_v3 = vld [vmem:[%s3855_s1 + $0x18] sm:$0xff]   ;;  %v3368_v6 = vld [vmem:[%s3855_s1 + $0x20] sm:$0xff]   ;;  %v3377_v7 = vld [vmem:[%s3855_s1 + $0x28] sm:$0xff]   ;;  %p718_p8 = scmp.lt.s32.totalorder %s2409_s24, 63 }
  0x3f   : > { %2839 = vmatpush3.bf16.msra.mxu0 %v3054_v0  ;;  %2887 = vmatpush3.bf16.msra.mxu1 %v3054_v0  ;;  %s3357_s10 = scalar_lea.vmem [#allocation2], %s2408_s5  ;;  %v3386_v8 = vld [vmem:[%s3855_s1 + $0x30] sm:$0xff]   ;;  %v3395_v9 = vld [vmem:[%s3855_s1 + $0x38] sm:$0xff]  }
  0x40   : > { %2840 = vmatprep.subr.bf16.mxu0 %v3055_v1  ;;  %2888 = vmatprep.subr.bf16.mxu1 %v3055_v1  ;;  %v3062_v4 = vld [vmem:[%s3357_s10] sm:$0xff]   ;;  %v3064_v10 = vld [vmem:[%s3357_s10 + $0x8] sm:$0xff]   ;;  %v3066_v12 = vld [vmem:[%s3357_s10 + $0x10] sm:$0xff]   ;;  %s3945_s24 = smov (!%p718_p8, %s2409_s24), 63 }
  0x41   : > { %v3063_v5 = vld [vmem:[%s3357_s10 + $0x80] sm:$0xff]   ;;  %2854 = vmatprep.mubr.bf16.mxu0 %v3062_v4  ;;  %v3065_v11 = vld [vmem:[%s3357_s10 + $0x88] sm:$0xff]   ;;  %v3067_v13 = vld [vmem:[%s3357_s10 + $0x90] sm:$0xff]   ;;  %s2410_s14 = sshll.u32 %s3945_s24, 2 }
  0x42   : > { %2902 = vmatprep.mubr.bf16.mxu1 %v3063_v5  ;;  %v3068_v14 = vld [vmem:[%s3357_s10 + $0x18] sm:$0xff]   ;;  %v3070_v16 = vld [vmem:[%s3357_s10 + $0x20] sm:$0xff]   ;;  %v3072_v18 = vld [vmem:[%s3357_s10 + $0x28] sm:$0xff]   ;;  %s3714_s28 = scalar_lea.vmem %s3857_s3, %s2410_s14 }
  0x43   : > { %2841 = vmatpush3.bf16.msra.mxu0 %v3055_v1  ;;  %2889 = vmatpush3.bf16.msra.mxu1 %v3055_v1  ;;  %v3069_v15 = vld [vmem:[%s3357_s10 + $0x98] sm:$0xff]   ;;  %v3071_v17 = vld [vmem:[%s3357_s10 + $0xa0] sm:$0xff]   ;;  %v3073_v19 = vld [vmem:[%s3357_s10 + $0xa8] sm:$0xff]  }
  0x44   : > { %2842 = vmatprep.subr.bf16.mxu0 %v3348_v2  ;;  %2890 = vmatprep.subr.bf16.mxu1 %v3348_v2  ;;  %v3074_v20 = vld [vmem:[%s3357_s10 + $0x30] sm:$0xff]   ;;  %v3076_v22 = vld [vmem:[%s3357_s10 + $0x38] sm:$0xff]   ;;  %v3078_v24 = vld [vmem:[%s3357_s10 + $0x40] sm:$0xff]  }
  0x45   : > { %v3075_v21 = vld [vmem:[%s3357_s10 + $0xb0] sm:$0xff]   ;;  %v3077_v23 = vld [vmem:[%s3357_s10 + $0xb8] sm:$0xff]   ;;  %v3079_v25 = vld [vmem:[%s3357_s10 + $0xc0] sm:$0xff]  }
  0x46   : > { %v3080_v26 = vld [vmem:[%s3357_s10 + $0x48] sm:$0xff]   ;;  %v3082_v28 = vld [vmem:[%s3357_s10 + $0x50] sm:$0xff]   ;;  %v3084_v30 = vld [vmem:[%s3357_s10 + $0x58] sm:$0xff]  }
  0x47   : > { %2843 = vmatpush3.bf16.msra.mxu0 %v3348_v2  ;;  %2891 = vmatpush3.bf16.msra.mxu1 %v3348_v2  ;;  %v3081_v27 = vld [vmem:[%s3357_s10 + $0xc8] sm:$0xff]   ;;  %v3083_v29 = vld [vmem:[%s3357_s10 + $0xd0] sm:$0xff]   ;;  %v3085_v31 = vld [vmem:[%s3357_s10 + $0xd8] sm:$0xff]  }
  0x48   : > { %2844 = vmatprep.subr.bf16.mxu0 %v3353_v3  ;;  %2892 = vmatprep.subr.bf16.mxu1 %v3353_v3  ;;  %v3086_v32 = vld [vmem:[%s3357_s10 + $0x60] sm:$0xff]   ;;  %v3088_v34 = vld [vmem:[%s3357_s10 + $0x68] sm:$0xff]   ;;  %v3090_v36 = vld [vmem:[%s3357_s10 + $0x70] sm:$0xff]  }
  0x49   : > { %v3087_v33 = vld [vmem:[%s3357_s10 + $0xe0] sm:$0xff]   ;;  %v3089_v35 = vld [vmem:[%s3357_s10 + $0xe8] sm:$0xff]   ;;  %v3091_v37 = vld [vmem:[%s3357_s10 + $0xf0] sm:$0xff]  }
  0x4a   : > { %v3092_v38 = vld [vmem:[%s3357_s10 + $0x78] sm:$0xff]   ;;  %v3094_v40 = vld [vmem:[%s3357_s10 + $0x100] sm:$0xff]   ;;  %v3096_v42 = vld [vmem:[%s3357_s10 + $0x108] sm:$0xff]  }
  0x4b   : > { %2845 = vmatpush3.bf16.msra.mxu0 %v3353_v3  ;;  %2893 = vmatpush3.bf16.msra.mxu1 %v3353_v3  ;;  %v3093_v39 = vld [vmem:[%s3357_s10 + $0xf8] sm:$0xff]   ;;  %v3095_v41 = vld [vmem:[%s3357_s10 + $0x180] sm:$0xff]   ;;  %v3097_v43 = vld [vmem:[%s3357_s10 + $0x188] sm:$0xff]  }
  0x4c   : > { %2846 = vmatprep.subr.bf16.mxu0 %v3368_v6  ;;  %2894 = vmatprep.subr.bf16.mxu1 %v3368_v6  ;;  %v3098_v44 = vld [vmem:[%s3357_s10 + $0x110] sm:$0xff]   ;;  %v3100_v46 = vld [vmem:[%s3357_s10 + $0x118] sm:$0xff]   ;;  %v3102_v48 = vld [vmem:[%s3357_s10 + $0x120] sm:$0xff]  }
  0x4d   : > { %v3099_v45 = vld [vmem:[%s3357_s10 + $0x190] sm:$0xff]   ;;  %v3101_v47 = vld [vmem:[%s3357_s10 + $0x198] sm:$0xff]   ;;  %v3103_v49 = vld [vmem:[%s3357_s10 + $0x1a0] sm:$0xff]  }
  0x4e   : > { %v3104_v50 = vld [vmem:[%s3357_s10 + $0x128] sm:$0xff]   ;;  %v3106_v52 = vld [vmem:[%s3357_s10 + $0x130] sm:$0xff]   ;;  %v3108_v54 = vld [vmem:[%s3357_s10 + $0x138] sm:$0xff]  }
  0x4f   : > { %2847 = vmatpush3.bf16.msra.mxu0 %v3368_v6  ;;  %2895 = vmatpush3.bf16.msra.mxu1 %v3368_v6  ;;  %v3105_v51 = vld [vmem:[%s3357_s10 + $0x1a8] sm:$0xff]   ;;  %v3107_v53 = vld [vmem:[%s3357_s10 + $0x1b0] sm:$0xff]   ;;  %v3109_v55 = vld [vmem:[%s3357_s10 + $0x1b8] sm:$0xff]  }
  0x50   : > { %2848 = vmatprep.subr.bf16.mxu0 %v3377_v7  ;;  %2896 = vmatprep.subr.bf16.mxu1 %v3377_v7  ;;  %v3110_v56 = vld [vmem:[%s3357_s10 + $0x140] sm:$0xff]   ;;  %v3112_v58 = vld [vmem:[%s3357_s10 + $0x148] sm:$0xff]   ;;  %v3114_v60 = vld [vmem:[%s3357_s10 + $0x150] sm:$0xff]  }
  0x51   : > { %v3111_v57 = vld [vmem:[%s3357_s10 + $0x1c0] sm:$0xff]   ;;  %v3113_v59 = vld [vmem:[%s3357_s10 + $0x1c8] sm:$0xff]   ;;  %v3115_v61 = vld [vmem:[%s3357_s10 + $0x1d0] sm:$0xff]  }
  0x52   : > { %v3116_v62 = vld [vmem:[%s3357_s10 + $0x158] sm:$0xff]   ;;  %v3122_v4 = vld [vmem:[%s3357_s10 + $0x170] sm:$0xff]  }
  0x53   : > { %2849 = vmatpush3.bf16.msra.mxu0 %v3377_v7  ;;  %2897 = vmatpush3.bf16.msra.mxu1 %v3377_v7  ;;  %v3117_v63 = vld [vmem:[%s3357_s10 + $0x1d8] sm:$0xff]   ;;  %v3123_v5 = vld [vmem:[%s3357_s10 + $0x1f0] sm:$0xff]  }
  0x54   : > { %2850 = vmatprep.subr.bf16.mxu0 %v3386_v8  ;;  %2898 = vmatprep.subr.bf16.mxu1 %v3386_v8 }
  0x57   : > { %2851 = vmatpush3.bf16.msra.mxu0 %v3386_v8  ;;  %2899 = vmatpush3.bf16.msra.mxu1 %v3386_v8 }
  0x58   : > { %2852 = vmatprep.subr.bf16.mxu0 %v3395_v9  ;;  %2900 = vmatprep.subr.bf16.mxu1 %v3395_v9 }
  0x5b   : > { %2853 = vmatpush3.bf16.msra.mxu0 %v3395_v9  ;;  %2901 = vmatpush3.bf16.msra.mxu1 %v3395_v9 }
  0x5c   : > { %2934 = vmatprep.subr.bf16.mxu0 %v3054_v0  ;;  %2982 = vmatprep.subr.bf16.mxu1 %v3054_v0 }
  0x5e   : > { %2855 = vmatmul.mubr.bf16.vlgmr.msra.gmra.mrb[0].mxu0 %v3064_v10  ;;  %2903 = vmatmul.mubr.bf16.vlgmr.msra.gmra.mrb[0].mxu1 %v3065_v11 }
  0x5f   : > { %2935 = vmatpush3.bf16.msra.mxu0 %v3054_v0  ;;  %2983 = vmatpush3.bf16.msra.mxu1 %v3054_v0  ;;  %v3118_v0 = vld [vmem:[%s3357_s10 + $0x160] sm:$0xff]  }
  0x60   : > { %2858 = vmatprep.mubr.bf16.mxu0 %v3066_v12  ;;  %2906 = vmatprep.mubr.bf16.mxu1 %v3067_v13 }
  0x61   : > { %2936 = vmatprep.subr.bf16.mxu0 %v3055_v1  ;;  %2984 = vmatprep.subr.bf16.mxu1 %v3055_v1 }
  0x63   : > { %2937 = vmatpush3.bf16.msra.mxu0 %v3055_v1  ;;  %2985 = vmatpush3.bf16.msra.mxu1 %v3055_v1  ;;  %v3119_v1 = vld [vmem:[%s3357_s10 + $0x1e0] sm:$0xff]  }
  0x64   : > { %2938 = vmatprep.subr.bf16.mxu0 %v3348_v2  ;;  %2986 = vmatprep.subr.bf16.mxu1 %v3348_v2 }
  0x66   : > { %2859 = vmatmul.mubr.bf16.gmra.mrb[4].mxu0 %v3068_v14  ;;  %2907 = vmatmul.mubr.bf16.gmra.mrb[4].mxu1 %v3069_v15 }
  0x67   : > { %2862 = vmatprep.mubr.bf16.mxu0 %v3070_v16  ;;  %2910 = vmatprep.mubr.bf16.mxu1 %v3071_v17 }
  0x68   : > { %2939 = vmatpush3.bf16.msra.mxu0 %v3348_v2  ;;  %2987 = vmatpush3.bf16.msra.mxu1 %v3348_v2  ;;  %v3120_v2 = vld [vmem:[%s3357_s10 + $0x168] sm:$0xff]  }
  0x69   : > { %2940 = vmatprep.subr.bf16.mxu0 %v3353_v3  ;;  %2988 = vmatprep.subr.bf16.mxu1 %v3353_v3 }
  0x6c   : > { %2941 = vmatpush3.bf16.msra.mxu0 %v3353_v3  ;;  %2989 = vmatpush3.bf16.msra.mxu1 %v3353_v3  ;;  %v3121_v3 = vld [vmem:[%s3357_s10 + $0x1e8] sm:$0xff]  }
  0x6d   : > { %2942 = vmatprep.subr.bf16.mxu0 %v3368_v6  ;;  %2990 = vmatprep.subr.bf16.mxu1 %v3368_v6 }
  0x6e   : > { %2863 = vmatmul.mubr.bf16.gmra.mrb[8].mxu0 %v3072_v18  ;;  %2911 = vmatmul.mubr.bf16.gmra.mrb[8].mxu1 %v3073_v19 }
  0x6f   : > { %2866 = vmatprep.mubr.bf16.mxu0 %v3074_v20  ;;  %2914 = vmatprep.mubr.bf16.mxu1 %v3075_v21 }
  0x70   : > { %2943 = vmatpush3.bf16.msra.mxu0 %v3368_v6  ;;  %2991 = vmatpush3.bf16.msra.mxu1 %v3368_v6  ;;  %v3124_v6 = vld [vmem:[%s3357_s10 + $0x178] sm:$0xff]  }
  0x71   : > { %2944 = vmatprep.subr.bf16.mxu0 %v3377_v7  ;;  %2992 = vmatprep.subr.bf16.mxu1 %v3377_v7 }
  0x74   : > { %2945 = vmatpush3.bf16.msra.mxu0 %v3377_v7  ;;  %2993 = vmatpush3.bf16.msra.mxu1 %v3377_v7  ;;  %v3125_v7 = vld [vmem:[%s3357_s10 + $0x1f8] sm:$0xff]  }
  0x75   : > { %2946 = vmatprep.subr.bf16.mxu0 %v3386_v8  ;;  %2994 = vmatprep.subr.bf16.mxu1 %v3386_v8 }
  0x76   : > { %2867 = vmatmul.mubr.bf16.gmra.mrb[12].mxu0 %v3076_v22  ;;  %2915 = vmatmul.mubr.bf16.gmra.mrb[12].mxu1 %v3077_v23 }
  0x77   : > { %2870 = vmatprep.mubr.bf16.mxu0 %v3078_v24  ;;  %2918 = vmatprep.mubr.bf16.mxu1 %v3079_v25 }
  0x78   : > { %2947 = vmatpush3.bf16.msra.mxu0 %v3386_v8  ;;  %2995 = vmatpush3.bf16.msra.mxu1 %v3386_v8 }
  0x79   : > { %2948 = vmatprep.subr.bf16.mxu0 %v3395_v9  ;;  %2996 = vmatprep.subr.bf16.mxu1 %v3395_v9 }
  0x7c   : > { %2949 = vmatpush3.bf16.msra.mxu0 %v3395_v9  ;;  %2997 = vmatpush3.bf16.msra.mxu1 %v3395_v9 }
  0x7e   : > { %2871 = vmatmul.mubr.bf16.gmra.mrb[16].mxu0 %v3080_v26  ;;  %2919 = vmatmul.mubr.bf16.gmra.mrb[16].mxu1 %v3081_v27 }
  0x7f   : > { %2874 = vmatprep.mubr.bf16.mxu0 %v3082_v28  ;;  %2922 = vmatprep.mubr.bf16.mxu1 %v3083_v29 }
  0x86   : > { %2875 = vmatmul.mubr.bf16.gmra.mrb[20].mxu0 %v3084_v30  ;;  %2923 = vmatmul.mubr.bf16.gmra.mrb[20].mxu1 %v3085_v31 }
  0x87   : > { %2878 = vmatprep.mubr.bf16.mxu0 %v3086_v32  ;;  %2926 = vmatprep.mubr.bf16.mxu1 %v3087_v33 }
  0x8e   : > { %2879 = vmatmul.mubr.bf16.gmra.mrb[24].mxu0 %v3088_v34  ;;  %2927 = vmatmul.mubr.bf16.gmra.mrb[24].mxu1 %v3089_v35 }
  0x8f   : > { %2882 = vmatprep.mubr.bf16.mxu0 %v3090_v36  ;;  %2930 = vmatprep.mubr.bf16.mxu1 %v3091_v37 }
  0x96   : > { %2883 = vmatmul.mubr.bf16.gmra.mrb[28].mxu0 %v3092_v38  ;;  %2931 = vmatmul.mubr.bf16.gmra.mrb[28].mxu1 %v3093_v39 }
  0x97   : > { %2950 = vmatprep.mubr.bf16.mxu0 %v3094_v40  ;;  %2998 = vmatprep.mubr.bf16.mxu1 %v3095_v41 }
  0x9e   : > { %2951 = vmatmul.mubr.bf16.vlgmr.msra.gmra.mrb[32].mxu0 %v3096_v42  ;;  %2999 = vmatmul.mubr.bf16.vlgmr.msra.gmra.mrb[32].mxu1 %v3097_v43 }
  0x9f   : > { %2954 = vmatprep.mubr.bf16.mxu0 %v3098_v44  ;;  %3002 = vmatprep.mubr.bf16.mxu1 %v3099_v45 }
  0xa6   : > { %2955 = vmatmul.mubr.bf16.gmra.mrb[36].mxu0 %v3100_v46  ;;  %3003 = vmatmul.mubr.bf16.gmra.mrb[36].mxu1 %v3101_v47 }
  0xa7   : > { %2958 = vmatprep.mubr.bf16.mxu0 %v3102_v48  ;;  %3006 = vmatprep.mubr.bf16.mxu1 %v3103_v49 }
  0xae   : > { %2959 = vmatmul.mubr.bf16.gmra.mrb[40].mxu0 %v3104_v50  ;;  %3007 = vmatmul.mubr.bf16.gmra.mrb[40].mxu1 %v3105_v51 }
  0xaf   : > { %2962 = vmatprep.mubr.bf16.mxu0 %v3106_v52  ;;  %3010 = vmatprep.mubr.bf16.mxu1 %v3107_v53 }
  0xb6   : > { %2963 = vmatmul.mubr.bf16.gmra.mrb[44].mxu0 %v3108_v54  ;;  %3011 = vmatmul.mubr.bf16.gmra.mrb[44].mxu1 %v3109_v55 }
  0xb7   : > { %2966 = vmatprep.mubr.bf16.mxu0 %v3110_v56  ;;  %3014 = vmatprep.mubr.bf16.mxu1 %v3111_v57 }
  0xbe   : > { %2967 = vmatmul.mubr.bf16.gmra.mrb[48].mxu0 %v3112_v58  ;;  %3015 = vmatmul.mubr.bf16.gmra.mrb[48].mxu1 %v3113_v59 }
  0xbf   : > { %2970 = vmatprep.mubr.bf16.mxu0 %v3114_v60  ;;  %3018 = vmatprep.mubr.bf16.mxu1 %v3115_v61 }
  0xc6   : > { %2971 = vmatmul.mubr.bf16.gmra.mrb[52].mxu0 %v3116_v62  ;;  %3019 = vmatmul.mubr.bf16.gmra.mrb[52].mxu1 %v3117_v63 }
  0xc7   : > { %2974 = vmatprep.mubr.bf16.mxu0 %v3118_v0  ;;  %3022 = vmatprep.mubr.bf16.mxu1 %v3119_v1  ;;  %v3689_v0 = vld [vmem:[%s3856_s2] ss:$0 sm:$0xff] }
  0xce   : > { %2975 = vmatmul.mubr.bf16.gmra.mrb[56].mxu0 %v3120_v2  ;;  %3023 = vmatmul.mubr.bf16.gmra.mrb[56].mxu1 %v3121_v3 }
  0xcf   : > { %2978 = vmatprep.mubr.bf16.mxu0 %v3122_v4  ;;  %3026 = vmatprep.mubr.bf16.mxu1 %v3123_v5 }
  0xd6   : > { %2979 = vmatmul.mubr.bf16.gmra.mrb[60].mxu0 %v3124_v6  ;;  %3027 = vmatmul.mubr.bf16.gmra.mrb[60].mxu1 %v3125_v7 }
 0x131   : > { %v3489_v8 = vpop.f32.mrb[0].mxu0  ;;  %v3491_v9 = vpop.f32.mrb[0].mxu1 }
 0x132   : > { %v3495_v11 = vpop.f32.mrb[1].mxu0  ;;  %v3497_v12 = vpop.f32.mrb[1].mxu1  ;;  %v3892_v6 = vmax.f32 %v3489_v8, %v3491_v9 }
 0x133   : > { %v3501_v14 = vpop.f32.mrb[2].mxu0  ;;  %v3503_v15 = vpop.f32.mrb[2].mxu1 }
 0x134   : > { %v3507_v17 = vpop.f32.mrb[3].mxu0  ;;  %v3509_v18 = vpop.f32.mrb[3].mxu1 }
 0x139   : > { %v3513_v20 = vpop.f32.mrb[4].mxu0  ;;  %v3515_v21 = vpop.f32.mrb[4].mxu1 }
 0x13a   : > { %v3519_v23 = vpop.f32.mrb[5].mxu0  ;;  %v3521_v24 = vpop.f32.mrb[5].mxu1 }
 0x13b   : > { %v3525_v26 = vpop.f32.mrb[6].mxu0  ;;  %v3527_v27 = vpop.f32.mrb[6].mxu1 }
 0x13c   : > { %v3531_v29 = vpop.f32.mrb[7].mxu0  ;;  %v3533_v30 = vpop.f32.mrb[7].mxu1 }
 0x141   : > { %v3537_v32 = vpop.f32.mrb[8].mxu0  ;;  %v3539_v33 = vpop.f32.mrb[8].mxu1 }
 0x142   : > { %v3543_v35 = vpop.f32.mrb[9].mxu0  ;;  %v3545_v36 = vpop.f32.mrb[9].mxu1 }
 0x143   : > { %v3549_v38 = vpop.f32.mrb[10].mxu0  ;;  %v3551_v39 = vpop.f32.mrb[10].mxu1 }
 0x144   : > { %v3555_v41 = vpop.f32.mrb[11].mxu0  ;;  %v3557_v42 = vpop.f32.mrb[11].mxu1 }
 0x149   : > { %v3561_v44 = vpop.f32.mrb[12].mxu0  ;;  %v3563_v45 = vpop.f32.mrb[12].mxu1 }
 0x14a   : > { %v3567_v47 = vpop.f32.mrb[13].mxu0  ;;  %v3569_v48 = vpop.f32.mrb[13].mxu1 }
 0x14b   : > { %v3573_v50 = vpop.f32.mrb[14].mxu0  ;;  %v3575_v51 = vpop.f32.mrb[14].mxu1 }
 0x14c   : > { %v3579_v53 = vpop.f32.mrb[15].mxu0  ;;  %v3581_v54 = vpop.f32.mrb[15].mxu1 }
 0x151   : > { %v3585_v56 = vpop.f32.mrb[16].mxu0  ;;  %v3587_v57 = vpop.f32.mrb[16].mxu1 }
 0x152   : > { %v3591_v59 = vpop.f32.mrb[17].mxu0  ;;  %v3593_v60 = vpop.f32.mrb[17].mxu1 }
 0x153   : > { %v3597_v62 = vpop.f32.mrb[18].mxu0  ;;  %v3599_v63 = vpop.f32.mrb[18].mxu1 }
 0x154   : > { %v3603_v1 = vpop.f32.mrb[19].mxu0  ;;  %v3605_v2 = vpop.f32.mrb[19].mxu1 }
 0x159   : > { %v3609_v4 = vpop.f32.mrb[20].mxu0  ;;  %v3611_v5 = vpop.f32.mrb[20].mxu1 }
 0x15a   : > { %v3615_v7 = vpop.f32.mrb[21].mxu0  ;;  %v3617_v61 = vpop.f32.mrb[21].mxu1 }
 0x15b   : > { %v3621_v58 = vpop.f32.mrb[22].mxu0  ;;  %v3623_v55 = vpop.f32.mrb[22].mxu1 }
 0x15c   : > { %v3627_v52 = vpop.f32.mrb[23].mxu0  ;;  %v3629_v49 = vpop.f32.mrb[23].mxu1 }
 0x15d   : > { %3875 = vst [vmem:[#allocation3_spill] sm:$0xff] %v3629_v49 }
 0x161   : > { %v3633_v46 = vpop.f32.mrb[24].mxu0  ;;  %v3635_v43 = vpop.f32.mrb[24].mxu1 }
 0x162   : > { %3876 = vst [vmem:[#allocation4_spill] sm:$0xff] %v3633_v46  ;;  %3877 = vst [vmem:[#allocation5_spill] sm:$0xff] %v3635_v43  ;;  %v3639_v40 = vpop.f32.mrb[25].mxu0  ;;  %v3641_v37 = vpop.f32.mrb[25].mxu1 }
 0x163   : > { %3878 = vst [vmem:[#allocation6_spill] sm:$0xff] %v3639_v40  ;;  %3879 = vst [vmem:[#allocation7_spill] sm:$0xff] %v3641_v37  ;;  %v3645_v34 = vpop.f32.mrb[26].mxu0  ;;  %v3647_v31 = vpop.f32.mrb[26].mxu1  ;;  %v3894_v37 = vmax.f32 %v3501_v14, %v3503_v15 }
 0x164   : > { %3880 = vst [vmem:[#allocation8_spill] sm:$0xff] %v3645_v34  ;;  %3881 = vst [vmem:[#allocation9_spill] sm:$0xff] %v3647_v31  ;;  %v3651_v28 = vpop.f32.mrb[27].mxu0  ;;  %v3653_v25 = vpop.f32.mrb[27].mxu1 }
 0x165   : > { %3882 = vst [vmem:[#allocation10_spill] sm:$0xff] %v3651_v28  ;;  %3883 = vst [vmem:[#allocation11_spill] sm:$0xff] %v3653_v25 }
 0x169   : > { %v3657_v22 = vpop.f32.mrb[28].mxu0  ;;  %v3659_v19 = vpop.f32.mrb[28].mxu1 }
 0x16a   : > { %3884 = vst [vmem:[#allocation12_spill] sm:$0xff] %v3657_v22  ;;  %3885 = vst [vmem:[#allocation13_spill] sm:$0xff] %v3659_v19  ;;  %v3663_v16 = vpop.f32.mrb[29].mxu0  ;;  %v3665_v13 = vpop.f32.mrb[29].mxu1 }
 0x16b   : > { %3886 = vst [vmem:[#allocation14_spill] sm:$0xff] %v3663_v16  ;;  %3887 = vst [vmem:[#allocation15_spill] sm:$0xff] %v3665_v13  ;;  %v3669_v10 = vpop.f32.mrb[30].mxu0  ;;  %v3671_v31 = vpop.f32.mrb[30].mxu1 }
 0x16c   : > { %3888 = vst [vmem:[#allocation16_spill] sm:$0xff] %v3669_v10  ;;  %3889 = vst [vmem:[#allocation17_spill] sm:$0xff] %v3671_v31  ;;  %v3675_v25 = vpop.f32.mrb[31].mxu0  ;;  %v3677_v28 = vpop.f32.mrb[31].mxu1  ;;  %v3893_v31 = vmax.f32 %v3495_v11, %v3497_v12 }
 0x16d   : > { %3890 = vst [vmem:[#allocation18_spill] sm:$0xff] %v3675_v25  ;;  %3891 = vst [vmem:[#allocation19_spill] sm:$0xff] %v3677_v28 }
 0x171   : > { %v2952_v19 = vpop.f32.mrb[32].mxu0  ;;  %v3000_v22 = vpop.f32.mrb[32].mxu1 }
 0x172   : > { %v1691_v13 = vmax.f32 %v3892_v6, %v2952_v19  ;;  %v1562_v16 = vpop.f32.mrb[33].mxu0  ;;  %v1884_v34 = vpop.f32.mrb[33].mxu1  ;;  %v3895_v6 = vmax.f32 %v3507_v17, %v3509_v18 }
 0x173   : > { %v1689_v3 = vmax.f32 %v3893_v31, %v1562_v16  ;;  %v2953_v28 = vpop.f32.mrb[34].mxu0  ;;  %v3001_v25 = vpop.f32.mrb[34].mxu1 }
 0x174   : > { %v2013_v10 = vmax.f32 %v1691_v13, %v3000_v22  ;;  %v1692_v40 = vmax.f32 %v3894_v37, %v2953_v28  ;;  %v1565_v8 = vpop.f32.mrb[35].mxu0  ;;  %v1887_v9 = vpop.f32.mrb[35].mxu1 }
 0x175   : > { %v2011_v19 = vmax.f32 %v1689_v3, %v1884_v34  ;;  %v1690_v43 = vmax.f32 %v3895_v6, %v1565_v8 }
 0x176   : > { %v2052_v46 = vadd.f32 %v3689_v0, %v2013_v10  ;;  %v2014_v49 = vmax.f32 %v1692_v40, %v3001_v25  ;;  %v3896_v10 = vmax.f32 %v3513_v20, %v3515_v21  ;;  %v3897_v40 = vmax.f32 %v3519_v23, %v3521_v24 }
 0x177   : > { %v2050_v11 = vadd.f32 %v3689_v0, %v2011_v19  ;;  %v2012_v12 = vmax.f32 %v1690_v43, %v1887_v9 }
 0x178   : > { %vm2084_vm0 = vcmp.ge.f32.partialorder %v2052_v46, 0.0  ;;  %v2116_v13 = vmul.f32 0.01, %v2052_v46  ;;  %v2053_v16 = vadd.f32 %v3689_v0, %v2014_v49 }
 0x179   : > { %vm2082_vm1 = vcmp.ge.f32.partialorder %v2050_v11, 0.0  ;;  %v2114_v14 = vmul.f32 0.01, %v2050_v11  ;;  %v2051_v15 = vadd.f32 %v3689_v0, %v2012_v12  ;;  %v2956_v22 = vpop.f32.mrb[36].mxu0  ;;  %v3004_v28 = vpop.f32.mrb[36].mxu1 }
 0x17a   : > { %vm2085_vm2 = vcmp.ge.f32.partialorder %v2053_v16, 0.0  ;;  %v2117_v17 = vmul.f32 0.01, %v2053_v16  ;;  %v1695_v18 = vmax.f32 %v3896_v10, %v2956_v22  ;;  %v1578_v25 = vpop.f32.mrb[37].mxu0  ;;  %v1900_v31 = vpop.f32.mrb[37].mxu1  ;;  %v2148_v34 = vsel %vm2084_vm0, %v2052_v46, %v2116_v13 }
 0x17b   : > { %vm2083_vm3 = vcmp.ge.f32.partialorder %v2051_v15, 0.0  ;;  %v2115_v37 = vmul.f32 0.01, %v2051_v15  ;;  %v1693_v43 = vmax.f32 %v3897_v40, %v1578_v25  ;;  %v2957_v49 = vpop.f32.mrb[38].mxu0  ;;  %v3005_v3 = vpop.f32.mrb[38].mxu1  ;;  %v2146_v8 = vsel %vm2082_vm1, %v2050_v11, %v2114_v14 }
 0x17c   : > { %v2149_v20 = vsel %vm2085_vm2, %v2053_v16, %v2117_v17  ;;  %v2017_v21 = vmax.f32 %v1695_v18, %v3004_v28  ;;  %v3898_v46 = vmax.f32 %v3525_v26, %v3527_v27  ;;  %v1581_v19 = vpop.f32.mrb[39].mxu0  ;;  %v1903_v23 = vpop.f32.mrb[39].mxu1  ;;  %v3899_v11 = vmax.f32 %v3531_v29, %v3533_v30 }
 0x17d   : > { %v2655_v24 = vpack.c.bf16 %v2149_v20, %v2148_v34  ;;  %v2147_v6 = vsel %vm2083_vm3, %v2051_v15, %v2115_v37  ;;  %v2015_v12 = vmax.f32 %v1693_v43, %v1900_v31  ;;  %v3900_v25 = vmax.f32 %v3537_v32, %v3539_v33 }
 0x17e   : > { %v1696_v9 = vmax.f32 %v3898_v46, %v2957_v49  ;;  %v1694_v13 = vmax.f32 %v3899_v11, %v1581_v19  ;;  %v2650_v14 = vpack.c.bf16 %v2147_v6, %v2146_v8  ;;  %v2056_v22 = vadd.f32 %v3689_v0, %v2017_v21 }
 0x17f   : > { %2727 = vst [vmem:[%s3714_s28 + $0x8] sm:$0xff] %v2655_v24   ;;  %v2054_v16 = vadd.f32 %v3689_v0, %v2015_v12  ;;  %v3901_v49 = vmax.f32 %v3543_v35, %v3545_v36  ;;  %v3902_v32 = vmax.f32 %v3549_v38, %v3551_v39  ;;  %v3903_v35 = vmax.f32 %v3555_v41, %v3557_v42 }
 0x180   : > { %v2018_v10 = vmax.f32 %v1696_v9, %v3005_v3  ;;  %v2016_v28 = vmax.f32 %v1694_v13, %v1903_v23  ;;  %2651 = vst [vmem:[%s3714_s28] sm:$0xff] %v2650_v14   ;;  %vm2088_vm4 = vcmp.ge.f32.partialorder %v2056_v22, 0.0  ;;  %v2120_v26 = vmul.f32 0.01, %v2056_v22 }
 0x181   : > { %vm2086_vm5 = vcmp.ge.f32.partialorder %v2054_v16, 0.0  ;;  %v2118_v15 = vmul.f32 0.01, %v2054_v16  ;;  %v2960_v18 = vpop.f32.mrb[40].mxu0  ;;  %v3008_v29 = vpop.f32.mrb[40].mxu1 }
 0x182   : > { %v2057_v27 = vadd.f32 %v3689_v0, %v2018_v10  ;;  %v2055_v17 = vadd.f32 %v3689_v0, %v2016_v28  ;;  %v1699_v31 = vmax.f32 %v3900_v25, %v2960_v18  ;;  %v1594_v34 = vpop.f32.mrb[41].mxu0  ;;  %v1916_v37 = vpop.f32.mrb[41].mxu1  ;;  %v2152_v40 = vsel %vm2088_vm4, %v2056_v22, %v2120_v26 }
 0x183   : > { %v1697_v3 = vmax.f32 %v3901_v49, %v1594_v34  ;;  %v2961_v8 = vpop.f32.mrb[42].mxu0  ;;  %v3009_v20 = vpop.f32.mrb[42].mxu1  ;;  %v2150_v21 = vsel %vm2086_vm5, %v2054_v16, %v2118_v15  ;;  %v3905_v25 = vmax.f32 %v3567_v47, %v3569_v48  ;;  %v3907_v47 = vmax.f32 %v3579_v53, %v3581_v54 }
 0x184   : > { %vm2089_vm6 = vcmp.ge.f32.partialorder %v2057_v27, 0.0  ;;  %v2121_v30 = vmul.f32 0.01, %v2057_v27  ;;  %vm2087_vm7 = vcmp.ge.f32.partialorder %v2055_v17, 0.0  ;;  %v2119_v43 = vmul.f32 0.01, %v2055_v17 }
 0x185   : > { %v2021_v9 = vmax.f32 %v1699_v31, %v3008_v29  ;;  %v1700_v33 = vmax.f32 %v3902_v32, %v2961_v8  ;;  %v1597_v19 = vpop.f32.mrb[43].mxu0  ;;  %v1919_v23 = vpop.f32.mrb[43].mxu1  ;;  %v2019_v12 = vmax.f32 %v1697_v3, %v1916_v37 }
 0x186   : > { %v2153_v46 = vsel %vm2089_vm6, %v2057_v27, %v2121_v30  ;;  %v2151_v6 = vsel %vm2087_vm7, %v2055_v17, %v2119_v43  ;;  %v1698_v36 = vmax.f32 %v3903_v35, %v1597_v19  ;;  %v3904_v27 = vmax.f32 %v3561_v44, %v3563_v45 }
 0x187   : > { %v2665_v24 = vpack.c.bf16 %v2153_v46, %v2152_v40  ;;  %v2660_v11 = vpack.c.bf16 %v2151_v6, %v2150_v21  ;;  %v2060_v13 = vadd.f32 %v3689_v0, %v2021_v9  ;;  %v2022_v14 = vmax.f32 %v1700_v33, %v3009_v20 }
 0x188   : > { %v2058_v22 = vadd.f32 %v3689_v0, %v2019_v12  ;;  %v2020_v10 = vmax.f32 %v1698_v36, %v1919_v23  ;;  %v3906_v44 = vmax.f32 %v3573_v50, %v3575_v51  ;;  %v3908_v35 = vmax.f32 %v3585_v56, %v3587_v57 }
 0x189   : > { %2729 = vst [vmem:[%s3714_s28 + $0x18] sm:$0xff] %v2665_v24   ;;  %2728 = vst [vmem:[%s3714_s28 + $0x10] sm:$0xff] %v2660_v11   ;;  %vm2092_vm8 = vcmp.ge.f32.partialorder %v2060_v13, 0.0  ;;  %v2124_v38 = vmul.f32 0.01, %v2060_v13  ;;  %v2061_v39 = vadd.f32 %v3689_v0, %v2022_v14  ;;  %v2964_v26 = vpop.f32.mrb[44].mxu0  ;;  %v3910_v56 = vmax.f32 %v3597_v62, %v3599_v63 }
 0x18a   : > { %vm2090_vm9 = vcmp.ge.f32.partialorder %v2058_v22, 0.0  ;;  %v2122_v16 = vmul.f32 0.01, %v2058_v22  ;;  %v2059_v28 = vadd.f32 %v3689_v0, %v2020_v10  ;;  %v3012_v41 = vpop.f32.mrb[44].mxu1  ;;  %v1703_v15 = vmax.f32 %v3904_v27, %v2964_v26  ;;  %v1610_v17 = vpop.f32.mrb[45].mxu0 }
 0x18b   : > { %vm2093_vm10 = vcmp.ge.f32.partialorder %v2061_v39, 0.0  ;;  %v2125_v42 = vmul.f32 0.01, %v2061_v39  ;;  %v1932_v18 = vpop.f32.mrb[45].mxu1  ;;  %v2156_v29 = vsel %vm2092_vm8, %v2060_v13, %v2124_v38  ;;  %v1701_v31 = vmax.f32 %v3905_v25, %v1610_v17  ;;  %v2965_v34 = vpop.f32.mrb[46].mxu0 }
 0x18c   : > { %vm2091_vm11 = vcmp.ge.f32.partialorder %v2059_v28, 0.0  ;;  %v2123_v30 = vmul.f32 0.01, %v2059_v28  ;;  %v3013_v37 = vpop.f32.mrb[46].mxu1  ;;  %v2154_v40 = vsel %vm2090_vm9, %v2058_v22, %v2122_v16  ;;  %v2025_v49 = vmax.f32 %v1703_v15, %v3012_v41  ;;  %v1613_v3 = vpop.f32.mrb[47].mxu0 }
 0x18d   : > { %v2157_v43 = vsel %vm2093_vm10, %v2061_v39, %v2125_v42  ;;  %v1704_v45 = vmax.f32 %v3906_v44, %v2965_v34  ;;  %v1935_v8 = vpop.f32.mrb[47].mxu1  ;;  %v2023_v46 = vmax.f32 %v1701_v31, %v1932_v18  ;;  %v1702_v48 = vmax.f32 %v3907_v47, %v1613_v3 }
 0x18e   : > { %v2675_v20 = vpack.c.bf16 %v2157_v43, %v2156_v29  ;;  %v2155_v21 = vsel %vm2091_vm11, %v2059_v28, %v2123_v30  ;;  %v2064_v32 = vadd.f32 %v3689_v0, %v2025_v49  ;;  %v3909_v10 = vmax.f32 %v3591_v59, %v3593_v60 }
 0x18f   : > { %v2670_v9 = vpack.c.bf16 %v2155_v21, %v2154_v40  ;;  %v2026_v33 = vmax.f32 %v1704_v45, %v3013_v37  ;;  %v2062_v19 = vadd.f32 %v3689_v0, %v2023_v46  ;;  %v2024_v23 = vmax.f32 %v1702_v48, %v1935_v8 }
 0x190   : > { %2731 = vst [vmem:[%s3714_s28 + $0x28] sm:$0xff] %v2675_v20   ;;  %vm2096_vm12 = vcmp.ge.f32.partialorder %v2064_v32, 0.0  ;;  %v2128_v50 = vmul.f32 0.01, %v2064_v32  ;;  %v3911_v59 = vmax.f32 %v3603_v1, %v3605_v2  ;;  %v3912_v49 = vmax.f32 %v3609_v4, %v3611_v5 }
 0x191   : > { %2730 = vst [vmem:[%s3714_s28 + $0x20] sm:$0xff] %v2670_v9   ;;  %v2065_v51 = vadd.f32 %v3689_v0, %v2026_v33  ;;  %vm2094_vm13 = vcmp.ge.f32.partialorder %v2062_v19, 0.0  ;;  %v2126_v24 = vmul.f32 0.01, %v2062_v19  ;;  %v2063_v6 = vadd.f32 %v3689_v0, %v2024_v23  ;;  %v2968_v12 = vpop.f32.mrb[48].mxu0  ;;  %v3016_v53 = vpop.f32.mrb[48].mxu1 }
 0x192   : > { %v1707_v36 = vmax.f32 %v3908_v35, %v2968_v12  ;;  %v1626_v11 = vpop.f32.mrb[49].mxu0  ;;  %v1948_v13 = vpop.f32.mrb[49].mxu1  ;;  %v2160_v14 = vsel %vm2096_vm12, %v2064_v32, %v2128_v50  ;;  %v3913_v21 = vmax.f32 %v3615_v7, %v3617_v61  ;;  %v3914_v4 = vmax.f32 %v3621_v58, %v3623_v55  ;;  %v3915_v61 = vld [vmem:[#allocation3_spill] sm:$0xff] }
 0x193   : > { %vm2097_vm14 = vcmp.ge.f32.partialorder %v2065_v51, 0.0  ;;  %v2129_v54 = vmul.f32 0.01, %v2065_v51  ;;  %vm2095_vm15 = vcmp.ge.f32.partialorder %v2063_v6, 0.0  ;;  %v2127_v22 = vmul.f32 0.01, %v2063_v6 }
 0x194   : > { %v1705_v38 = vmax.f32 %v3909_v10, %v1626_v11  ;;  %v2969_v39 = vpop.f32.mrb[50].mxu0  ;;  %v3017_v16 = vpop.f32.mrb[50].mxu1  ;;  %v2158_v28 = vsel %vm2094_vm13, %v2062_v19, %v2126_v24  ;;  %v2029_v41 = vmax.f32 %v1707_v36, %v3016_v53  ;;  %v3916_v7 = vmax.f32 %v3627_v52, %v3915_v61  ;;  %v3917_v10 = vld [vmem:[#allocation4_spill] sm:$0xff] }
 0x195   : > { %v2161_v26 = vsel %vm2097_vm14, %v2065_v51, %v2129_v54  ;;  %v1708_v57 = vmax.f32 %v3910_v56, %v2969_v39  ;;  %v1629_v42 = vpop.f32.mrb[51].mxu0  ;;  %v1951_v27 = vpop.f32.mrb[51].mxu1  ;;  %v2159_v17 = vsel %vm2095_vm15, %v2063_v6, %v2127_v22 }
 0x196   : > { %v2685_v15 = vpack.c.bf16 %v2161_v26, %v2160_v14  ;;  %v2027_v18 = vmax.f32 %v1705_v38, %v1948_v13  ;;  %v1706_v60 = vmax.f32 %v3911_v59, %v1629_v42  ;;  %v2680_v29 = vpack.c.bf16 %v2159_v17, %v2158_v28  ;;  %v3918_v38 = vld [vmem:[#allocation5_spill] sm:$0xff]  ;;  %v3921_v42 = vld [vmem:[#allocation7_spill] sm:$0xff] }
 0x197   : > { %v2068_v30 = vadd.f32 %v3689_v0, %v2029_v41  ;;  %v2030_v25 = vmax.f32 %v1708_v57, %v3017_v16  ;;  %v3919_v39 = vmax.f32 %v3917_v10, %v3918_v38  ;;  %v3920_v57 = vld [vmem:[#allocation6_spill] sm:$0xff] }
 0x198   : > { %2733 = vst [vmem:[%s3714_s28 + $0x38] sm:$0xff] %v2685_v15   ;;  %v2066_v31 = vadd.f32 %v3689_v0, %v2027_v18  ;;  %v2028_v34 = vmax.f32 %v1706_v60, %v1951_v27  ;;  %2732 = vst [vmem:[%s3714_s28 + $0x30] sm:$0xff] %v2680_v29   ;;  %v3922_v27 = vmax.f32 %v3920_v57, %v3921_v42 }
 0x199   : > { %vm2100_vm0 = vcmp.ge.f32.partialorder %v2068_v30, 0.0  ;;  %v2132_v62 = vmul.f32 0.01, %v2068_v30  ;;  %v2069_v63 = vadd.f32 %v3689_v0, %v2030_v25  ;;  %v2972_v43 = vpop.f32.mrb[52].mxu0  ;;  %v3020_v1 = vpop.f32.mrb[52].mxu1  ;;  %v3924_v25 = vld [vmem:[#allocation9_spill] sm:$0xff] }
 0x19a   : > { %vm2098_vm1 = vcmp.ge.f32.partialorder %v2066_v31, 0.0  ;;  %v2130_v37 = vmul.f32 0.01, %v2066_v31  ;;  %v2067_v40 = vadd.f32 %v3689_v0, %v2028_v34  ;;  %v1711_v44 = vmax.f32 %v3912_v49, %v2972_v43  ;;  %v1642_v45 = vpop.f32.mrb[53].mxu0  ;;  %v1964_v3 = vpop.f32.mrb[53].mxu1 }
 0x19b   : > { %vm2101_vm2 = vcmp.ge.f32.partialorder %v2069_v63, 0.0  ;;  %v2133_v2 = vmul.f32 0.01, %v2069_v63  ;;  %v2164_v8 = vsel %vm2100_vm0, %v2068_v30, %v2132_v62  ;;  %v1709_v46 = vmax.f32 %v3913_v21, %v1642_v45  ;;  %v2973_v47 = vpop.f32.mrb[54].mxu0  ;;  %v3021_v48 = vpop.f32.mrb[54].mxu1  ;;  %v3923_v30 = vld [vmem:[#allocation8_spill] sm:$0xff] }
 0x19c   : > { %vm2099_vm3 = vcmp.ge.f32.partialorder %v2067_v40, 0.0  ;;  %v2131_v20 = vmul.f32 0.01, %v2067_v40  ;;  %v2162_v9 = vsel %vm2098_vm1, %v2066_v31, %v2130_v37  ;;  %v2033_v33 = vmax.f32 %v1711_v44, %v3020_v1  ;;  %v1645_v19 = vpop.f32.mrb[55].mxu0  ;;  %v1967_v23 = vpop.f32.mrb[55].mxu1  ;;  %v3926_v1 = vld [vmem:[#allocation10_spill] sm:$0xff] }
 0x19d   : > { %v2165_v32 = vsel %vm2101_vm2, %v2069_v63, %v2133_v2  ;;  %v1712_v5 = vmax.f32 %v3914_v4, %v2973_v47  ;;  %v2031_v24 = vmax.f32 %v1709_v46, %v1964_v3  ;;  %v1710_v6 = vmax.f32 %v3916_v7, %v1645_v19  ;;  %v3927_v2 = vld [vmem:[#allocation11_spill] sm:$0xff]  ;;  %v3930_v19 = vld [vmem:[#allocation13_spill] sm:$0xff] }
 0x19e   : > { %v2695_v50 = vpack.c.bf16 %v2165_v32, %v2164_v8  ;;  %v2163_v51 = vsel %vm2099_vm3, %v2067_v40, %v2131_v20  ;;  %v2072_v53 = vadd.f32 %v3689_v0, %v2033_v33  ;;  %v3925_v31 = vmax.f32 %v3923_v30, %v3924_v25 }
 0x19f   : > { %v2690_v12 = vpack.c.bf16 %v2163_v51, %v2162_v9  ;;  %v2034_v54 = vmax.f32 %v1712_v5, %v3021_v48  ;;  %v2070_v35 = vadd.f32 %v3689_v0, %v2031_v24  ;;  %v2032_v36 = vmax.f32 %v1710_v6, %v1967_v23  ;;  %v3929_v5 = vld [vmem:[#allocation12_spill] sm:$0xff]  ;;  %v3932_v6 = vld [vmem:[#allocation14_spill] sm:$0xff] }
 0x1a0   : > { %2735 = vst [vmem:[%s3714_s28 + $0x48] sm:$0xff] %v2695_v50   ;;  %vm2104_vm4 = vcmp.ge.f32.partialorder %v2072_v53, 0.0  ;;  %v2136_v55 = vmul.f32 0.01, %v2072_v53  ;;  %v3928_v49 = vmax.f32 %v3926_v1, %v3927_v2  ;;  %v3931_v23 = vmax.f32 %v3929_v5, %v3930_v19 }
 0x1a1   : > { %2734 = vst [vmem:[%s3714_s28 + $0x40] sm:$0xff] %v2690_v12   ;;  %v2073_v58 = vadd.f32 %v3689_v0, %v2034_v54  ;;  %vm2102_vm5 = vcmp.ge.f32.partialorder %v2070_v35, 0.0  ;;  %v2134_v11 = vmul.f32 0.01, %v2070_v35  ;;  %v2071_v13 = vadd.f32 %v3689_v0, %v2032_v36  ;;  %v2976_v14 = vpop.f32.mrb[56].mxu0  ;;  %v3024_v52 = vpop.f32.mrb[56].mxu1 }
 0x1a2   : > { %v1715_v16 = vmax.f32 %v3919_v39, %v2976_v14  ;;  %v1658_v28 = vpop.f32.mrb[57].mxu0  ;;  %v1980_v26 = vpop.f32.mrb[57].mxu1  ;;  %v2168_v41 = vsel %vm2104_vm4, %v2072_v53, %v2136_v55  ;;  %v3933_v12 = vld [vmem:[#allocation15_spill] sm:$0xff]  ;;  %v3936_v14 = vld [vmem:[#allocation17_spill] sm:$0xff] }
 0x1a3   : > { %vm2105_vm6 = vcmp.ge.f32.partialorder %v2073_v58, 0.0  ;;  %v2137_v22 = vmul.f32 0.01, %v2073_v58  ;;  %vm2103_vm7 = vcmp.ge.f32.partialorder %v2071_v13, 0.0  ;;  %v2135_v56 = vmul.f32 0.01, %v2071_v13 }
 0x1a4   : > { %v1713_v15 = vmax.f32 %v3922_v27, %v1658_v28  ;;  %v2977_v17 = vpop.f32.mrb[58].mxu0  ;;  %v3025_v18 = vpop.f32.mrb[58].mxu1  ;;  %v2166_v59 = vsel %vm2102_vm5, %v2070_v35, %v2134_v11  ;;  %v2037_v29 = vmax.f32 %v1715_v16, %v3024_v52  ;;  %v3934_v53 = vmax.f32 %v3932_v6, %v3933_v12 }
 0x1a5   : > { %v2169_v60 = vsel %vm2105_vm6, %v2073_v58, %v2137_v22  ;;  %v1716_v34 = vmax.f32 %v3925_v31, %v2977_v17  ;;  %v1661_v62 = vpop.f32.mrb[59].mxu0  ;;  %v1983_v63 = vpop.f32.mrb[59].mxu1  ;;  %v2167_v40 = vsel %vm2103_vm7, %v2071_v13, %v2135_v56  ;;  %v3935_v13 = vld [vmem:[#allocation16_spill] sm:$0xff] }
 0x1a6   : > { %v2705_v37 = vpack.c.bf16 %v2169_v60, %v2168_v41  ;;  %v2035_v43 = vmax.f32 %v1713_v15, %v1980_v26  ;;  %v1714_v44 = vmax.f32 %v3928_v49, %v1661_v62  ;;  %v2700_v45 = vpack.c.bf16 %v2167_v40, %v2166_v59  ;;  %v3938_v26 = vld [vmem:[#allocation18_spill] sm:$0xff]  ;;  %v3939_v41 = vld [vmem:[#allocation19_spill] sm:$0xff] }
 0x1a7   : > { %v2076_v3 = vadd.f32 %v3689_v0, %v2037_v29  ;;  %v2038_v8 = vmax.f32 %v1716_v34, %v3025_v18  ;;  %v3937_v52 = vmax.f32 %v3935_v13, %v3936_v14  ;;  %v3940_v56 = vmax.f32 %v3938_v26, %v3939_v41 }
 0x1a8   : > { %2737 = vst [vmem:[%s3714_s28 + $0x58] sm:$0xff] %v2705_v37   ;;  %v2074_v20 = vadd.f32 %v3689_v0, %v2035_v43  ;;  %v2036_v21 = vmax.f32 %v1714_v44, %v1983_v63  ;;  %2736 = vst [vmem:[%s3714_s28 + $0x50] sm:$0xff] %v2700_v45  }
 0x1a9   : > { %vm2108_vm8 = vcmp.ge.f32.partialorder %v2076_v3, 0.0  ;;  %v2140_v46 = vmul.f32 0.01, %v2076_v3  ;;  %v2077_v47 = vadd.f32 %v3689_v0, %v2038_v8  ;;  %v2980_v32 = vpop.f32.mrb[60].mxu0  ;;  %v3028_v33 = vpop.f32.mrb[60].mxu1 }
 0x1aa   : > { %vm2106_vm9 = vcmp.ge.f32.partialorder %v2074_v20, 0.0  ;;  %v2138_v48 = vmul.f32 0.01, %v2074_v20  ;;  %v2075_v9 = vadd.f32 %v3689_v0, %v2036_v21  ;;  %v1719_v50 = vmax.f32 %v3931_v23, %v2980_v32  ;;  %v1674_v51 = vpop.f32.mrb[61].mxu0  ;;  %v1996_v24 = vpop.f32.mrb[61].mxu1 }
 0x1ab   : > { %vm2109_vm10 = vcmp.ge.f32.partialorder %v2077_v47, 0.0  ;;  %v2141_v4 = vmul.f32 0.01, %v2077_v47  ;;  %v2172_v61 = vsel %vm2108_vm8, %v2076_v3, %v2140_v46  ;;  %v1717_v54 = vmax.f32 %v3934_v53, %v1674_v51  ;;  %v2981_v35 = vpop.f32.mrb[62].mxu0  ;;  %v3029_v36 = vpop.f32.mrb[62].mxu1 }
 0x1ac   : > { %vm2107_vm11 = vcmp.ge.f32.partialorder %v2075_v9, 0.0  ;;  %v2139_v7 = vmul.f32 0.01, %v2075_v9  ;;  %v2170_v55 = vsel %vm2106_vm9, %v2074_v20, %v2138_v48  ;;  %v2041_v11 = vmax.f32 %v1719_v50, %v3028_v33  ;;  %v1677_v10 = vpop.f32.mrb[63].mxu0  ;;  %v1999_v38 = vpop.f32.mrb[63].mxu1 }
 0x1ad   : > { %v2173_v58 = vsel %vm2109_vm10, %v2077_v47, %v2141_v4  ;;  %v1720_v22 = vmax.f32 %v3937_v52, %v2981_v35  ;;  %v2039_v28 = vmax.f32 %v1717_v54, %v1996_v24  ;;  %v1718_v57 = vmax.f32 %v3940_v56, %v1677_v10 }
 0x1ae   : > { %v2715_v39 = vpack.c.bf16 %v2173_v58, %v2172_v61  ;;  %v2171_v16 = vsel %vm2107_vm11, %v2075_v9, %v2139_v7  ;;  %v2080_v27 = vadd.f32 %v3689_v0, %v2041_v11 }
 0x1af   : > { %v2710_v42 = vpack.c.bf16 %v2171_v16, %v2170_v55  ;;  %v2042_v15 = vmax.f32 %v1720_v22, %v3029_v36  ;;  %v2078_v17 = vadd.f32 %v3689_v0, %v2039_v28  ;;  %v2040_v18 = vmax.f32 %v1718_v57, %v1999_v38 }
 0x1b0   : > { %2739 = vst [vmem:[%s3714_s28 + $0x68] sm:$0xff] %v2715_v39   ;;  %v2144_v59 = vmul.f32 0.01, %v2080_v27  ;;  %vm2112_vm12 = vcmp.ge.f32.partialorder %v2080_v27, 0.0 }
 0x1b1   : > { %2738 = vst [vmem:[%s3714_s28 + $0x60] sm:$0xff] %v2710_v42   ;;  %v2081_v60 = vadd.f32 %v3689_v0, %v2042_v15  ;;  %v2142_v29 = vmul.f32 0.01, %v2078_v17  ;;  %v2079_v30 = vadd.f32 %v3689_v0, %v2040_v18  ;;  %vm2110_vm13 = vcmp.ge.f32.partialorder %v2078_v17, 0.0 }
 0x1b2   : > { %v2176_v34 = vsel %vm2112_vm12, %v2080_v27, %v2144_v59 }
 0x1b3   : > { %vm2113_vm14 = vcmp.ge.f32.partialorder %v2081_v60, 0.0  ;;  %v2145_v25 = vmul.f32 0.01, %v2081_v60  ;;  %vm2111_vm15 = vcmp.ge.f32.partialorder %v2079_v30, 0.0  ;;  %v2143_v31 = vmul.f32 0.01, %v2079_v30 }
 0x1b4   : > { %v2174_v63 = vsel %vm2110_vm13, %v2078_v17, %v2142_v29 }
 0x1b5   : > { %v2177_v62 = vsel %vm2113_vm14, %v2081_v60, %v2145_v25  ;;  %v2175_v40 = vsel %vm2111_vm15, %v2079_v30, %v2143_v31 }
 0x1b6   : > { %v2725_v37 = vpack.c.bf16 %v2177_v62, %v2176_v34  ;;  %v2720_v43 = vpack.c.bf16 %v2175_v40, %v2174_v63 }
 0x1b8   : > { %2741 = vst [vmem:[%s3714_s28 + $0x78] sm:$0xff] %v2725_v37   ;;  %2740 = vst [vmem:[%s3714_s28 + $0x70] sm:$0xff] %v2720_v43  }
 0x1b9 PF: > { %p10_p9 = scmp.ge.s32.totalorder %s3187_s16, 4   ;;  %s3941_s12 = smov %s3144_s13 }
 0x1ba   : > { %s3942_s13 = smov %s3196_s19  ;;  %s3943_s14 = smov %s3187_s16 }
 0x1bb   :  { %12 = sbr.rel (!%p10_p9) target bundleno = 2 (0x2), region = 111 }

// kernel: _block_forward.4
= control target key start
LH: loop header
LB: loop body
LE: loop exit
PB: predicated region body
PF: predicated region fallthrough
CT: control target
= control target key end

     0   :  { %s4220_s1 = inlined_call_operand.vmem [shape: bf16[1152,128], index: 1, kind: input, shape index: {}]   ;;  %s4221_s0 = inlined_call_operand.vmem [shape: bf16[4,32,1152], index: 0, kind: input, shape index: {}]   ;;  %s4222_s2 = inlined_call_operand.vmem [shape: f32[1,128], index: 2, kind: input, shape index: {}]   ;;  %s4223_s3 = inlined_call_operand.vmem [shape: bf16[32,128], index: 3, kind: output, shape index: {}]  }
   0x1   :  { %v3129_v0 = vld [vmem:[%s4220_s1 + $0x40] sm:$0xff]   ;;  %v3152_v4 = vld [vmem:[%s4220_s1 + $0x48] sm:$0xff]   ;;  %v3176_v8 = vld [vmem:[%s4220_s1 + $0x50] sm:$0xff]  }
   0x2   :  { %v3134_v1 = vld [vmem:[%s4220_s1 + $0xc0] sm:$0xff]   ;;  %2305 = vmatprep.subr.bf16.mxu0 %v3129_v0  ;;  %v3158_v5 = vld [vmem:[%s4220_s1 + $0xc8] sm:$0xff]   ;;  %v3182_v9 = vld [vmem:[%s4220_s1 + $0xd0] sm:$0xff]  }
   0x3   :  { %v3140_v2 = vld [vmem:[%s4220_s1] sm:$0xff]   ;;  %2333 = vmatprep.subr.bf16.mxu1 %v3134_v1  ;;  %v3164_v6 = vld [vmem:[%s4220_s1 + $0x8] sm:$0xff]   ;;  %v3188_v10 = vld [vmem:[%s4220_s1 + $0x10] sm:$0xff]  }
   0x4   :  { %v3146_v3 = vld [vmem:[%s4220_s1 + $0x80] sm:$0xff]   ;;  %2306 = vmatpush3.bf16.msra.mxu0 %v3140_v2  ;;  %v3170_v7 = vld [vmem:[%s4220_s1 + $0x88] sm:$0xff]   ;;  %v3194_v11 = vld [vmem:[%s4220_s1 + $0x90] sm:$0xff]  }
   0x5   :  { %2334 = vmatpush3.bf16.msra.mxu1 %v3146_v3  ;;  %2307 = vmatprep.subr.bf16.mxu0 %v3152_v4  ;;  %v3200_v12 = vld [vmem:[%s4220_s1 + $0x58] sm:$0xff]   ;;  %v3224_v16 = vld [vmem:[%s4220_s1 + $0x60] sm:$0xff]   ;;  %v3248_v20 = vld [vmem:[%s4220_s1 + $0x68] sm:$0xff]  }
   0x6   :  { %2335 = vmatprep.subr.bf16.mxu1 %v3158_v5  ;;  %v3206_v13 = vld [vmem:[%s4220_s1 + $0xd8] sm:$0xff]   ;;  %v3230_v17 = vld [vmem:[%s4220_s1 + $0xe0] sm:$0xff]   ;;  %v3254_v21 = vld [vmem:[%s4220_s1 + $0xe8] sm:$0xff]  }
   0x7   :  { %v3212_v14 = vld [vmem:[%s4220_s1 + $0x18] sm:$0xff]   ;;  %v3236_v18 = vld [vmem:[%s4220_s1 + $0x20] sm:$0xff]   ;;  %v3260_v22 = vld [vmem:[%s4220_s1 + $0x28] sm:$0xff]  }
   0x8   :  { %2308 = vmatpush3.bf16.msra.mxu0 %v3164_v6  ;;  %v3218_v15 = vld [vmem:[%s4220_s1 + $0x98] sm:$0xff]   ;;  %v3242_v19 = vld [vmem:[%s4220_s1 + $0xa0] sm:$0xff]   ;;  %v3266_v23 = vld [vmem:[%s4220_s1 + $0xa8] sm:$0xff]  }
   0x9   :  { %2336 = vmatpush3.bf16.msra.mxu1 %v3170_v7  ;;  %2309 = vmatprep.subr.bf16.mxu0 %v3176_v8  ;;  %v3272_v24 = vld [vmem:[%s4220_s1 + $0x70] sm:$0xff]   ;;  %v3296_v28 = vld [vmem:[%s4220_s1 + $0x78] sm:$0xff]   ;;  %v2905_v32 = vld [vmem:[%s4221_s0] ss:$36 sps:$4 sm:$0xff]  }
   0xa   :  { %2337 = vmatprep.subr.bf16.mxu1 %v3182_v9  ;;  %4255 = vst [vmem:[#allocation2_spill] sm:$0xff] %v3272_v24  ;;  %v3278_v25 = vld [vmem:[%s4220_s1 + $0xf0] sm:$0xff]   ;;  %4257 = vst [vmem:[#allocation4_spill] sm:$0xff] %v3296_v28  ;;  %v3302_v29 = vld [vmem:[%s4220_s1 + $0xf8] sm:$0xff]  }
   0xb   :  { %v3284_v26 = vld [vmem:[%s4220_s1 + $0x30] sm:$0xff]   ;;  %v3308_v30 = vld [vmem:[%s4220_s1 + $0x38] sm:$0xff]   ;;  %v2907_v33 = vld [vmem:[%s4221_s0 + $0x4] ss:$36 sps:$4 sm:$0xff]  }
   0xc   :  { %2310 = vmatpush3.bf16.msra.mxu0 %v3188_v10  ;;  %4256 = vst [vmem:[#allocation3_spill] sm:$0xff] %v3284_v26  ;;  %v3290_v27 = vld [vmem:[%s4220_s1 + $0xb0] sm:$0xff]   ;;  %v3314_v31 = vld [vmem:[%s4220_s1 + $0xb8] sm:$0xff]   ;;  %v2908_v34 = vld [vmem:[%s4221_s0 + $0x8] ss:$36 sps:$4 sm:$0xff]   ;;  %735 = vmatprep.mubr.bf16.mxu0 %v2907_v33 }
   0xd   :  { %2338 = vmatpush3.bf16.msra.mxu1 %v3194_v11  ;;  %2311 = vmatprep.subr.bf16.mxu0 %v3200_v12  ;;  %v2910_v35 = vld [vmem:[%s4221_s0 + $0xc] ss:$36 sps:$4 sm:$0xff]   ;;  %v3333_v36 = vld [vmem:[%s4220_s1 + $0x140] sm:$0xff]   ;;  %v3404_v48 = vld [vmem:[%s4220_s1 + $0x158] sm:$0xff]  }
   0xe   :  { %2339 = vmatprep.subr.bf16.mxu1 %v3206_v13  ;;  %784 = vmatprep.mubr.bf16.mxu1 %v2910_v35  ;;  %v3338_v37 = vld [vmem:[%s4220_s1 + $0x1c0] sm:$0xff]   ;;  %v3356_v40 = vld [vmem:[%s4220_s1 + $0x148] sm:$0xff]   ;;  %v3380_v44 = vld [vmem:[%s4220_s1 + $0x150] sm:$0xff]  }
   0xf   :  { %v3344_v38 = vld [vmem:[%s4220_s1 + $0x100] sm:$0xff]   ;;  %v3362_v41 = vld [vmem:[%s4220_s1 + $0x1c8] sm:$0xff]   ;;  %v3386_v45 = vld [vmem:[%s4220_s1 + $0x1d0] sm:$0xff]  }
  0x10   :  { %2312 = vmatpush3.bf16.msra.mxu0 %v3212_v14  ;;  %v3350_v39 = vld [vmem:[%s4220_s1 + $0x180] sm:$0xff]   ;;  %v3368_v42 = vld [vmem:[%s4220_s1 + $0x108] sm:$0xff]   ;;  %v3392_v46 = vld [vmem:[%s4220_s1 + $0x110] sm:$0xff]  }
  0x11   :  { %2340 = vmatpush3.bf16.msra.mxu1 %v3218_v15  ;;  %2313 = vmatprep.subr.bf16.mxu0 %v3224_v16  ;;  %v3374_v43 = vld [vmem:[%s4220_s1 + $0x188] sm:$0xff]   ;;  %v3398_v47 = vld [vmem:[%s4220_s1 + $0x190] sm:$0xff]   ;;  %v3410_v49 = vld [vmem:[%s4220_s1 + $0x1d8] sm:$0xff]  }
  0x12   :  { %2341 = vmatprep.subr.bf16.mxu1 %v3230_v17  ;;  %v3416_v50 = vld [vmem:[%s4220_s1 + $0x118] sm:$0xff]   ;;  %v3428_v52 = vld [vmem:[%s4220_s1 + $0x160] sm:$0xff]   ;;  %v3452_v56 = vld [vmem:[%s4220_s1 + $0x168] sm:$0xff]  }
  0x13   :  { %v3422_v51 = vld [vmem:[%s4220_s1 + $0x198] sm:$0xff]   ;;  %v3434_v53 = vld [vmem:[%s4220_s1 + $0x1e0] sm:$0xff]   ;;  %v3458_v57 = vld [vmem:[%s4220_s1 + $0x1e8] sm:$0xff]  }
  0x14   :  { %2314 = vmatpush3.bf16.msra.mxu0 %v3236_v18  ;;  %v3440_v54 = vld [vmem:[%s4220_s1 + $0x120] sm:$0xff]   ;;  %4258 = vst [vmem:[#allocation5_spill] sm:$0xff] %v3458_v57  ;;  %v2933_v58 = vld [vmem:[%s4221_s0 + $0x4c] ss:$36 sps:$4 sm:$0xff]   ;;  %v2935_v59 = vld [vmem:[%s4221_s0 + $0x54] ss:$36 sps:$4 sm:$0xff]  }
  0x15   :  { %2342 = vmatpush3.bf16.msra.mxu1 %v3242_v19  ;;  %2315 = vmatprep.subr.bf16.mxu0 %v3248_v20  ;;  %v3446_v55 = vld [vmem:[%s4220_s1 + $0x1a0] sm:$0xff]   ;;  %v3471_v60 = vld [vmem:[%s4220_s1 + $0x128] sm:$0xff]   ;;  %v2940_v63 = vld [vmem:[%s4221_s0 + $0x50] ss:$36 sps:$4 sm:$0xff]  }
  0x16   :  { %2343 = vmatprep.subr.bf16.mxu1 %v3254_v21  ;;  %v3476_v61 = vld [vmem:[%s4220_s1 + $0x1a8] sm:$0xff]   ;;  %v3494_v33 = vld [vmem:[%s4220_s1 + $0x1f0] sm:$0xff]  }
  0x17   :  { %4259 = vst [vmem:[#allocation6_spill] sm:$0xff] %v3476_v61  ;;  %v2939_v62 = vld [vmem:[%s4221_s0 + $0x48] ss:$36 sps:$4 sm:$0xff]   ;;  %4260 = vst [vmem:[#allocation7_spill] sm:$0xff] %v3494_v33  ;;  %v3506_v35 = vld [vmem:[%s4220_s1 + $0x1b0] sm:$0xff]  }
  0x18   :  { %2316 = vmatpush3.bf16.msra.mxu0 %v3260_v22  ;;  %4261 = vst [vmem:[#allocation8_spill] sm:$0xff] %v3506_v35 }
  0x19   :  { %2344 = vmatpush3.bf16.msra.mxu1 %v3266_v23  ;;  %2317 = vmatprep.subr.bf16.mxu0 %v3272_v24 }
  0x1a   :  { %2345 = vmatprep.subr.bf16.mxu1 %v3278_v25 }
  0x1c   :  { %2318 = vmatpush3.bf16.msra.mxu0 %v3284_v26 }
  0x1d   :  { %2346 = vmatpush3.bf16.msra.mxu1 %v3290_v27  ;;  %2319 = vmatprep.subr.bf16.mxu0 %v3296_v28 }
  0x1e   :  { %2347 = vmatprep.subr.bf16.mxu1 %v3302_v29 }
  0x20   :  { %2320 = vmatpush3.bf16.msra.mxu0 %v3308_v30 }
  0x21   :  { %2348 = vmatpush3.bf16.msra.mxu1 %v3314_v31  ;;  %2361 = vmatprep.subr.bf16.mxu0 %v3333_v36 }
  0x22   :  { %2389 = vmatprep.subr.bf16.mxu1 %v3338_v37 }
  0x23   :  { %736 = vmatmul.mubr.bf16.vlgmr.msra.gmra.mrb[0].mxu0 %v2905_v32  ;;  %v3489_v32 = vld [vmem:[%s4220_s1 + $0x170] sm:$0xff]  }
  0x24   :  { %785 = vmatmul.mubr.bf16.vlgmr.msra.gmra.mrb[0].mxu1 %v2908_v34  ;;  %2362 = vmatpush3.bf16.msra.mxu0 %v3344_v38  ;;  %v3500_v34 = vld [vmem:[%s4220_s1 + $0x130] sm:$0xff]  }
  0x25   :  { %2390 = vmatpush3.bf16.msra.mxu1 %v3350_v39  ;;  %2363 = vmatprep.subr.bf16.mxu0 %v3356_v40 }
  0x26   :  { %2391 = vmatprep.subr.bf16.mxu1 %v3362_v41  ;;  %743 = vmatprep.mubr.bf16.mxu0 %v2933_v58  ;;  %v3512_v58 = vld [vmem:[%s4220_s1 + $0x178] sm:$0xff]  }
  0x27   :  { %792 = vmatprep.mubr.bf16.mxu1 %v2935_v59  ;;  %v3518_v59 = vld [vmem:[%s4220_s1 + $0x1f8] sm:$0xff]  }
  0x28   :  { %2364 = vmatpush3.bf16.msra.mxu0 %v3368_v42  ;;  %4262 = vst [vmem:[#allocation9_spill] sm:$0xff] %v3518_v59 }
  0x29   :  { %2392 = vmatpush3.bf16.msra.mxu1 %v3374_v43  ;;  %2365 = vmatprep.subr.bf16.mxu0 %v3380_v44 }
  0x2a   :  { %2393 = vmatprep.subr.bf16.mxu1 %v3386_v45 }
  0x2b   :  { %744 = vmatmul.mubr.bf16.gmra.mrb[4].mxu0 %v2939_v62  ;;  %v3524_v62 = vld [vmem:[%s4220_s1 + $0x138] sm:$0xff]  }
  0x2c   :  { %2366 = vmatpush3.bf16.msra.mxu0 %v3392_v46  ;;  %793 = vmatmul.mubr.bf16.gmra.mrb[4].mxu1 %v2940_v63  ;;  %v3530_v63 = vld [vmem:[%s4220_s1 + $0x1b8] sm:$0xff]  }
  0x2d   :  { %2394 = vmatpush3.bf16.msra.mxu1 %v3398_v47  ;;  %2367 = vmatprep.subr.bf16.mxu0 %v3404_v48  ;;  %4263 = vst [vmem:[#allocation10_spill] sm:$0xff] %v3530_v63 }
  0x2e   :  { %2395 = vmatprep.subr.bf16.mxu1 %v3410_v49 }
  0x30   :  { %2368 = vmatpush3.bf16.msra.mxu0 %v3416_v50 }
  0x31   :  { %2396 = vmatpush3.bf16.msra.mxu1 %v3422_v51  ;;  %2369 = vmatprep.subr.bf16.mxu0 %v3428_v52 }
  0x32   :  { %2397 = vmatprep.subr.bf16.mxu1 %v3434_v53 }
  0x34   :  { %2370 = vmatpush3.bf16.msra.mxu0 %v3440_v54 }
  0x35   :  { %2398 = vmatpush3.bf16.msra.mxu1 %v3446_v55  ;;  %2371 = vmatprep.subr.bf16.mxu0 %v3452_v56 }
  0x36   :  { %2399 = vmatprep.subr.bf16.mxu1 %v3458_v57  ;;  %v3549_v57 = vld [vmem:[%s4220_s1 + $0x200] sm:$0xff]  }
  0x38   :  { %2372 = vmatpush3.bf16.msra.mxu0 %v3471_v60 }
  0x39   :  { %2400 = vmatpush3.bf16.msra.mxu1 %v3476_v61  ;;  %2373 = vmatprep.subr.bf16.mxu0 %v3489_v32  ;;  %v2954_v61 = vld [vmem:[%s4221_s0 + $0x1c] ss:$36 sps:$4 sm:$0xff]  }
  0x3a   :  { %2401 = vmatprep.subr.bf16.mxu1 %v3494_v33  ;;  %v2951_v33 = vld [vmem:[%s4221_s0 + $0x14] ss:$36 sps:$4 sm:$0xff]   ;;  %882 = vmatprep.mubr.bf16.mxu1 %v2954_v61 }
  0x3b   :  { %833 = vmatprep.mubr.bf16.mxu0 %v2951_v33  ;;  %v2957_v33 = vld [vmem:[%s4221_s0 + $0x5c] ss:$36 sps:$4 sm:$0xff]  }
  0x3c   :  { %2374 = vmatpush3.bf16.msra.mxu0 %v3500_v34  ;;  %v2959_v61 = vld [vmem:[%s4221_s0 + $0x58] ss:$36 sps:$4 sm:$0xff]  }
  0x3d   :  { %2402 = vmatpush3.bf16.msra.mxu1 %v3506_v35  ;;  %2375 = vmatprep.subr.bf16.mxu0 %v3512_v58  ;;  %v2949_v35 = vld [vmem:[%s4221_s0 + $0x10] ss:$36 sps:$4 sm:$0xff]  }
  0x3e   :  { %2403 = vmatprep.subr.bf16.mxu1 %v3518_v59  ;;  %v2952_v59 = vld [vmem:[%s4221_s0 + $0x18] ss:$36 sps:$4 sm:$0xff]  }
  0x40   :  { %2376 = vmatpush3.bf16.msra.mxu0 %v3524_v62 }
  0x41   :  { %2404 = vmatpush3.bf16.msra.mxu1 %v3530_v63  ;;  %v3555_v63 = vld [vmem:[%s4220_s1 + $0x208] sm:$0xff]   ;;  %2793 = vmatprep.subr.bf16.mxu0 %v3549_v57 }
  0x42   :  { %2427 = vmatprep.subr.bf16.mxu1 %v3129_v0  ;;  %4264 = vst [vmem:[#allocation11_spill] sm:$0xff] %v3555_v63  ;;  %v3568_v0 = vld [vmem:[%s4220_s1 + $0x210] sm:$0xff]  }
  0x43   :  { %834 = vmatmul.mubr.bf16.vlgmr.msra.gmra.mrb[8].mxu0 %v2949_v35  ;;  %4265 = vst [vmem:[#allocation12_spill] sm:$0xff] %v3568_v0  ;;  %v2961_v35 = vld [vmem:[%s4221_s0 + $0x64] ss:$36 sps:$4 sm:$0xff]  }
  0x44   :  { %883 = vmatmul.mubr.bf16.vlgmr.msra.gmra.mrb[8].mxu1 %v2952_v59  ;;  %2794 = vmatpush3.bf16.msra.mxu0 %v3549_v57  ;;  %v2969_v59 = vld [vmem:[%s4221_s0 + $0x20] ss:$36 sps:$4 sm:$0xff]  }
  0x45   :  { %2428 = vmatpush3.bf16.msra.mxu1 %v3140_v2  ;;  %2795 = vmatprep.subr.bf16.mxu0 %v3555_v63  ;;  %v2963_v2 = vld [vmem:[%s4221_s0 + $0x60] ss:$36 sps:$4 sm:$0xff]  }
  0x46   :  { %2429 = vmatprep.subr.bf16.mxu1 %v3152_v4  ;;  %841 = vmatprep.mubr.bf16.mxu0 %v2957_v33  ;;  %v3586_v4 = vld [vmem:[%s4220_s1 + $0x218] sm:$0xff]   ;;  %v3598_v33 = vld [vmem:[%s4220_s1 + $0x220] sm:$0xff]  }
  0x47   :  { %4266 = vst [vmem:[#allocation13_spill] sm:$0xff] %v3586_v4  ;;  %890 = vmatprep.mubr.bf16.mxu1 %v2961_v35  ;;  %4267 = vst [vmem:[#allocation14_spill] sm:$0xff] %v3598_v33  ;;  %v3610_v35 = vld [vmem:[%s4220_s1 + $0x228] sm:$0xff]  }
  0x48   :  { %2796 = vmatpush3.bf16.msra.mxu0 %v3555_v63  ;;  %4268 = vst [vmem:[#allocation15_spill] sm:$0xff] %v3610_v35 }
  0x49   :  { %2430 = vmatpush3.bf16.msra.mxu1 %v3164_v6  ;;  %2797 = vmatprep.subr.bf16.mxu0 %v3568_v0 }
  0x4a   :  { %2431 = vmatprep.subr.bf16.mxu1 %v3176_v8 }
  0x4b   :  { %842 = vmatmul.mubr.bf16.gmra.mrb[12].mxu0 %v2959_v61  ;;  %v2973_v61 = vld [vmem:[%s4221_s0 + $0x94] ss:$36 sps:$4 sm:$0xff]  }
  0x4c   :  { %891 = vmatmul.mubr.bf16.gmra.mrb[12].mxu1 %v2963_v2  ;;  %2798 = vmatpush3.bf16.msra.mxu0 %v3568_v0  ;;  %v3619_v2 = vld [vmem:[%s4220_s1 + $0x230] sm:$0xff]  }
  0x4d   :  { %2432 = vmatpush3.bf16.msra.mxu1 %v3188_v10  ;;  %2799 = vmatprep.subr.bf16.mxu0 %v3586_v4  ;;  %4269 = vst [vmem:[#allocation16_spill] sm:$0xff] %v3619_v2 }
  0x4e   :  { %2433 = vmatprep.subr.bf16.mxu1 %v3200_v12  ;;  %2809 = vmatprep.mubr.bf16.mxu0 %v2969_v59  ;;  %v3628_v59 = vld [vmem:[%s4220_s1 + $0x238] sm:$0xff]  }
  0x4f   :  { %1093 = vmatprep.mubr.bf16.mxu1 %v2973_v61  ;;  %4270 = vst [vmem:[#allocation17_spill] sm:$0xff] %v3628_v59  ;;  %v2970_v61 = vld [vmem:[%s4221_s0 + $0x68] ss:$36 sps:$4 sm:$0xff]  }
  0x50   :  { %2800 = vmatpush3.bf16.msra.mxu0 %v3586_v4 }
  0x51   :  { %2434 = vmatpush3.bf16.msra.mxu1 %v3212_v14  ;;  %2801 = vmatprep.subr.bf16.mxu0 %v3598_v33 }
  0x52   :  { %2435 = vmatprep.subr.bf16.mxu1 %v3224_v16 }
  0x54   :  { %2802 = vmatpush3.bf16.msra.mxu0 %v3598_v33 }
  0x55   :  { %2436 = vmatpush3.bf16.msra.mxu1 %v3236_v18  ;;  %2803 = vmatprep.subr.bf16.mxu0 %v3610_v35 }
  0x56   :  { %2437 = vmatprep.subr.bf16.mxu1 %v3248_v20 }
  0x58   :  { %2804 = vmatpush3.bf16.msra.mxu0 %v3610_v35 }
  0x59   :  { %2438 = vmatpush3.bf16.msra.mxu1 %v3260_v22  ;;  %2805 = vmatprep.subr.bf16.mxu0 %v3619_v2 }
  0x5a   :  { %2439 = vmatprep.subr.bf16.mxu1 %v3272_v24  ;;  %v2971_v24 = vld [vmem:[%s4221_s0 + $0x90] ss:$36 sps:$4 sm:$0xff]  }
  0x5c   :  { %2806 = vmatpush3.bf16.msra.mxu0 %v3619_v2 }
  0x5d   :  { %2440 = vmatpush3.bf16.msra.mxu1 %v3284_v26  ;;  %2807 = vmatprep.subr.bf16.mxu0 %v3628_v59  ;;  %v2974_v26 = vld [vmem:[%s4221_s0 + $0xdc] ss:$36 sps:$4 sm:$0xff]  }
  0x5e   :  { %2441 = vmatprep.subr.bf16.mxu1 %v3296_v28  ;;  %v2979_v28 = vld [vmem:[%s4221_s0 + $0x9c] ss:$36 sps:$4 sm:$0xff]  }
  0x60   :  { %2808 = vmatpush3.bf16.msra.mxu0 %v3628_v59 }
  0x61   :  { %2442 = vmatpush3.bf16.msra.mxu1 %v3308_v30  ;;  %2455 = vmatprep.subr.bf16.mxu0 %v3134_v1  ;;  %v2976_v1 = vld [vmem:[%s4221_s0 + $0xd8] ss:$36 sps:$4 sm:$0xff]  }
  0x62   :  { %2483 = vmatprep.subr.bf16.mxu1 %v3333_v36 }
  0x63   :  { %2810 = vmatmul.mubr.bf16.vlgmr.msra.gmra.mrb[16].mxu0 %v2970_v61  ;;  %v2986_v61 = vld [vmem:[%s4221_s0 + $0xec] ss:$36 sps:$4 sm:$0xff]  }
  0x64   :  { %1094 = vmatmul.mubr.bf16.vlgmr.msra.gmra.mrb[16].mxu1 %v2971_v24  ;;  %2456 = vmatpush3.bf16.msra.mxu0 %v3146_v3  ;;  %v2982_v3 = vld [vmem:[%s4221_s0 + $0xa4] ss:$36 sps:$4 sm:$0xff]   ;;  %v2977_v24 = vld [vmem:[%s4221_s0 + $0x98] ss:$36 sps:$4 sm:$0xff]  }
  0x65   :  { %2484 = vmatpush3.bf16.msra.mxu1 %v3344_v38  ;;  %2457 = vmatprep.subr.bf16.mxu0 %v3158_v5 }
  0x66   :  { %2485 = vmatprep.subr.bf16.mxu1 %v3356_v40  ;;  %1101 = vmatprep.mubr.bf16.mxu1 %v2974_v26  ;;  %v2980_v26 = vld [vmem:[%s4221_s0 + $0xa0] ss:$36 sps:$4 sm:$0xff]  }
  0x67   :  { %1142 = vmatprep.mubr.bf16.mxu0 %v2979_v28  ;;  %v2983_v28 = vld [vmem:[%s4221_s0 + $0xe4] ss:$36 sps:$4 sm:$0xff]  }
  0x68   :  { %2458 = vmatpush3.bf16.msra.mxu0 %v3170_v7 }
  0x69   :  { %2486 = vmatpush3.bf16.msra.mxu1 %v3368_v42  ;;  %2459 = vmatprep.subr.bf16.mxu0 %v3182_v9 }
  0x6a   :  { %2487 = vmatprep.subr.bf16.mxu1 %v3380_v44 }
  0x6c   :  { %1102 = vmatmul.mubr.bf16.gmra.mrb[20].mxu1 %v2976_v1  ;;  %2460 = vmatpush3.bf16.msra.mxu0 %v3194_v11  ;;  %v2985_v1 = vld [vmem:[%s4221_s0 + $0xe0] ss:$36 sps:$4 sm:$0xff]  }
  0x6d   :  { %2488 = vmatpush3.bf16.msra.mxu1 %v3392_v46  ;;  %2461 = vmatprep.subr.bf16.mxu0 %v3206_v13 }
  0x6e   :  { %2489 = vmatprep.subr.bf16.mxu1 %v3404_v48  ;;  %1191 = vmatprep.mubr.bf16.mxu1 %v2982_v3  ;;  %v2988_v3 = vld [vmem:[%s4221_s0 + $0xe8] ss:$36 sps:$4 sm:$0xff]  }
  0x70   :  { %2462 = vmatpush3.bf16.msra.mxu0 %v3218_v15 }
  0x71   :  { %2490 = vmatpush3.bf16.msra.mxu1 %v3416_v50  ;;  %2463 = vmatprep.subr.bf16.mxu0 %v3230_v17 }
  0x72   :  { %2491 = vmatprep.subr.bf16.mxu1 %v3428_v52 }
  0x74   :  { %2464 = vmatpush3.bf16.msra.mxu0 %v3242_v19 }
  0x75   :  { %2492 = vmatpush3.bf16.msra.mxu1 %v3440_v54  ;;  %2465 = vmatprep.subr.bf16.mxu0 %v3254_v21 }
  0x76   :  { %2493 = vmatprep.subr.bf16.mxu1 %v3452_v56 }
  0x78   :  { %2466 = vmatpush3.bf16.msra.mxu0 %v3266_v23 }
  0x79   :  { %2494 = vmatpush3.bf16.msra.mxu1 %v3471_v60  ;;  %2467 = vmatprep.subr.bf16.mxu0 %v3278_v25 }
  0x7a   :  { %2495 = vmatprep.subr.bf16.mxu1 %v3489_v32 }
  0x7c   :  { %2468 = vmatpush3.bf16.msra.mxu0 %v3290_v27 }
  0x7d   :  { %2496 = vmatpush3.bf16.msra.mxu1 %v3500_v34  ;;  %2469 = vmatprep.subr.bf16.mxu0 %v3302_v29 }
  0x7e   :  { %2497 = vmatprep.subr.bf16.mxu1 %v3512_v58 }
  0x80   :  { %2470 = vmatpush3.bf16.msra.mxu0 %v3314_v31 }
  0x81   :  { %2498 = vmatpush3.bf16.msra.mxu1 %v3524_v62  ;;  %2511 = vmatprep.subr.bf16.mxu0 %v3338_v37 }
  0x82   :  { %2813 = vmatprep.subr.bf16.mxu1 %v3549_v57 }
  0x83   :  { %1143 = vmatmul.mubr.bf16.vlgmr.msra.gmra.mrb[20].mxu0 %v2977_v24  ;;  %v2991_v24 = vld [vmem:[%s4221_s0 + $0xac] ss:$36 sps:$4 sm:$0xff]  }
  0x84   :  { %1192 = vmatmul.mubr.bf16.vlgmr.msra.gmra.mrb[24].mxu1 %v2980_v26  ;;  %2512 = vmatpush3.bf16.msra.mxu0 %v3350_v39  ;;  %v2992_v26 = vld [vmem:[%s4221_s0 + $0xb0] ss:$36 sps:$4 sm:$0xff]  }
  0x85   :  { %2814 = vmatpush3.bf16.msra.mxu1 %v3549_v57  ;;  %2513 = vmatprep.subr.bf16.mxu0 %v3362_v41 }
  0x86   :  { %2815 = vmatprep.subr.bf16.mxu1 %v3555_v63  ;;  %1150 = vmatprep.mubr.bf16.mxu0 %v2983_v28  ;;  %v4271_v28 = vld [vmem:[#allocation5_spill] sm:$0xff] }
  0x87   :  { %1199 = vmatprep.mubr.bf16.mxu1 %v2986_v61  ;;  %v4272_v61 = vld [vmem:[#allocation6_spill] sm:$0xff] }
  0x88   :  { %2514 = vmatpush3.bf16.msra.mxu0 %v3374_v43 }
  0x89   :  { %2816 = vmatpush3.bf16.msra.mxu1 %v3555_v63  ;;  %2515 = vmatprep.subr.bf16.mxu0 %v3386_v45  ;;  %v3769_v63 = vld [vmem:[%s4220_s1] sm:$0xff]  }
  0x8a   :  { %2817 = vmatprep.subr.bf16.mxu1 %v3568_v0 }
  0x8b   :  { %1151 = vmatmul.mubr.bf16.gmra.mrb[24].mxu0 %v2985_v1  ;;  %v4273_v1 = vld [vmem:[#allocation7_spill] sm:$0xff] }
  0x8c   :  { %1200 = vmatmul.mubr.bf16.gmra.mrb[28].mxu1 %v2988_v3  ;;  %2516 = vmatpush3.bf16.msra.mxu0 %v3398_v47  ;;  %v4274_v3 = vld [vmem:[#allocation8_spill] sm:$0xff] }
  0x8d   :  { %2818 = vmatpush3.bf16.msra.mxu1 %v3568_v0  ;;  %2517 = vmatprep.subr.bf16.mxu0 %v3410_v49  ;;  %v2994_v0 = vld [vmem:[%s4221_s0 + $0xf4] ss:$36 sps:$4 sm:$0xff]  }
  0x8e   :  { %2819 = vmatprep.subr.bf16.mxu1 %v3586_v4  ;;  %1240 = vmatprep.mubr.bf16.mxu0 %v2991_v24  ;;  %v4275_v24 = vld [vmem:[#allocation9_spill] sm:$0xff] }
  0x8f   :  { %2829 = vmatprep.mubr.bf16.mxu1 %v2992_v26  ;;  %v2989_v26 = vld [vmem:[%s4221_s0 + $0xa8] ss:$36 sps:$4 sm:$0xff]  }
  0x90   :  { %2518 = vmatpush3.bf16.msra.mxu0 %v3422_v51 }
  0x91   :  { %2820 = vmatpush3.bf16.msra.mxu1 %v3586_v4  ;;  %2519 = vmatprep.subr.bf16.mxu0 %v3434_v53  ;;  %v3757_v4 = vld [vmem:[%s4220_s1 + $0xc0] sm:$0xff]  }
  0x92   :  { %2821 = vmatprep.subr.bf16.mxu1 %v3598_v33  ;;  %4278 = vst [vmem:[#allocation6_spill] sm:$0xff] %v3757_v4 }
  0x94   :  { %2520 = vmatpush3.bf16.msra.mxu0 %v3446_v55 }
  0x95   :  { %2822 = vmatpush3.bf16.msra.mxu1 %v3598_v33  ;;  %2521 = vmatprep.subr.bf16.mxu0 %v4271_v28  ;;  %v4276_v33 = vld [vmem:[#allocation10_spill] sm:$0xff] }
  0x96   :  { %2823 = vmatprep.subr.bf16.mxu1 %v3610_v35 }
  0x98   :  { %2522 = vmatpush3.bf16.msra.mxu0 %v4272_v61 }
  0x99   :  { %2824 = vmatpush3.bf16.msra.mxu1 %v3610_v35  ;;  %2523 = vmatprep.subr.bf16.mxu0 %v4273_v1  ;;  %v2993_v35 = vld [vmem:[%s4221_s0 + $0xf8] ss:$36 sps:$4 sm:$0xff]  }
  0x9a   :  { %2825 = vmatprep.subr.bf16.mxu1 %v3619_v2 }
  0x9c   :  { %2524 = vmatpush3.bf16.msra.mxu0 %v4274_v3 }
  0x9d   :  { %2826 = vmatpush3.bf16.msra.mxu1 %v3619_v2  ;;  %2525 = vmatprep.subr.bf16.mxu0 %v4275_v24  ;;  %v3751_v2 = vld [vmem:[%s4220_s1 + $0x40] sm:$0xff]  }
  0x9e   :  { %2827 = vmatprep.subr.bf16.mxu1 %v3628_v59  ;;  %4277 = vst [vmem:[#allocation5_spill] sm:$0xff] %v3751_v2 }
  0xa0   :  { %2526 = vmatpush3.bf16.msra.mxu0 %v4276_v33 }
  0xa1   :  { %2828 = vmatpush3.bf16.msra.mxu1 %v3628_v59  ;;  %2549 = vmatprep.subr.bf16.mxu0 %v3751_v2  ;;  %v3002_v59 = vld [vmem:[%s4221_s0 + $0x12c] ss:$36 sps:$4 sm:$0xff]  }
  0xa2   :  { %2577 = vmatprep.subr.bf16.mxu1 %v3757_v4  ;;  %v3775_v4 = vld [vmem:[%s4220_s1 + $0x80] sm:$0xff]   ;;  %v3781_v2 = vld [vmem:[%s4220_s1 + $0x48] sm:$0xff]  }
  0xa3   :  { %1241 = vmatmul.mubr.bf16.vlgmr.msra.gmra.mrb[28].mxu0 %v2989_v26  ;;  %v2999_v26 = vld [vmem:[%s4221_s0 + $0x124] ss:$36 sps:$4 sm:$0xff]  }
  0xa4   :  { %2830 = vmatmul.mubr.bf16.vlgmr.msra.gmra.mrb[32].mxu1 %v2993_v35  ;;  %2550 = vmatpush3.bf16.msra.mxu0 %v3769_v63  ;;  %v2996_v35 = vld [vmem:[%s4221_s0 + $0xf0] ss:$36 sps:$4 sm:$0xff]  }
  0xa5   :  { %2578 = vmatpush3.bf16.msra.mxu1 %v3775_v4  ;;  %2551 = vmatprep.subr.bf16.mxu0 %v3781_v2 }
  0xa6   :  { %2579 = vmatprep.subr.bf16.mxu1 %v3158_v5  ;;  %1248 = vmatprep.mubr.bf16.mxu0 %v2994_v0  ;;  %v4279_v5 = vld [vmem:[#allocation2_spill] sm:$0xff] }
  0xa7   :  { %1504 = vmatprep.mubr.bf16.mxu1 %v3002_v59  ;;  %v3062_v59 = vld [vmem:[%s4220_s1 + $0x28] sm:$0xff]  }
  0xa8   :  { %2552 = vmatpush3.bf16.msra.mxu0 %v3164_v6  ;;  %v4280_v6 = vld [vmem:[#allocation3_spill] sm:$0xff] }
  0xa9   :  { %2580 = vmatpush3.bf16.msra.mxu1 %v3170_v7  ;;  %2553 = vmatprep.subr.bf16.mxu0 %v3176_v8  ;;  %v4281_v7 = vld [vmem:[#allocation4_spill] sm:$0xff]  ;;  %v2997_v8 = vld [vmem:[%s4221_s0 + $0x120] ss:$36 sps:$4 sm:$0xff]  }
  0xaa   :  { %2581 = vmatprep.subr.bf16.mxu1 %v3182_v9  ;;  %v3000_v9 = vld [vmem:[%s4221_s0 + $0x128] ss:$36 sps:$4 sm:$0xff]  }
  0xab   :  { %1249 = vmatmul.mubr.bf16.gmra.mrb[32].mxu0 %v2996_v35  ;;  %v3022_v35 = vld [vmem:[%s4221_s0 + $0x188] ss:$36 sps:$4 sm:$0xff]  }
  0xac   :  { %2554 = vmatpush3.bf16.msra.mxu0 %v3188_v10  ;;  %1455 = vmatprep.mubr.bf16.mxu0 %v2999_v26  ;;  %v3003_v10 = vld [vmem:[%s4221_s0 + $0x16c] ss:$36 sps:$4 sm:$0xff]  }
  0xad   :  { %2582 = vmatpush3.bf16.msra.mxu1 %v3194_v11  ;;  %2555 = vmatprep.subr.bf16.mxu0 %v3200_v12  ;;  %v3005_v11 = vld [vmem:[%s4221_s0 + $0x174] ss:$36 sps:$4 sm:$0xff]   ;;  %v3007_v12 = vld [vmem:[%s4221_s0 + $0x168] ss:$36 sps:$4 sm:$0xff]  }
  0xae   :  { %2583 = vmatprep.subr.bf16.mxu1 %v3206_v13  ;;  %v3008_v13 = vld [vmem:[%s4221_s0 + $0x170] ss:$36 sps:$4 sm:$0xff]  }
  0xaf   :  { %v3023_v26 = vld [vmem:[%s4221_s0 + $0x1b0] ss:$36 sps:$4 sm:$0xff]  }
  0xb0   :  { %2556 = vmatpush3.bf16.msra.mxu0 %v3212_v14  ;;  %v3011_v14 = vld [vmem:[%s4221_s0 + $0x134] ss:$36 sps:$4 sm:$0xff]  }
  0xb1   :  { %2584 = vmatpush3.bf16.msra.mxu1 %v3218_v15  ;;  %2557 = vmatprep.subr.bf16.mxu0 %v3224_v16  ;;  %v3014_v15 = vld [vmem:[%s4221_s0 + $0x13c] ss:$36 sps:$4 sm:$0xff]   ;;  %v3009_v16 = vld [vmem:[%s4221_s0 + $0x130] ss:$36 sps:$4 sm:$0xff]  }
  0xb2   :  { %2585 = vmatprep.subr.bf16.mxu1 %v3230_v17  ;;  %v3012_v17 = vld [vmem:[%s4221_s0 + $0x138] ss:$36 sps:$4 sm:$0xff]  }
  0xb4   :  { %2558 = vmatpush3.bf16.msra.mxu0 %v3236_v18  ;;  %v4282_v18 = vld [vmem:[#allocation5_spill] sm:$0xff] }
  0xb5   :  { %2586 = vmatpush3.bf16.msra.mxu1 %v3242_v19  ;;  %2559 = vmatprep.subr.bf16.mxu0 %v3248_v20  ;;  %v3015_v19 = vld [vmem:[%s4221_s0 + $0x17c] ss:$36 sps:$4 sm:$0xff]   ;;  %v3018_v20 = vld [vmem:[%s4221_s0 + $0x184] ss:$36 sps:$4 sm:$0xff]  }
  0xb6   :  { %2587 = vmatprep.subr.bf16.mxu1 %v3254_v21  ;;  %v4283_v21 = vld [vmem:[#allocation11_spill] sm:$0xff] }
  0xb8   :  { %2560 = vmatpush3.bf16.msra.mxu0 %v3260_v22  ;;  %v3017_v22 = vld [vmem:[%s4221_s0 + $0x178] ss:$36 sps:$4 sm:$0xff]  }
  0xb9   :  { %2588 = vmatpush3.bf16.msra.mxu1 %v3266_v23  ;;  %2561 = vmatprep.subr.bf16.mxu0 %v4279_v5  ;;  %v3020_v23 = vld [vmem:[%s4221_s0 + $0x180] ss:$36 sps:$4 sm:$0xff]   ;;  %v3066_v5 = vld [vmem:[%s4220_s1 + $0x38] sm:$0xff]  }
  0xba   :  { %2589 = vmatprep.subr.bf16.mxu1 %v3278_v25  ;;  %v3054_v25 = vld [vmem:[%s4220_s1 + $0x8] sm:$0xff]  }
  0xbc   :  { %2562 = vmatpush3.bf16.msra.mxu0 %v4280_v6  ;;  %v4290_v6 = vld [vmem:[#allocation6_spill] sm:$0xff] }
  0xbd   :  { %2590 = vmatpush3.bf16.msra.mxu1 %v3290_v27  ;;  %2563 = vmatprep.subr.bf16.mxu0 %v4281_v7  ;;  %v4284_v27 = vld [vmem:[#allocation12_spill] sm:$0xff]  ;;  %v3067_v7 = vld [vmem:[%s4220_s1 + $0x140] sm:$0xff]  }
  0xbe   :  { %2591 = vmatprep.subr.bf16.mxu1 %v3302_v29  ;;  %v3055_v29 = vld [vmem:[%s4220_s1 + $0x50] sm:$0xff]  }
  0xc0   :  { %2564 = vmatpush3.bf16.msra.mxu0 %v3308_v30  ;;  %v3021_v30 = vld [vmem:[%s4221_s0 + $0x140] ss:$36 sps:$4 sm:$0xff]  }
  0xc1   :  { %2592 = vmatpush3.bf16.msra.mxu1 %v3314_v31  ;;  %2605 = vmatprep.subr.bf16.mxu0 %v3333_v36  ;;  %v3025_v31 = vld [vmem:[%s4221_s0 + $0x1b4] ss:$36 sps:$4 sm:$0xff]  }
  0xc2   :  { %2633 = vmatprep.subr.bf16.mxu1 %v3338_v37  ;;  %v3056_v36 = vld [vmem:[%s4220_s1 + $0x10] sm:$0xff]   ;;  %v4285_v37 = vld [vmem:[#allocation13_spill] sm:$0xff] }
  0xc3   :  { %1456 = vmatmul.mubr.bf16.vlgmr.msra.gmra.mrb[36].mxu0 %v2997_v8  ;;  %v3026_v8 = vld [vmem:[%s4221_s0 + $0x1fc] ss:$36 sps:$4 sm:$0xff]  }
  0xc4   :  { %1505 = vmatmul.mubr.bf16.vlgmr.msra.gmra.mrb[36].mxu1 %v3000_v9  ;;  %2606 = vmatpush3.bf16.msra.mxu0 %v3344_v38  ;;  %v3057_v38 = vld [vmem:[%s4220_s1 + $0x58] sm:$0xff]  }
  0xc5   :  { %2634 = vmatpush3.bf16.msra.mxu1 %v3350_v39  ;;  %2607 = vmatprep.subr.bf16.mxu0 %v3356_v40  ;;  %v3058_v39 = vld [vmem:[%s4220_s1 + $0x18] sm:$0xff]  }
  0xc6   :  { %2635 = vmatprep.subr.bf16.mxu1 %v3362_v41  ;;  %1463 = vmatprep.mubr.bf16.mxu0 %v3003_v10  ;;  %v4286_v41 = vld [vmem:[#allocation14_spill] sm:$0xff] }
  0xc7   :  { %1512 = vmatprep.mubr.bf16.mxu1 %v3005_v11  ;;  %v3031_v9 = vld [vmem:[%s4221_s0 + $0x1bc] ss:$36 sps:$4 sm:$0xff]   ;;  %v3069_v11 = vld [vmem:[%s4220_s1 + $0xc8] sm:$0xff]  }
  0xc8   :  { %2608 = vmatpush3.bf16.msra.mxu0 %v3368_v42  ;;  %v3059_v42 = vld [vmem:[%s4220_s1 + $0x60] sm:$0xff]  }
  0xc9   :  { %2636 = vmatpush3.bf16.msra.mxu1 %v3374_v43  ;;  %2609 = vmatprep.subr.bf16.mxu0 %v3380_v44  ;;  %v3068_v10 = vld [vmem:[%s4220_s1 + $0x100] sm:$0xff]  }
  0xca   :  { %2637 = vmatprep.subr.bf16.mxu1 %v3386_v45 }
  0xcb   :  { %1464 = vmatmul.mubr.bf16.gmra.mrb[40].mxu0 %v3007_v12  ;;  %v3070_v12 = vld [vmem:[%s4220_s1 + $0x148] sm:$0xff]  }
  0xcc   :  { %1513 = vmatmul.mubr.bf16.gmra.mrb[40].mxu1 %v3008_v13  ;;  %2610 = vmatpush3.bf16.msra.mxu0 %v3392_v46  ;;  %v3071_v13 = vld [vmem:[%s4220_s1 + $0x88] sm:$0xff]  }
  0xcd   :  { %2638 = vmatpush3.bf16.msra.mxu1 %v3398_v47  ;;  %2611 = vmatprep.subr.bf16.mxu0 %v3404_v48 }
  0xce   :  { %2639 = vmatprep.subr.bf16.mxu1 %v3410_v49  ;;  %1553 = vmatprep.mubr.bf16.mxu0 %v3011_v14  ;;  %v3072_v14 = vld [vmem:[%s4220_s1 + $0x108] sm:$0xff]  }
  0xcf   :  { %1602 = vmatprep.mubr.bf16.mxu1 %v3014_v15  ;;  %v3073_v15 = vld [vmem:[%s4220_s1 + $0xd0] sm:$0xff]  }
  0xd0   :  { %2612 = vmatpush3.bf16.msra.mxu0 %v3416_v50 }
  0xd1   :  { %2640 = vmatpush3.bf16.msra.mxu1 %v3422_v51  ;;  %2613 = vmatprep.subr.bf16.mxu0 %v3428_v52  ;;  %v3060_v51 = vld [vmem:[%s4220_s1 + $0x20] sm:$0xff]  }
  0xd2   :  { %2641 = vmatprep.subr.bf16.mxu1 %v3434_v53 }
  0xd4   :  { %2614 = vmatpush3.bf16.msra.mxu0 %v3440_v54 }
  0xd5   :  { %2642 = vmatpush3.bf16.msra.mxu1 %v3446_v55  ;;  %2615 = vmatprep.subr.bf16.mxu0 %v3452_v56 }
  0xd6   :  { %2643 = vmatprep.subr.bf16.mxu1 %v4271_v28  ;;  %v4288_v28 = vld [vmem:[#allocation16_spill] sm:$0xff] }
  0xd8   :  { %2616 = vmatpush3.bf16.msra.mxu0 %v3471_v60 }
  0xd9   :  { %2644 = vmatpush3.bf16.msra.mxu1 %v4272_v61  ;;  %2617 = vmatprep.subr.bf16.mxu0 %v3489_v32  ;;  %v3063_v61 = vld [vmem:[%s4220_s1 + $0x70] sm:$0xff]  }
  0xda   :  { %2645 = vmatprep.subr.bf16.mxu1 %v4273_v1  ;;  %v3064_v1 = vld [vmem:[%s4220_s1 + $0x30] sm:$0xff]  }
  0xdc   :  { %2618 = vmatpush3.bf16.msra.mxu0 %v3500_v34 }
  0xdd   :  { %2646 = vmatpush3.bf16.msra.mxu1 %v4274_v3  ;;  %2619 = vmatprep.subr.bf16.mxu0 %v3512_v58  ;;  %v4289_v3 = vld [vmem:[#allocation17_spill] sm:$0xff] }
  0xde   :  { %2647 = vmatprep.subr.bf16.mxu1 %v4275_v24  ;;  %v3065_v24 = vld [vmem:[%s4220_s1 + $0x78] sm:$0xff]  }
  0xe0   :  { %2620 = vmatpush3.bf16.msra.mxu0 %v3524_v62 }
  0xe1   :  { %2648 = vmatpush3.bf16.msra.mxu1 %v4276_v33  ;;  %2833 = vmatprep.subr.bf16.mxu0 %v3549_v57  ;;  %v3061_v33 = vld [vmem:[%s4220_s1 + $0x68] sm:$0xff]  }
  0xe2   :  { %2671 = vmatprep.subr.bf16.mxu1 %v4282_v18  ;;  %v3034_v18 = vld [vmem:[%s4221_s0 + $0x1c4] ss:$36 sps:$4 sm:$0xff]  }
  0xe3   :  { %1554 = vmatmul.mubr.bf16.vlgmr.msra.gmra.mrb[44].mxu0 %v3009_v16  ;;  %v3074_v16 = vld [vmem:[%s4220_s1 + $0x150] sm:$0xff]  }
  0xe4   :  { %1603 = vmatmul.mubr.bf16.vlgmr.msra.gmra.mrb[44].mxu1 %v3012_v17  ;;  %2834 = vmatpush3.bf16.msra.mxu0 %v3549_v57 }
  0xe5   :  { %2672 = vmatpush3.bf16.msra.mxu1 %v3769_v63  ;;  %2835 = vmatprep.subr.bf16.mxu0 %v4283_v21  ;;  %v4287_v63 = vld [vmem:[#allocation15_spill] sm:$0xff] }
  0xe6   :  { %2673 = vmatprep.subr.bf16.mxu1 %v3781_v2  ;;  %1561 = vmatprep.mubr.bf16.mxu0 %v3015_v19 }
  0xe7   :  { %1610 = vmatprep.mubr.bf16.mxu1 %v3018_v20 }
  0xe8   :  { %2836 = vmatpush3.bf16.msra.mxu0 %v4283_v21 }
  0xe9   :  { %2674 = vmatpush3.bf16.msra.mxu1 %v3054_v25  ;;  %2837 = vmatprep.subr.bf16.mxu0 %v4284_v27 }
  0xea   :  { %2675 = vmatprep.subr.bf16.mxu1 %v3055_v29 }
  0xeb   :  { %1562 = vmatmul.mubr.bf16.gmra.mrb[48].mxu0 %v3017_v22  ;;  %v3075_v22 = vld [vmem:[%s4220_s1 + $0x90] sm:$0xff]  }
  0xec   :  { %1611 = vmatmul.mubr.bf16.gmra.mrb[48].mxu1 %v3020_v23  ;;  %2838 = vmatpush3.bf16.msra.mxu0 %v4284_v27 }
  0xed   :  { %2676 = vmatpush3.bf16.msra.mxu1 %v3056_v36  ;;  %2839 = vmatprep.subr.bf16.mxu0 %v4285_v37 }
  0xee   :  { %2677 = vmatprep.subr.bf16.mxu1 %v3057_v38  ;;  %2849 = vmatprep.mubr.bf16.mxu0 %v3021_v30  ;;  %v3076_v30 = vld [vmem:[%s4220_s1 + $0x110] sm:$0xff]  }
  0xef   :  { %1817 = vmatprep.mubr.bf16.mxu1 %v3025_v31 }
  0xf0   :  { %2840 = vmatpush3.bf16.msra.mxu0 %v4285_v37 }
  0xf1   :  { %2678 = vmatpush3.bf16.msra.mxu1 %v3058_v39  ;;  %2841 = vmatprep.subr.bf16.mxu0 %v4286_v41  ;;  %v3077_v39 = vld [vmem:[%s4220_s1 + $0xd8] sm:$0xff]  }
  0xf2   :  { %2679 = vmatprep.subr.bf16.mxu1 %v3059_v42 }
  0xf4   :  { %2842 = vmatpush3.bf16.msra.mxu0 %v4286_v41 }
  0xf5   :  { %2680 = vmatpush3.bf16.msra.mxu1 %v3060_v51  ;;  %2843 = vmatprep.subr.bf16.mxu0 %v4287_v63  ;;  %v3083_v51 = vld [vmem:[%s4220_s1 + $0xa0] sm:$0xff]  }
  0xf6   :  { %v2321_v40 = vpop.f32.mrb[0].mxu0  ;;  %2681 = vmatprep.subr.bf16.mxu1 %v3061_v33 }
  0xf7   :  { %v2349_v43 = vpop.f32.mrb[0].mxu1  ;;  %v2322_v44 = vpop.f32.mrb[1].mxu0 }
  0xf8   :  { %v2323_v45 = vadd.f32 %v2322_v44, %v2321_v40  ;;  %v2350_v46 = vpop.f32.mrb[1].mxu1  ;;  %v2324_v47 = vpop.f32.mrb[2].mxu0  ;;  %2844 = vmatpush3.bf16.msra.mxu0 %v4287_v63  ;;  %v3078_v40 = vld [vmem:[%s4220_s1 + $0x158] sm:$0xff]  }
  0xf9   :  { %v2351_v48 = vadd.f32 %v2350_v46, %v2349_v43  ;;  %v2352_v49 = vpop.f32.mrb[2].mxu1  ;;  %v2325_v50 = vpop.f32.mrb[3].mxu0  ;;  %2682 = vmatpush3.bf16.msra.mxu1 %v3062_v59  ;;  %2845 = vmatprep.subr.bf16.mxu0 %v4288_v28  ;;  %v3079_v46 = vld [vmem:[%s4220_s1 + $0x98] sm:$0xff]  }
  0xfa   :  { %v2326_v52 = vadd.f32 %v2325_v50, %v2324_v47  ;;  %v2353_v53 = vpop.f32.mrb[3].mxu1  ;;  %2683 = vmatprep.subr.bf16.mxu1 %v3063_v61  ;;  %v3080_v47 = vld [vmem:[%s4220_s1 + $0x118] sm:$0xff]   ;;  %v3082_v50 = vld [vmem:[%s4220_s1 + $0x160] sm:$0xff]  }
  0xfb   :  { %v3931_v55 = vadd.f32 %v2351_v48, %v2323_v45  ;;  %v2354_v0 = vadd.f32 %v2353_v53, %v2352_v49  ;;  %v3081_v49 = vld [vmem:[%s4220_s1 + $0xe0] sm:$0xff]   ;;  %v3084_v53 = vld [vmem:[%s4220_s1 + $0xe8] sm:$0xff]  }
  0xfc   :  { %2846 = vmatpush3.bf16.msra.mxu0 %v4288_v28 }
  0xfd   :  { %v3937_v2 = vadd.f32 %v2354_v0, %v2326_v52  ;;  %2684 = vmatpush3.bf16.msra.mxu1 %v3064_v1  ;;  %2847 = vmatprep.subr.bf16.mxu0 %v4289_v3 }
  0xfe   :  { %2685 = vmatprep.subr.bf16.mxu1 %v3065_v24  ;;  %v2327_v17 = vpop.f32.mrb[4].mxu0  ;;  %v3085_v24 = vld [vmem:[%s4220_s1 + $0xa8] sm:$0xff]  }
  0xff   :  { %v2355_v19 = vpop.f32.mrb[4].mxu1  ;;  %v2328_v20 = vpop.f32.mrb[5].mxu0 }
 0x100   :  { %2848 = vmatpush3.bf16.msra.mxu0 %v4289_v3  ;;  %v2329_v23 = vadd.f32 %v2328_v20, %v2327_v17  ;;  %v2356_v25 = vpop.f32.mrb[5].mxu1  ;;  %v2330_v29 = vpop.f32.mrb[6].mxu0 }
 0x101   :  { %2686 = vmatpush3.bf16.msra.mxu1 %v3066_v5  ;;  %2699 = vmatprep.subr.bf16.mxu0 %v4290_v6  ;;  %v2357_v31 = vadd.f32 %v2356_v25, %v2355_v19  ;;  %v2358_v36 = vpop.f32.mrb[6].mxu1  ;;  %v2331_v38 = vpop.f32.mrb[7].mxu0  ;;  %v3035_v25 = vld [vmem:[%s4221_s0 + $0x204] ss:$36 sps:$4 sm:$0xff]  }
 0x102   :  { %2727 = vmatprep.subr.bf16.mxu1 %v3067_v7  ;;  %v2332_v42 = vadd.f32 %v2331_v38, %v2330_v29  ;;  %v2359_v43 = vpop.f32.mrb[7].mxu1  ;;  %v3092_v38 = vld [vmem:[%s4220_s1 + $0x1c8] sm:$0xff]  }
 0x103   :  { %2850 = vmatmul.mubr.bf16.vlgmr.msra.gmra.mrb[52].mxu0 %v3022_v35  ;;  %v795_v44 = vadd.f32 %v2357_v31, %v2329_v23  ;;  %v2360_v45 = vadd.f32 %v2359_v43, %v2358_v36  ;;  %v3090_v23 = vld [vmem:[%s4220_s1 + $0x1c0] sm:$0xff]   ;;  %v3094_v43 = vld [vmem:[%s4220_s1 + $0x1d0] sm:$0xff]  }
 0x104   :  { %1818 = vmatmul.mubr.bf16.vlgmr.msra.gmra.mrb[52].mxu1 %v3023_v26  ;;  %2700 = vmatpush3.bf16.msra.mxu0 %v3775_v4  ;;  %v3028_v4 = vld [vmem:[%s4221_s0 + $0x1f8] ss:$36 sps:$4 sm:$0xff]   ;;  %v3091_v36 = vld [vmem:[%s4220_s1 + $0x180] sm:$0xff]  }
 0x105   :  { %2728 = vmatpush3.bf16.msra.mxu1 %v3068_v10  ;;  %2701 = vmatprep.subr.bf16.mxu0 %v3069_v11  ;;  %v798_v48 = vadd.f32 %v2360_v45, %v2332_v42  ;;  %v3088_v11 = vld [vmem:[%s4220_s1 + $0xf8] sm:$0xff]   ;;  %v3040_v42 = vld [vmem:[%s4221_s0 + $0x208] ss:$36 sps:$4 sm:$0xff]   ;;  %v3044_v45 = vld [vmem:[%s4221_s0 + $0x1d0] ss:$36 sps:$4 sm:$0xff]  }
 0x106   :  { %2729 = vmatprep.subr.bf16.mxu1 %v3070_v12  ;;  %1825 = vmatprep.mubr.bf16.mxu1 %v3026_v8 }
 0x107   :  { %1866 = vmatprep.mubr.bf16.mxu0 %v3031_v9 }
 0x108   :  { %2702 = vmatpush3.bf16.msra.mxu0 %v3071_v13 }
 0x109   :  { %2730 = vmatpush3.bf16.msra.mxu1 %v3072_v14  ;;  %2703 = vmatprep.subr.bf16.mxu0 %v3073_v15  ;;  %v3029_v15 = vld [vmem:[%s4221_s0 + $0x1b8] ss:$36 sps:$4 sm:$0xff]  }
 0x10a   :  { %2731 = vmatprep.subr.bf16.mxu1 %v3074_v16  ;;  %v3089_v16 = vld [vmem:[%s4220_s1 + $0xb8] sm:$0xff]  }
 0x10c   :  { %1826 = vmatmul.mubr.bf16.gmra.mrb[56].mxu1 %v3028_v4  ;;  %2704 = vmatpush3.bf16.msra.mxu0 %v3075_v22 }
 0x10d   :  { %2732 = vmatpush3.bf16.msra.mxu1 %v3076_v30  ;;  %2705 = vmatprep.subr.bf16.mxu0 %v3077_v39  ;;  %v3038_v30 = vld [vmem:[%s4221_s0 + $0x20c] ss:$36 sps:$4 sm:$0xff]  }
 0x10e   :  { %2733 = vmatprep.subr.bf16.mxu1 %v3078_v40  ;;  %1915 = vmatprep.mubr.bf16.mxu1 %v3034_v18  ;;  %v3037_v40 = vld [vmem:[%s4221_s0 + $0x200] ss:$36 sps:$4 sm:$0xff]  }
 0x110   :  { %2706 = vmatpush3.bf16.msra.mxu0 %v3079_v46  ;;  %v3096_v46 = vld [vmem:[%s4220_s1 + $0x1d8] sm:$0xff]  }
 0x111   :  { %2734 = vmatpush3.bf16.msra.mxu1 %v3080_v47  ;;  %2707 = vmatprep.subr.bf16.mxu0 %v3081_v49  ;;  %v3097_v47 = vld [vmem:[%s4220_s1 + $0x198] sm:$0xff]   ;;  %v3100_v49 = vld [vmem:[%s4220_s1 + $0x1e8] sm:$0xff]  }
 0x112   :  { %2735 = vmatprep.subr.bf16.mxu1 %v3082_v50 }
 0x114   :  { %2708 = vmatpush3.bf16.msra.mxu0 %v3083_v51 }
 0x115   :  { %2736 = vmatpush3.bf16.msra.mxu1 %v3440_v54  ;;  %2709 = vmatprep.subr.bf16.mxu0 %v3084_v53 }
 0x116   :  { %v2377_v52 = vpop.f32.mrb[8].mxu0  ;;  %2737 = vmatprep.subr.bf16.mxu1 %v3452_v56  ;;  %v3086_v56 = vld [vmem:[%s4220_s1 + $0xf0] sm:$0xff]  }
 0x117   :  { %v2378_v0 = vpop.f32.mrb[9].mxu0  ;;  %v2405_v33 = vpop.f32.mrb[8].mxu1 }
 0x118   :  { %v2379_v59 = vadd.f32 %v2378_v0, %v2377_v52  ;;  %v2380_v61 = vpop.f32.mrb[10].mxu0  ;;  %v2406_v1 = vpop.f32.mrb[9].mxu1  ;;  %2710 = vmatpush3.bf16.msra.mxu0 %v3085_v24 }
 0x119   :  { %v2381_v35 = vpop.f32.mrb[11].mxu0  ;;  %v2407_v54 = vadd.f32 %v2406_v1, %v2405_v33  ;;  %v2408_v26 = vpop.f32.mrb[10].mxu1  ;;  %2738 = vmatpush3.bf16.msra.mxu1 %v3471_v60  ;;  %2711 = vmatprep.subr.bf16.mxu0 %v3086_v56  ;;  %v3087_v60 = vld [vmem:[%s4220_s1 + $0xb0] sm:$0xff]   ;;  %v3041_v56 = vld [vmem:[%s4221_s0 + $0x1c8] ss:$36 sps:$4 sm:$0xff]  }
 0x11a   :  { %v836_v5 = vadd.f32 %v2379_v59, %v3931_v55  ;;  %v2382_v6 = vadd.f32 %v2381_v35, %v2380_v61  ;;  %v2409_v7 = vpop.f32.mrb[11].mxu1  ;;  %2739 = vmatprep.subr.bf16.mxu1 %v3489_v32  ;;  %v3102_v35 = vld [vmem:[%s4220_s1 + $0x1f0] sm:$0xff]  }
 0x11b   :  { %v2410_v8 = vadd.f32 %v2409_v7, %v2408_v26 }
 0x11c   :  { %v839_v9 = vadd.f32 %v2382_v6, %v3937_v2  ;;  %v4045_v10 = vadd.f32 %v2407_v54, %v836_v5  ;;  %2712 = vmatpush3.bf16.msra.mxu0 %v3087_v60  ;;  %v3104_v6 = vld [vmem:[%s4220_s1 + $0x1f8] sm:$0xff]  }
 0x11d   :  { %2740 = vmatpush3.bf16.msra.mxu1 %v3500_v34  ;;  %2713 = vmatprep.subr.bf16.mxu0 %v3088_v11  ;;  %v3032_v34 = vld [vmem:[%s4221_s0 + $0x1c0] ss:$36 sps:$4 sm:$0xff]  }
 0x11e   :  { %v2383_v55 = vpop.f32.mrb[12].mxu0  ;;  %2741 = vmatprep.subr.bf16.mxu1 %v3512_v58  ;;  %v4055_v32 = vadd.f32 %v2410_v8, %v839_v9  ;;  %v3045_v8 = vld [vmem:[%s4221_s0 + $0x218] ss:$36 sps:$4 sm:$0xff]  }
 0x11f   :  { %v2384_v2 = vpop.f32.mrb[13].mxu0  ;;  %v2411_v12 = vpop.f32.mrb[12].mxu1 }
 0x120   :  { %v2385_v4 = vadd.f32 %v2384_v2, %v2383_v55  ;;  %v2386_v13 = vpop.f32.mrb[14].mxu0  ;;  %v2412_v14 = vpop.f32.mrb[13].mxu1  ;;  %2714 = vmatpush3.bf16.msra.mxu0 %v3089_v16  ;;  %v3048_v2 = vld [vmem:[%s4221_s0 + $0x210] ss:$36 sps:$4 sm:$0xff]  }
 0x121   :  { %v2387_v58 = vpop.f32.mrb[15].mxu0  ;;  %v2413_v17 = vadd.f32 %v2412_v14, %v2411_v12  ;;  %v2414_v18 = vpop.f32.mrb[14].mxu1  ;;  %2742 = vmatpush3.bf16.msra.mxu1 %v3524_v62  ;;  %2755 = vmatprep.subr.bf16.mxu0 %v3090_v23 }
 0x122   :  { %v844_v19 = vadd.f32 %v2385_v4, %v795_v44  ;;  %v2388_v20 = vadd.f32 %v2387_v58, %v2386_v13  ;;  %v2415_v22 = vpop.f32.mrb[15].mxu1  ;;  %2853 = vmatprep.subr.bf16.mxu1 %v3549_v57  ;;  %v3043_v44 = vld [vmem:[%s4221_s0 + $0x1cc] ss:$36 sps:$4 sm:$0xff]  }
 0x123   :  { %v2416_v29 = vadd.f32 %v2415_v22, %v2414_v18  ;;  %1867 = vmatmul.mubr.bf16.vlgmr.msra.gmra.mrb[56].mxu0 %v3029_v15 }
 0x124   :  { %v847_v62 = vadd.f32 %v2388_v20, %v798_v48  ;;  %1916 = vmatmul.mubr.bf16.vlgmr.msra.gmra.mrb[60].mxu1 %v3032_v34  ;;  %v893_v31 = vadd.f32 %v2413_v17, %v844_v19  ;;  %2756 = vmatpush3.bf16.msra.mxu0 %v3091_v36  ;;  %v3099_v48 = vld [vmem:[%s4220_s1 + $0x1a0] sm:$0xff]  }
 0x125   :  { %2854 = vmatpush3.bf16.msra.mxu1 %v3549_v57  ;;  %2757 = vmatprep.subr.bf16.mxu0 %v3092_v38  ;;  %v3093_v57 = vld [vmem:[%s4220_s1 + $0x188] sm:$0xff]  }
 0x126   :  { %1874 = vmatprep.mubr.bf16.mxu0 %v3035_v25  ;;  %v896_v39 = vadd.f32 %v2416_v29, %v847_v62  ;;  %2855 = vmatprep.subr.bf16.mxu1 %v4283_v21 }
 0x127   :  { %1923 = vmatprep.mubr.bf16.mxu1 %v3038_v30 }
 0x128   :  { %2758 = vmatpush3.bf16.msra.mxu0 %v3093_v57 }
 0x129   :  { %2856 = vmatpush3.bf16.msra.mxu1 %v4283_v21  ;;  %2759 = vmatprep.subr.bf16.mxu0 %v3094_v43  ;;  %v3095_v21 = vld [vmem:[%s4220_s1 + $0x190] sm:$0xff]  }
 0x12a   :  { %2857 = vmatprep.subr.bf16.mxu1 %v4284_v27 }
 0x12b   :  { %1875 = vmatmul.mubr.bf16.gmra.mrb[60].mxu0 %v3037_v40 }
 0x12c   :  { %1924 = vmatmul.mubr.bf16.gmra.mrb[64].mxu1 %v3040_v42  ;;  %2760 = vmatpush3.bf16.msra.mxu0 %v3095_v21 }
 0x12d   :  { %2858 = vmatpush3.bf16.msra.mxu1 %v4284_v27  ;;  %2761 = vmatprep.subr.bf16.mxu0 %v3096_v46  ;;  %v3098_v27 = vld [vmem:[%s4220_s1 + $0x1e0] sm:$0xff]  }
 0x12e   :  { %2859 = vmatprep.subr.bf16.mxu1 %v4285_v37  ;;  %1964 = vmatprep.mubr.bf16.mxu0 %v3043_v44 }
 0x12f   :  { %2869 = vmatprep.mubr.bf16.mxu1 %v3044_v45 }
 0x130   :  { %2762 = vmatpush3.bf16.msra.mxu0 %v3097_v47 }
 0x131   :  { %2860 = vmatpush3.bf16.msra.mxu1 %v4285_v37  ;;  %2763 = vmatprep.subr.bf16.mxu0 %v3098_v27 }
 0x132   :  { %2861 = vmatprep.subr.bf16.mxu1 %v4286_v41 }
 0x134   :  { %2764 = vmatpush3.bf16.msra.mxu0 %v3099_v48 }
 0x135   :  { %2862 = vmatpush3.bf16.msra.mxu1 %v4286_v41  ;;  %2765 = vmatprep.subr.bf16.mxu0 %v3100_v49  ;;  %v3101_v41 = vld [vmem:[%s4220_s1 + $0x1a8] sm:$0xff]  }
 0x136   :  { %2863 = vmatprep.subr.bf16.mxu1 %v4287_v63  ;;  %v2811_v37 = vpop.f32.mrb[16].mxu0 }
 0x137   :  { %v2443_v50 = vpop.f32.mrb[16].mxu1  ;;  %v4129_v51 = vadd.f32 %v2811_v37, %v893_v31  ;;  %v933_v52 = vpop.f32.mrb[17].mxu0 }
 0x138   :  { %v2444_v53 = vpop.f32.mrb[17].mxu1  ;;  %v4132_v0 = vadd.f32 %v933_v52, %v4045_v10  ;;  %v2812_v33 = vpop.f32.mrb[18].mxu0  ;;  %2766 = vmatpush3.bf16.msra.mxu0 %v3101_v41  ;;  %v3046_v10 = vld [vmem:[%s4221_s0 + $0x214] ss:$36 sps:$4 sm:$0xff]  }
 0x139   :  { %2864 = vmatpush3.bf16.msra.mxu1 %v4287_v63  ;;  %v2445_v59 = vadd.f32 %v2444_v53, %v2443_v50  ;;  %v2446_v61 = vpop.f32.mrb[18].mxu1  ;;  %v4138_v1 = vadd.f32 %v2812_v33, %v896_v39  ;;  %v936_v24 = vpop.f32.mrb[19].mxu0  ;;  %2767 = vmatprep.subr.bf16.mxu0 %v3102_v35  ;;  %v3103_v63 = vld [vmem:[%s4220_s1 + $0x1b0] sm:$0xff]  }
 0x13a   :  { %2865 = vmatprep.subr.bf16.mxu1 %v4288_v28  ;;  %v2447_v54 = vpop.f32.mrb[19].mxu1  ;;  %v4145_v26 = vadd.f32 %v936_v24, %v4055_v32 }
 0x13b   :  { %v2448_v5 = vadd.f32 %v2447_v54, %v2446_v61 }
 0x13c   :  { %2768 = vmatpush3.bf16.msra.mxu0 %v3103_v63 }
 0x13d   :  { %2866 = vmatpush3.bf16.msra.mxu1 %v4288_v28  ;;  %2769 = vmatprep.subr.bf16.mxu0 %v3104_v6  ;;  %v3105_v28 = vld [vmem:[%s4220_s1 + $0x1b8] sm:$0xff]  }
 0x13e   :  { %2867 = vmatprep.subr.bf16.mxu1 %v4289_v3 }
 0x13f   :  { %v2449_v7 = vpop.f32.mrb[20].mxu1 }
 0x140   :  { %v2450_v9 = vpop.f32.mrb[21].mxu1  ;;  %2770 = vmatpush3.bf16.msra.mxu0 %v3105_v28 }
 0x141   :  { %2868 = vmatpush3.bf16.msra.mxu1 %v4289_v3  ;;  %v2451_v60 = vadd.f32 %v2450_v9, %v2449_v7  ;;  %v2452_v55 = vpop.f32.mrb[22].mxu1 }
 0x142   :  { %v2453_v11 = vpop.f32.mrb[23].mxu1 }
 0x143   :  { %v2454_v32 = vadd.f32 %v2453_v11, %v2452_v55  ;;  %1965 = vmatmul.mubr.bf16.vlgmr.msra.gmra.mrb[64].mxu0 %v3041_v56 }
 0x144   :  { %2870 = vmatmul.mubr.bf16.vlgmr.msra.gmra.mrb[68].mxu1 %v3045_v8  ;;  %1972 = vmatprep.mubr.bf16.mxu0 %v3046_v10 }
 0x14b   :  { %1973 = vmatmul.mubr.bf16.gmra.mrb[68].mxu0 %v3048_v2 }
 0x156   :  { %v2471_v12 = vpop.f32.mrb[20].mxu0 }
 0x157   :  { %v2499_v4 = vpop.f32.mrb[24].mxu1  ;;  %v2472_v13 = vpop.f32.mrb[21].mxu0 }
 0x158   :  { %v2500_v3 = vpop.f32.mrb[25].mxu1  ;;  %v2473_v14 = vadd.f32 %v2472_v13, %v2471_v12  ;;  %v2474_v15 = vpop.f32.mrb[22].mxu0 }
 0x159   :  { %v2501_v34 = vadd.f32 %v2500_v3, %v2499_v4  ;;  %v2502_v16 = vpop.f32.mrb[26].mxu1  ;;  %v2475_v58 = vpop.f32.mrb[23].mxu0 }
 0x15a   :  { %v2503_v17 = vpop.f32.mrb[27].mxu1  ;;  %v1145_v18 = vadd.f32 %v2473_v14, %v2445_v59  ;;  %v2476_v19 = vadd.f32 %v2475_v58, %v2474_v15 }
 0x15b   :  { %v2504_v20 = vadd.f32 %v2503_v17, %v2502_v16 }
 0x15c   :  { %v1148_v22 = vadd.f32 %v2476_v19, %v2448_v5  ;;  %v1194_v23 = vadd.f32 %v2501_v34, %v1145_v18 }
 0x15e   :  { %v1197_v25 = vadd.f32 %v2504_v20, %v1148_v22  ;;  %v2477_v29 = vpop.f32.mrb[24].mxu0 }
 0x15f   :  { %v2505_v30 = vpop.f32.mrb[28].mxu1  ;;  %v2478_v62 = vpop.f32.mrb[25].mxu0 }
 0x160   :  { %v2506_v31 = vpop.f32.mrb[29].mxu1  ;;  %v2479_v36 = vadd.f32 %v2478_v62, %v2477_v29  ;;  %v2480_v38 = vpop.f32.mrb[26].mxu0 }
 0x161   :  { %v2507_v39 = vadd.f32 %v2506_v31, %v2505_v30  ;;  %v2508_v40 = vpop.f32.mrb[30].mxu1  ;;  %v2481_v42 = vpop.f32.mrb[27].mxu0 }
 0x162   :  { %v2509_v57 = vpop.f32.mrb[31].mxu1  ;;  %v1153_v43 = vadd.f32 %v2479_v36, %v2451_v60  ;;  %v2482_v44 = vadd.f32 %v2481_v42, %v2480_v38 }
 0x163   :  { %v2510_v45 = vadd.f32 %v2509_v57, %v2508_v40 }
 0x164   :  { %v1156_v21 = vadd.f32 %v2482_v44, %v2454_v32  ;;  %v1202_v46 = vadd.f32 %v2507_v39, %v1153_v43 }
 0x166   :  { %v1205_v47 = vadd.f32 %v2510_v45, %v1156_v21 }
 0x176   :  { %v2527_v27 = vpop.f32.mrb[28].mxu0 }
 0x177   :  { %v2831_v48 = vpop.f32.mrb[32].mxu1  ;;  %v2528_v49 = vpop.f32.mrb[29].mxu0 }
 0x178   :  { %v1291_v37 = vpop.f32.mrb[33].mxu1  ;;  %v2529_v50 = vadd.f32 %v2528_v49, %v2527_v27  ;;  %v2530_v52 = vpop.f32.mrb[30].mxu0 }
 0x179   :  { %v2832_v53 = vpop.f32.mrb[34].mxu1  ;;  %v2531_v33 = vpop.f32.mrb[31].mxu0 }
 0x17a   :  { %v1294_v41 = vpop.f32.mrb[35].mxu1  ;;  %v2532_v59 = vadd.f32 %v2531_v33, %v2530_v52  ;;  %v1243_v61 = vadd.f32 %v2529_v50, %v1194_v23 }
 0x17c   :  { %v4171_v24 = vadd.f32 %v1291_v37, %v1243_v61  ;;  %v1246_v35 = vadd.f32 %v2532_v59, %v1197_v25 }
 0x17e   :  { %v1306_v54 = vmax.f32 %v4132_v0, %v4171_v24  ;;  %v4175_v5 = vadd.f32 %v1294_v41, %v1246_v35  ;;  %v2533_v63 = vpop.f32.mrb[32].mxu0 }
 0x17f   :  { %v2534_v6 = vpop.f32.mrb[33].mxu0 }
 0x180   :  { %v1307_v7 = vmax.f32 %v4145_v26, %v4175_v5  ;;  %v2535_v56 = vadd.f32 %v2534_v6, %v2533_v63  ;;  %v2536_v8 = vpop.f32.mrb[34].mxu0 }
 0x181   :  { %v2537_v9 = vpop.f32.mrb[35].mxu0 }
 0x182   :  { %v1251_v28 = vadd.f32 %v2535_v56, %v1202_v46  ;;  %v2538_v10 = vadd.f32 %v2537_v9, %v2536_v8 }
 0x184   :  { %v4179_v60 = vadd.f32 %v2831_v48, %v1251_v28  ;;  %v1254_v55 = vadd.f32 %v2538_v10, %v1205_v47 }
 0x186   :  { %v4181_v11 = vadd.f32 %v2832_v53, %v1254_v55  ;;  %v1308_v32 = vmax.f32 %v4129_v51, %v4179_v60 }
 0x188   :  { %v1309_v2 = vmax.f32 %v4138_v1, %v4181_v11 }
 0x196   :  { %v2565_v12 = vpop.f32.mrb[36].mxu0 }
 0x197   :  { %v2593_v4 = vpop.f32.mrb[36].mxu1  ;;  %v2566_v13 = vpop.f32.mrb[37].mxu0 }
 0x198   :  { %v2594_v3 = vpop.f32.mrb[37].mxu1  ;;  %v2567_v14 = vadd.f32 %v2566_v13, %v2565_v12  ;;  %v2568_v34 = vpop.f32.mrb[38].mxu0 }
 0x199   :  { %v2595_v15 = vadd.f32 %v2594_v3, %v2593_v4  ;;  %v2596_v16 = vpop.f32.mrb[38].mxu1  ;;  %v2569_v58 = vpop.f32.mrb[39].mxu0 }
 0x19a   :  { %v2597_v17 = vpop.f32.mrb[39].mxu1  ;;  %v2570_v19 = vadd.f32 %v2569_v58, %v2568_v34 }
 0x19b   :  { %v1507_v18 = vadd.f32 %v2595_v15, %v2567_v14  ;;  %v2598_v20 = vadd.f32 %v2597_v17, %v2596_v16 }
 0x19d   :  { %v1510_v22 = vadd.f32 %v2598_v20, %v2570_v19 }
 0x19e   :  { %v2571_v23 = vpop.f32.mrb[40].mxu0 }
 0x19f   :  { %v2599_v25 = vpop.f32.mrb[40].mxu1  ;;  %v2572_v29 = vpop.f32.mrb[41].mxu0 }
 0x1a0   :  { %v2600_v30 = vpop.f32.mrb[41].mxu1  ;;  %v2573_v62 = vadd.f32 %v2572_v29, %v2571_v23  ;;  %v2574_v36 = vpop.f32.mrb[42].mxu0 }
 0x1a1   :  { %v2601_v31 = vadd.f32 %v2600_v30, %v2599_v25  ;;  %v2602_v38 = vpop.f32.mrb[42].mxu1  ;;  %v2575_v39 = vpop.f32.mrb[43].mxu0 }
 0x1a2   :  { %v2603_v40 = vpop.f32.mrb[43].mxu1  ;;  %v2576_v57 = vadd.f32 %v2575_v39, %v2574_v36 }
 0x1a3   :  { %v1515_v42 = vadd.f32 %v2601_v31, %v2573_v62  ;;  %v2604_v43 = vadd.f32 %v2603_v40, %v2602_v38 }
 0x1a5   :  { %v1518_v44 = vadd.f32 %v2604_v43, %v2576_v57 }
 0x1b6   :  { %v2621_v45 = vpop.f32.mrb[44].mxu0 }
 0x1b7   :  { %v2649_v21 = vpop.f32.mrb[44].mxu1  ;;  %v2622_v46 = vpop.f32.mrb[45].mxu0 }
 0x1b8   :  { %v2650_v47 = vpop.f32.mrb[45].mxu1  ;;  %v2623_v27 = vadd.f32 %v2622_v46, %v2621_v45  ;;  %v2624_v48 = vpop.f32.mrb[46].mxu0 }
 0x1b9   :  { %v2651_v49 = vadd.f32 %v2650_v47, %v2649_v21  ;;  %v2652_v37 = vpop.f32.mrb[46].mxu1  ;;  %v2625_v50 = vpop.f32.mrb[47].mxu0 }
 0x1ba   :  { %v2653_v52 = vpop.f32.mrb[47].mxu1  ;;  %v1556_v53 = vadd.f32 %v2623_v27, %v1507_v18  ;;  %v2626_v33 = vadd.f32 %v2625_v50, %v2624_v48 }
 0x1bb   :  { %v2654_v41 = vadd.f32 %v2653_v52, %v2652_v37 }
 0x1bc   :  { %v1559_v59 = vadd.f32 %v2626_v33, %v1510_v22  ;;  %v1605_v61 = vadd.f32 %v2651_v49, %v1556_v53 }
 0x1be   :  { %v2627_v35 = vpop.f32.mrb[48].mxu0  ;;  %v1608_v6 = vadd.f32 %v2654_v41, %v1559_v59 }
 0x1bf   :  { %v2655_v63 = vpop.f32.mrb[48].mxu1  ;;  %v2628_v56 = vpop.f32.mrb[49].mxu0 }
 0x1c0   :  { %v2656_v8 = vpop.f32.mrb[49].mxu1  ;;  %v2629_v9 = vadd.f32 %v2628_v56, %v2627_v35  ;;  %v2630_v28 = vpop.f32.mrb[50].mxu0 }
 0x1c1   :  { %v2657_v10 = vadd.f32 %v2656_v8, %v2655_v63  ;;  %v2658_v55 = vpop.f32.mrb[50].mxu1  ;;  %v2631_v12 = vpop.f32.mrb[51].mxu0 }
 0x1c2   :  { %v2659_v4 = vpop.f32.mrb[51].mxu1  ;;  %v1564_v13 = vadd.f32 %v2629_v9, %v1515_v42  ;;  %v2632_v3 = vadd.f32 %v2631_v12, %v2630_v28 }
 0x1c3   :  { %v2660_v14 = vadd.f32 %v2659_v4, %v2658_v55 }
 0x1c4   :  { %v1567_v15 = vadd.f32 %v2632_v3, %v1518_v44  ;;  %v1613_v34 = vadd.f32 %v2657_v10, %v1564_v13 }
 0x1c6   :  { %v1616_v16 = vadd.f32 %v2660_v14, %v1567_v15 }
 0x1d6   :  { %v2851_v58 = vpop.f32.mrb[52].mxu0 }
 0x1d7   :  { %v2687_v17 = vpop.f32.mrb[52].mxu1  ;;  %v1662_v18 = vadd.f32 %v2851_v58, %v1613_v34  ;;  %v1653_v19 = vpop.f32.mrb[53].mxu0 }
 0x1d8   :  { %v2688_v20 = vpop.f32.mrb[53].mxu1  ;;  %v1654_v22 = vadd.f32 %v1653_v19, %v1605_v61  ;;  %v2852_v23 = vpop.f32.mrb[54].mxu0 }
 0x1d9   :  { %v2689_v25 = vadd.f32 %v2688_v20, %v2687_v17  ;;  %v2690_v29 = vpop.f32.mrb[54].mxu1  ;;  %v4190_v30 = vmax.f32 %v1308_v32, %v1662_v18  ;;  %v1665_v62 = vadd.f32 %v2852_v23, %v1616_v16  ;;  %v1656_v31 = vpop.f32.mrb[55].mxu0 }
 0x1da   :  { %v2691_v36 = vpop.f32.mrb[55].mxu1  ;;  %v4195_v38 = vmax.f32 %v1306_v54, %v1654_v22  ;;  %v1657_v39 = vadd.f32 %v1656_v31, %v1608_v6  ;;  %v2285_v22 = vld [vmem:[%s4222_s2] ss:$0 sm:$0xff] }
 0x1db   :  { %v2692_v40 = vadd.f32 %v2691_v36, %v2690_v29  ;;  %v4200_v42 = vmax.f32 %v1309_v2, %v1665_v62 }
 0x1dc   :  { %v4205_v51 = vmax.f32 %v1307_v7, %v1657_v39 }
 0x1df   :  { %v2693_v60 = vpop.f32.mrb[56].mxu1 }
 0x1e0   :  { %v2694_v32 = vpop.f32.mrb[57].mxu1 }
 0x1e1   :  { %v2695_v57 = vadd.f32 %v2694_v32, %v2693_v60  ;;  %v2696_v43 = vpop.f32.mrb[58].mxu1 }
 0x1e2   :  { %v2697_v44 = vpop.f32.mrb[59].mxu1 }
 0x1e3   :  { %v2698_v0 = vadd.f32 %v2697_v44, %v2696_v43 }
 0x1f6   :  { %v2715_v24 = vpop.f32.mrb[56].mxu0 }
 0x1f7   :  { %v2743_v54 = vpop.f32.mrb[60].mxu1  ;;  %v2716_v45 = vpop.f32.mrb[57].mxu0 }
 0x1f8   :  { %v2744_v21 = vpop.f32.mrb[61].mxu1  ;;  %v2717_v46 = vadd.f32 %v2716_v45, %v2715_v24  ;;  %v2718_v47 = vpop.f32.mrb[58].mxu0 }
 0x1f9   :  { %v2745_v1 = vadd.f32 %v2744_v21, %v2743_v54  ;;  %v2746_v11 = vpop.f32.mrb[62].mxu1  ;;  %v2719_v2 = vpop.f32.mrb[59].mxu0 }
 0x1fa   :  { %v2747_v27 = vpop.f32.mrb[63].mxu1  ;;  %v1869_v48 = vadd.f32 %v2717_v46, %v2689_v25  ;;  %v2720_v26 = vadd.f32 %v2719_v2, %v2718_v47 }
 0x1fb   :  { %v2748_v5 = vadd.f32 %v2747_v27, %v2746_v11 }
 0x1fc   :  { %v1872_v7 = vadd.f32 %v2720_v26, %v2692_v40  ;;  %v1918_v49 = vadd.f32 %v2745_v1, %v1869_v48 }
 0x1fe   :  { %v1921_v37 = vadd.f32 %v2748_v5, %v1872_v7  ;;  %v2721_v50 = vpop.f32.mrb[60].mxu0 }
 0x1ff   :  { %v2749_v52 = vpop.f32.mrb[64].mxu1  ;;  %v2722_v53 = vpop.f32.mrb[61].mxu0 }
 0x200   :  { %v2750_v33 = vpop.f32.mrb[65].mxu1  ;;  %v2723_v41 = vadd.f32 %v2722_v53, %v2721_v50  ;;  %v2724_v59 = vpop.f32.mrb[62].mxu0 }
 0x201   :  { %v2751_v61 = vadd.f32 %v2750_v33, %v2749_v52  ;;  %v2752_v35 = vpop.f32.mrb[66].mxu1  ;;  %v2725_v63 = vpop.f32.mrb[63].mxu0 }
 0x202   :  { %v2753_v6 = vpop.f32.mrb[67].mxu1  ;;  %v1877_v56 = vadd.f32 %v2723_v41, %v2695_v57  ;;  %v2726_v8 = vadd.f32 %v2725_v63, %v2724_v59 }
 0x203   :  { %v2754_v9 = vadd.f32 %v2753_v6, %v2752_v35 }
 0x204   :  { %v1880_v28 = vadd.f32 %v2726_v8, %v2698_v0  ;;  %v1926_v10 = vadd.f32 %v2751_v61, %v1877_v56 }
 0x206   :  { %v1929_v55 = vadd.f32 %v2754_v9, %v1880_v28 }
 0x216   :  { %v2771_v12 = vpop.f32.mrb[64].mxu0 }
 0x217   :  { %v2871_v4 = vpop.f32.mrb[68].mxu1  ;;  %v2772_v13 = vpop.f32.mrb[65].mxu0 }
 0x218   :  { %v2015_v3 = vpop.f32.mrb[69].mxu1  ;;  %v2773_v14 = vadd.f32 %v2772_v13, %v2771_v12  ;;  %v2774_v15 = vpop.f32.mrb[66].mxu0 }
 0x219   :  { %v2872_v34 = vpop.f32.mrb[70].mxu1  ;;  %v2775_v16 = vpop.f32.mrb[67].mxu0 }
 0x21a   :  { %v2018_v58 = vpop.f32.mrb[71].mxu1  ;;  %v2776_v17 = vadd.f32 %v2775_v16, %v2774_v15  ;;  %v1967_v18 = vadd.f32 %v2773_v14, %v1918_v49 }
 0x21c   :  { %v2016_v19 = vadd.f32 %v2015_v3, %v1967_v18  ;;  %v1970_v20 = vadd.f32 %v2776_v17, %v1921_v37 }
 0x21e   :  { %v2030_v23 = vmax.f32 %v4195_v38, %v2016_v19  ;;  %v2019_v25 = vadd.f32 %v2018_v58, %v1970_v20  ;;  %v2777_v29 = vpop.f32.mrb[68].mxu0 }
 0x21f   :  { %v2778_v62 = vpop.f32.mrb[69].mxu0 }
 0x220   :  { %v2041_v31 = vadd.f32 %v2285_v22, %v2030_v23  ;;  %v2031_v36 = vmax.f32 %v4205_v51, %v2019_v25  ;;  %v2779_v39 = vadd.f32 %v2778_v62, %v2777_v29  ;;  %v2780_v40 = vpop.f32.mrb[70].mxu0 }
 0x221   :  { %v2781_v60 = vpop.f32.mrb[71].mxu0 }
 0x222   :  { %v2049_v32 = vmul.f32 0.01, %v2041_v31  ;;  %v2042_v57 = vadd.f32 %v2285_v22, %v2031_v36  ;;  %v1975_v43 = vadd.f32 %v2779_v39, %v1926_v10  ;;  %vm2045_vm0 = vcmp.ge.f32.partialorder %v2041_v31, 0.0 }
 0x223   :  { %v2782_v44 = vadd.f32 %v2781_v60, %v2780_v40 }
 0x224   :  { %vm2046_vm1 = vcmp.ge.f32.partialorder %v2042_v57, 0.0  ;;  %v2050_v0 = vmul.f32 0.01, %v2042_v57  ;;  %v2024_v24 = vadd.f32 %v2871_v4, %v1975_v43  ;;  %v2053_v45 = vsel %vm2045_vm0, %v2041_v31, %v2049_v32 }
 0x225   :  { %v1978_v54 = vadd.f32 %v2782_v44, %v1929_v55 }
 0x226   :  { %v2054_v38 = vsel %vm2046_vm1, %v2042_v57, %v2050_v0  ;;  %v2032_v21 = vmax.f32 %v4190_v30, %v2024_v24 }
 0x227   :  { %v2297_v46 = vpack.c.bf16 %v2054_v38, %v2053_v45  ;;  %v2027_v47 = vadd.f32 %v2872_v34, %v1978_v54 }
 0x228   :  { %v2043_v1 = vadd.f32 %v2285_v22, %v2032_v21 }
 0x229   :  { %2298 = vst [vmem:[%s4223_s3] sm:$0xff] %v2297_v46   ;;  %v2033_v51 = vmax.f32 %v4200_v42, %v2027_v47 }
 0x22a   :  { %v2051_v11 = vmul.f32 0.01, %v2043_v1  ;;  %vm2047_vm2 = vcmp.ge.f32.partialorder %v2043_v1, 0.0 }
 0x22b   :  { %v2044_v2 = vadd.f32 %v2285_v22, %v2033_v51 }
 0x22c   :  { %v2055_v48 = vsel %vm2047_vm2, %v2043_v1, %v2051_v11 }
 0x22d   :  { %vm2048_vm3 = vcmp.ge.f32.partialorder %v2044_v2, 0.0  ;;  %v2052_v27 = vmul.f32 0.01, %v2044_v2 }
 0x22f   :  { %v2056_v26 = vsel %vm2048_vm3, %v2044_v2, %v2052_v27 }
 0x230   :  { %v2302_v5 = vpack.c.bf16 %v2056_v26, %v2055_v48 }
 0x232   :  { %2304 = vst [vmem:[%s4223_s3 + $0x8] sm:$0xff] %v2302_v5  }

// kernel: _block_forward.5
= control target key start
LH: loop header
LB: loop body
LE: loop exit
PB: predicated region body
PF: predicated region fallthrough
CT: control target
= control target key end

     0   :  { %v2532_v7 = vmov 1966171168   ;;  %v167_v9 = vlaneseq  ;;  %s3984_s1 = inlined_call_operand.vmem [shape: bf16[1152,256], index: 1, kind: input, shape index: {}]   ;;  %s3985_s0 = inlined_call_operand.vmem [shape: bf16[4,2,1152], index: 0, kind: input, shape index: {}]   ;;  %s3986_s2 = inlined_call_operand.vmem [shape: f32[1,256], index: 2, kind: input, shape index: {}]   ;;  %s3987_s3 = inlined_call_operand.vmem [shape: bf16[2,256], index: 3, kind: output, shape index: {}]  }
   0x1   :  { %v2279_v0 = vld [vmem:[%s3984_s1 + $0x4] ss:$8 sps:$4 sm:$0xff]   ;;  %v2281_v1 = vld [vmem:[%s3984_s1] ss:$8 sps:$4 sm:$0xff]   ;;  %v2282_v2 = vld [vmem:[%s3984_s1 + $0x14] ss:$8 sps:$4 sm:$0xff]   ;;  %v165_v8 = vunpack.c.l.s4 %v2532_v7 }
   0x2   :  { %955 = vmatprep.subr.bf16.mxu0 %v2279_v0  ;;  %1237 = vmatprep.subr.bf16.mxu1 %v2279_v0  ;;  %v2284_v3 = vld [vmem:[%s3984_s1 + $0x10] ss:$8 sps:$4 sm:$0xff]   ;;  %v2285_v4 = vld [vmem:[%s3984_s1 + $0x24] ss:$8 sps:$4 sm:$0xff]   ;;  %v2287_v5 = vld [vmem:[%s3984_s1 + $0x20] ss:$8 sps:$4 sm:$0xff]  }
   0x3   :  { %956 = vmatpush1.bf16.msra.mxu0 %v2281_v1  ;;  %1238 = vmatpush1.bf16.msra.mxu1 %v2281_v1  ;;  %v2288_v6 = vld [vmem:[%s3984_s1 + $0x34] ss:$8 sps:$4 sm:$0xff]   ;;  %v2290_v10 = vld [vmem:[%s3984_s1 + $0x30] ss:$8 sps:$4 sm:$0xff]   ;;  %v2291_v11 = vld [vmem:[%s3984_s1 + $0x44] ss:$8 sps:$4 sm:$0xff]   ;;  %v166_v12 = vunpack.c.0.s8 %v165_v8 }
   0x4   :  { %957 = vmatprep.subr.bf16.mxu0 %v2282_v2  ;;  %1239 = vmatprep.subr.bf16.mxu1 %v2282_v2  ;;  %v2581_v13 = vshrl.u32 %v167_v9, 7  ;;  %v2293_v14 = vld [vmem:[%s3984_s1 + $0x40] ss:$8 sps:$4 sm:$0xff]   ;;  %v2294_v15 = vld [vmem:[%s3984_s1 + $0x54] ss:$8 sps:$4 sm:$0xff]  }
   0x5   :  { %v2296_v17 = vld [vmem:[%s3984_s1 + $0x50] ss:$8 sps:$4 sm:$0xff]   ;;  %v2297_v18 = vld [vmem:[%s3984_s1 + $0x64] ss:$8 sps:$4 sm:$0xff]   ;;  %v2299_v22 = vld [vmem:[%s3984_s1 + $0x60] ss:$8 sps:$4 sm:$0xff]  }
   0x6   :  { %4116 = vst [vmem:[#allocation2_spill] sm:$0xff] %v2581_v13  ;;  %v2590_v16 = vsub.s32 %v166_v12, %v2581_v13  ;;  %v2601_v19 = vld [vmem:[%s3985_s0] sm:$0xff]  ;;  %v2610_v21 = vld [vmem:[%s3985_s0 + $0x9] sm:$0xff]  ;;  %v2300_v24 = vld [vmem:[%s3984_s1 + $0x74] ss:$8 sps:$4 sm:$0xff]  }
   0x7   :  { %958 = vmatpush1.bf16.msra.mxu0 %v2284_v3  ;;  %1240 = vmatpush1.bf16.msra.mxu1 %v2284_v3  ;;  %v2302_v28 = vld [vmem:[%s3984_s1 + $0x70] ss:$8 sps:$4 sm:$0xff]   ;;  %v2303_v30 = vld [vmem:[%s3984_s1 + $0x84] ss:$8 sps:$4 sm:$0xff]   ;;  %v2305_v31 = vld [vmem:[%s3984_s1 + $0x80] ss:$8 sps:$4 sm:$0xff]  }
   0x8   :  { %959 = vmatprep.subr.bf16.mxu0 %v2285_v4  ;;  %1241 = vmatprep.subr.bf16.mxu1 %v2285_v4  ;;  %v2605_v20 = vrot.slane %v2601_v19, %v2590_v16  ;;  %v2617_v23 = vrot.slane %v2610_v21, %v2590_v16  ;;  %v2306_v32 = vld [vmem:[%s3984_s1 + $0x94] ss:$8 sps:$4 sm:$0xff]   ;;  %v2308_v33 = vld [vmem:[%s3984_s1 + $0x90] ss:$8 sps:$4 sm:$0xff]   ;;  %v2309_v34 = vld [vmem:[%s3984_s1 + $0xa4] ss:$8 sps:$4 sm:$0xff]  }
   0x9   :  { %v2311_v35 = vld [vmem:[%s3984_s1 + $0xa0] ss:$8 sps:$4 sm:$0xff]   ;;  %v2312_v36 = vld [vmem:[%s3984_s1 + $0xb4] ss:$8 sps:$4 sm:$0xff]   ;;  %v2314_v37 = vld [vmem:[%s3984_s1 + $0xb0] ss:$8 sps:$4 sm:$0xff]  }
   0xa   :  { %v178_v25 = vcombine.high %v2605_v20, %v2605_v20  ;;  %v1180_v26 = vcombine.high %v2617_v23, %v2617_v23  ;;  %v2315_v38 = vld [vmem:[%s3984_s1 + $0xc4] ss:$8 sps:$4 sm:$0xff]   ;;  %v2317_v39 = vld [vmem:[%s3984_s1 + $0xc0] ss:$8 sps:$4 sm:$0xff]   ;;  %v2318_v40 = vld [vmem:[%s3984_s1 + $0xd4] ss:$8 sps:$4 sm:$0xff]   ;;  %v2692_v47 = vrot.slane %v2605_v20, %v2590_v16  ;;  %v2696_v48 = vrot.slane %v2617_v23, %v2590_v16 }
   0xb   :  { %960 = vmatpush1.bf16.msra.mxu0 %v2287_v5  ;;  %1242 = vmatpush1.bf16.msra.mxu1 %v2287_v5  ;;  %v2320_v41 = vld [vmem:[%s3984_s1 + $0xd0] ss:$8 sps:$4 sm:$0xff]   ;;  %v2321_v42 = vld [vmem:[%s3984_s1 + $0xe4] ss:$8 sps:$4 sm:$0xff]   ;;  %v2323_v43 = vld [vmem:[%s3984_s1 + $0xe0] ss:$8 sps:$4 sm:$0xff]  }
   0xc   :  { %961 = vmatprep.subr.bf16.mxu0 %v2288_v6  ;;  %1243 = vmatprep.subr.bf16.mxu1 %v2288_v6  ;;  %v2627_v27 = vrot.slane %v178_v25, %v2590_v16  ;;  %v2633_v29 = vrot.slane %v1180_v26, %v2590_v16  ;;  %v2324_v44 = vld [vmem:[%s3984_s1 + $0xf4] ss:$8 sps:$4 sm:$0xff]   ;;  %v2326_v45 = vld [vmem:[%s3984_s1 + $0xf0] ss:$8 sps:$4 sm:$0xff]   ;;  %v2688_v46 = vld [vmem:[%s3984_s1 + $0x104] ss:$8 sps:$4 sm:$0xff]  }
   0xd   :  { %v2701_v49 = vld [vmem:[%s3984_s1 + $0x100] ss:$8 sps:$4 sm:$0xff]   ;;  %v2708_v50 = vld [vmem:[%s3984_s1 + $0x114] ss:$8 sps:$4 sm:$0xff]   ;;  %v2721_v53 = vld [vmem:[%s3984_s1 + $0x110] ss:$8 sps:$4 sm:$0xff]  }
   0xe   :  { %987 = vmatprep.mubr.bf16.mxu0 %v2627_v27  ;;  %1269 = vmatprep.mubr.bf16.mxu1 %v2633_v29  ;;  %v210_v51 = vcombine.high %v2627_v27, %v2627_v27  ;;  %v1212_v52 = vcombine.high %v2633_v29, %v2633_v29  ;;  %v2728_v54 = vld [vmem:[%s3984_s1 + $0x124] ss:$8 sps:$4 sm:$0xff]   ;;  %v2735_v55 = vld [vmem:[%s3984_s1 + $0x120] ss:$8 sps:$4 sm:$0xff]   ;;  %v2742_v56 = vld [vmem:[%s3984_s1 + $0x134] ss:$8 sps:$4 sm:$0xff]   ;;  %v208_v27 = vcombine.high %v2692_v47, %v2692_v47 }
   0xf   :  { %962 = vmatpush1.bf16.msra.mxu0 %v2290_v10  ;;  %1244 = vmatpush1.bf16.msra.mxu1 %v2290_v10  ;;  %v2749_v57 = vld [vmem:[%s3984_s1 + $0x130] ss:$8 sps:$4 sm:$0xff]   ;;  %v2756_v58 = vld [vmem:[%s3984_s1 + $0x144] ss:$8 sps:$4 sm:$0xff]   ;;  %v2763_v59 = vld [vmem:[%s3984_s1 + $0x140] ss:$8 sps:$4 sm:$0xff]  }
  0x10   :  { %963 = vmatprep.subr.bf16.mxu0 %v2291_v11  ;;  %1245 = vmatprep.subr.bf16.mxu1 %v2291_v11  ;;  %v2770_v60 = vld [vmem:[%s3984_s1 + $0x154] ss:$8 sps:$4 sm:$0xff]   ;;  %v2777_v61 = vld [vmem:[%s3984_s1 + $0x150] ss:$8 sps:$4 sm:$0xff]   ;;  %v2784_v62 = vld [vmem:[%s3984_s1 + $0x164] ss:$8 sps:$4 sm:$0xff]  }
  0x11   :  { %v2791_v63 = vld [vmem:[%s3984_s1 + $0x160] ss:$8 sps:$4 sm:$0xff]   ;;  %v2798_v0 = vld [vmem:[%s3984_s1 + $0x174] ss:$8 sps:$4 sm:$0xff]   ;;  %v2805_v1 = vld [vmem:[%s3984_s1 + $0x170] ss:$8 sps:$4 sm:$0xff]  }
  0x12   :  { %v2812_v2 = vld [vmem:[%s3984_s1 + $0x184] ss:$8 sps:$4 sm:$0xff]   ;;  %v2819_v3 = vld [vmem:[%s3984_s1 + $0x180] ss:$8 sps:$4 sm:$0xff]   ;;  %v2826_v4 = vld [vmem:[%s3984_s1 + $0x194] ss:$8 sps:$4 sm:$0xff]  }
  0x13   :  { %964 = vmatpush1.bf16.msra.mxu0 %v2293_v14  ;;  %1246 = vmatpush1.bf16.msra.mxu1 %v2293_v14  ;;  %v2833_v5 = vld [vmem:[%s3984_s1 + $0x190] ss:$8 sps:$4 sm:$0xff]   ;;  %v2840_v6 = vld [vmem:[%s3984_s1 + $0x1a4] ss:$8 sps:$4 sm:$0xff]   ;;  %v2847_v7 = vld [vmem:[%s3984_s1 + $0x1a0] ss:$8 sps:$4 sm:$0xff]  }
  0x14   :  { %965 = vmatprep.subr.bf16.mxu0 %v2294_v15  ;;  %1247 = vmatprep.subr.bf16.mxu1 %v2294_v15  ;;  %v2854_v8 = vld [vmem:[%s3984_s1 + $0x1b4] ss:$8 sps:$4 sm:$0xff]   ;;  %v2861_v9 = vld [vmem:[%s3984_s1 + $0x1b0] ss:$8 sps:$4 sm:$0xff]   ;;  %v2868_v10 = vld [vmem:[%s3984_s1 + $0x1c4] ss:$8 sps:$4 sm:$0xff]  }
  0x15   :  { %v2875_v11 = vld [vmem:[%s3984_s1 + $0x1c0] ss:$8 sps:$4 sm:$0xff]   ;;  %v2882_v12 = vld [vmem:[%s3984_s1 + $0x1d4] ss:$8 sps:$4 sm:$0xff]   ;;  %v2889_v14 = vld [vmem:[%s3984_s1 + $0x1d0] ss:$8 sps:$4 sm:$0xff]  }
  0x16   :  { %v2896_v15 = vld [vmem:[%s3984_s1 + $0x1e4] ss:$8 sps:$4 sm:$0xff]   ;;  %v2907_v20 = vld [vmem:[%s3984_s1 + $0x1e0] ss:$8 sps:$4 sm:$0xff]   ;;  %v2927_v23 = vld [vmem:[%s3984_s1 + $0x1f0] ss:$8 sps:$4 sm:$0xff]  }
  0x17   :  { %966 = vmatpush1.bf16.msra.mxu0 %v2296_v17  ;;  %1248 = vmatpush1.bf16.msra.mxu1 %v2296_v17  ;;  %v163_v17 = vcombine.high %v2601_v19, %v2601_v19  ;;  %v2914_v19 = vld [vmem:[%s3984_s1 + $0x1f4] ss:$8 sps:$4 sm:$0xff]   ;;  %v2949_v29 = vld [vmem:[%s3984_s1 + $0x200] ss:$8 sps:$4 sm:$0xff]  }
  0x18   :  { %967 = vmatprep.subr.bf16.mxu0 %v2297_v18  ;;  %1249 = vmatprep.subr.bf16.mxu1 %v2297_v18  ;;  %v1165_v18 = vcombine.high %v2610_v21, %v2610_v21  ;;  %v3132_v13 = vld [vmem:[%s3984_s1 + $0x2d4] ss:$8 sps:$4 sm:$0xff]  }
  0x19   :  { %v2917_v21 = vrot.slane %v163_v17, %v2590_v16  ;;  %v3090_v17 = vld [vmem:[%s3984_s1 + $0x2a4] ss:$8 sps:$4 sm:$0xff]   ;;  %4126 = vst [vmem:[#allocation12_spill] sm:$0xff] %v3132_v13 }
  0x1a   :  { %4120 = vst [vmem:[#allocation6_spill] sm:$0xff] %v3090_v17 }
  0x1b   :  { %968 = vmatpush1.bf16.msra.mxu0 %v2299_v22  ;;  %1250 = vmatpush1.bf16.msra.mxu1 %v2299_v22  ;;  %v2920_v22 = vrot.slane %v1165_v18, %v2590_v16  ;;  %v179_v25 = vcombine.high %v2917_v21, %v2917_v21  ;;  %v3097_v18 = vld [vmem:[%s3984_s1 + $0x2a0] ss:$8 sps:$4 sm:$0xff]  }
  0x1c   :  { %969 = vmatprep.subr.bf16.mxu0 %v2300_v24  ;;  %1251 = vmatprep.subr.bf16.mxu1 %v2300_v24  ;;  %v2934_v24 = vld [vmem:[%s3984_s1 + $0x204] ss:$8 sps:$4 sm:$0xff]   ;;  %4121 = vst [vmem:[#allocation7_spill] sm:$0xff] %v3097_v18 }
  0x1d   :  { %v1181_v26 = vcombine.high %v2920_v22, %v2920_v22 }
  0x1f   :  { %970 = vmatpush1.bf16.msra.mxu0 %v2302_v28  ;;  %1252 = vmatpush1.bf16.msra.mxu1 %v2302_v28  ;;  %v1210_v28 = vcombine.high %v2696_v48, %v2696_v48 }
  0x20   :  { %971 = vmatprep.subr.bf16.mxu0 %v2303_v30  ;;  %1253 = vmatprep.subr.bf16.mxu1 %v2303_v30  ;;  %v2956_v30 = vld [vmem:[%s3984_s1 + $0x214] ss:$8 sps:$4 sm:$0xff]  }
  0x23   :  { %972 = vmatpush1.bf16.msra.mxu0 %v2305_v31  ;;  %1254 = vmatpush1.bf16.msra.mxu1 %v2305_v31  ;;  %v2959_v31 = vrot.slane %v179_v25, %v2590_v16  ;;  %v3104_v25 = vld [vmem:[%s3984_s1 + $0x2b4] ss:$8 sps:$4 sm:$0xff]  }
  0x24   :  { %973 = vmatprep.subr.bf16.mxu0 %v2306_v32  ;;  %1255 = vmatprep.subr.bf16.mxu1 %v2306_v32  ;;  %v2962_v32 = vrot.slane %v1181_v26, %v2590_v16  ;;  %4122 = vst [vmem:[#allocation8_spill] sm:$0xff] %v3104_v25  ;;  %v3111_v26 = vld [vmem:[%s3984_s1 + $0x2b0] ss:$8 sps:$4 sm:$0xff]  }
  0x25   :  { %4123 = vst [vmem:[#allocation9_spill] sm:$0xff] %v3111_v26 }
  0x27   :  { %974 = vmatpush1.bf16.msra.mxu0 %v2308_v33  ;;  %1256 = vmatpush1.bf16.msra.mxu1 %v2308_v33  ;;  %v2969_v33 = vld [vmem:[%s3984_s1 + $0x210] ss:$8 sps:$4 sm:$0xff]  }
  0x28   :  { %975 = vmatprep.subr.bf16.mxu0 %v2309_v34  ;;  %1257 = vmatprep.subr.bf16.mxu1 %v2309_v34  ;;  %v2976_v34 = vld [vmem:[%s3984_s1 + $0x224] ss:$8 sps:$4 sm:$0xff]  }
  0x2b   :  { %976 = vmatpush1.bf16.msra.mxu0 %v2311_v35  ;;  %1258 = vmatpush1.bf16.msra.mxu1 %v2311_v35  ;;  %v2985_v35 = vld [vmem:[%s3984_s1 + $0x220] ss:$8 sps:$4 sm:$0xff]  }
  0x2c   :  { %977 = vmatprep.subr.bf16.mxu0 %v2312_v36  ;;  %1259 = vmatprep.subr.bf16.mxu1 %v2312_v36  ;;  %v2992_v36 = vld [vmem:[%s3984_s1 + $0x234] ss:$8 sps:$4 sm:$0xff]  }
  0x2f   :  { %978 = vmatpush1.bf16.msra.mxu0 %v2314_v37  ;;  %1260 = vmatpush1.bf16.msra.mxu1 %v2314_v37  ;;  %v2999_v37 = vld [vmem:[%s3984_s1 + $0x230] ss:$8 sps:$4 sm:$0xff]  }
  0x30   :  { %979 = vmatprep.subr.bf16.mxu0 %v2315_v38  ;;  %1261 = vmatprep.subr.bf16.mxu1 %v2315_v38  ;;  %v3006_v38 = vld [vmem:[%s3984_s1 + $0x244] ss:$8 sps:$4 sm:$0xff]  }
  0x33   :  { %980 = vmatpush1.bf16.msra.mxu0 %v2317_v39  ;;  %1262 = vmatpush1.bf16.msra.mxu1 %v2317_v39  ;;  %v3013_v39 = vld [vmem:[%s3984_s1 + $0x240] ss:$8 sps:$4 sm:$0xff]  }
  0x34   :  { %981 = vmatprep.subr.bf16.mxu0 %v2318_v40  ;;  %1263 = vmatprep.subr.bf16.mxu1 %v2318_v40  ;;  %v3020_v40 = vld [vmem:[%s3984_s1 + $0x254] ss:$8 sps:$4 sm:$0xff]  }
  0x37   :  { %982 = vmatpush1.bf16.msra.mxu0 %v2320_v41  ;;  %1264 = vmatpush1.bf16.msra.mxu1 %v2320_v41  ;;  %v3027_v41 = vld [vmem:[%s3984_s1 + $0x250] ss:$8 sps:$4 sm:$0xff]  }
  0x38   :  { %983 = vmatprep.subr.bf16.mxu0 %v2321_v42  ;;  %1265 = vmatprep.subr.bf16.mxu1 %v2321_v42  ;;  %v3034_v42 = vld [vmem:[%s3984_s1 + $0x264] ss:$8 sps:$4 sm:$0xff]  }
  0x3b   :  { %984 = vmatpush1.bf16.msra.mxu0 %v2323_v43  ;;  %1266 = vmatpush1.bf16.msra.mxu1 %v2323_v43  ;;  %v3041_v43 = vld [vmem:[%s3984_s1 + $0x260] ss:$8 sps:$4 sm:$0xff]  }
  0x3c   :  { %985 = vmatprep.subr.bf16.mxu0 %v2324_v44  ;;  %1267 = vmatprep.subr.bf16.mxu1 %v2324_v44  ;;  %v3048_v44 = vld [vmem:[%s3984_s1 + $0x274] ss:$8 sps:$4 sm:$0xff]  }
  0x3f   :  { %986 = vmatpush1.bf16.msra.mxu0 %v2326_v45  ;;  %1268 = vmatpush1.bf16.msra.mxu1 %v2326_v45  ;;  %v3055_v45 = vld [vmem:[%s3984_s1 + $0x270] ss:$8 sps:$4 sm:$0xff]  }
  0x40   :  { %996 = vmatprep.subr.bf16.mxu0 %v2688_v46  ;;  %1278 = vmatprep.subr.bf16.mxu1 %v2688_v46 }
  0x42   :  { %988 = vmatmul.mubr.bf16.vlgmr.msra.gmra.mrb[0].mxu0 %v2692_v47  ;;  %1270 = vmatmul.mubr.bf16.vlgmr.msra.gmra.mrb[0].mxu1 %v2696_v48  ;;  %v3062_v47 = vld [vmem:[%s3984_s1 + $0x284] ss:$8 sps:$4 sm:$0xff]   ;;  %v3069_v48 = vld [vmem:[%s3984_s1 + $0x280] ss:$8 sps:$4 sm:$0xff]  }
  0x43   :  { %997 = vmatpush1.bf16.msra.mxu0 %v2701_v49  ;;  %1279 = vmatpush1.bf16.msra.mxu1 %v2701_v49  ;;  %4117 = vst [vmem:[#allocation3_spill] sm:$0xff] %v3069_v48 }
  0x44   :  { %998 = vmatprep.subr.bf16.mxu0 %v2708_v50  ;;  %1280 = vmatprep.subr.bf16.mxu1 %v2708_v50 }
  0x45   :  { %1028 = vmatprep.mubr.bf16.mxu0 %v210_v51  ;;  %1310 = vmatprep.mubr.bf16.mxu1 %v1212_v52  ;;  %v3076_v51 = vld [vmem:[%s3984_s1 + $0x294] ss:$8 sps:$4 sm:$0xff]   ;;  %v3083_v52 = vld [vmem:[%s3984_s1 + $0x290] ss:$8 sps:$4 sm:$0xff]  }
  0x46   :  { %4118 = vst [vmem:[#allocation4_spill] sm:$0xff] %v3076_v51  ;;  %4119 = vst [vmem:[#allocation5_spill] sm:$0xff] %v3083_v52 }
  0x47   :  { %999 = vmatpush1.bf16.msra.mxu0 %v2721_v53  ;;  %1281 = vmatpush1.bf16.msra.mxu1 %v2721_v53 }
  0x48   :  { %1000 = vmatprep.subr.bf16.mxu0 %v2728_v54  ;;  %1282 = vmatprep.subr.bf16.mxu1 %v2728_v54 }
  0x4b   :  { %1001 = vmatpush1.bf16.msra.mxu0 %v2735_v55  ;;  %1283 = vmatpush1.bf16.msra.mxu1 %v2735_v55 }
  0x4c   :  { %1002 = vmatprep.subr.bf16.mxu0 %v2742_v56  ;;  %1284 = vmatprep.subr.bf16.mxu1 %v2742_v56 }
  0x4f   :  { %1003 = vmatpush1.bf16.msra.mxu0 %v2749_v57  ;;  %1285 = vmatpush1.bf16.msra.mxu1 %v2749_v57 }
  0x50   :  { %1004 = vmatprep.subr.bf16.mxu0 %v2756_v58  ;;  %1286 = vmatprep.subr.bf16.mxu1 %v2756_v58 }
  0x53   :  { %1005 = vmatpush1.bf16.msra.mxu0 %v2763_v59  ;;  %1287 = vmatpush1.bf16.msra.mxu1 %v2763_v59 }
  0x54   :  { %1006 = vmatprep.subr.bf16.mxu0 %v2770_v60  ;;  %1288 = vmatprep.subr.bf16.mxu1 %v2770_v60 }
  0x57   :  { %1007 = vmatpush1.bf16.msra.mxu0 %v2777_v61  ;;  %1289 = vmatpush1.bf16.msra.mxu1 %v2777_v61 }
  0x58   :  { %1008 = vmatprep.subr.bf16.mxu0 %v2784_v62  ;;  %1290 = vmatprep.subr.bf16.mxu1 %v2784_v62 }
  0x5b   :  { %1009 = vmatpush1.bf16.msra.mxu0 %v2791_v63  ;;  %1291 = vmatpush1.bf16.msra.mxu1 %v2791_v63 }
  0x5c   :  { %1010 = vmatprep.subr.bf16.mxu0 %v2798_v0  ;;  %1292 = vmatprep.subr.bf16.mxu1 %v2798_v0 }
  0x5f   :  { %1011 = vmatpush1.bf16.msra.mxu0 %v2805_v1  ;;  %1293 = vmatpush1.bf16.msra.mxu1 %v2805_v1 }
  0x60   :  { %1012 = vmatprep.subr.bf16.mxu0 %v2812_v2  ;;  %1294 = vmatprep.subr.bf16.mxu1 %v2812_v2 }
  0x63   :  { %1013 = vmatpush1.bf16.msra.mxu0 %v2819_v3  ;;  %1295 = vmatpush1.bf16.msra.mxu1 %v2819_v3 }
  0x64   :  { %1014 = vmatprep.subr.bf16.mxu0 %v2826_v4  ;;  %1296 = vmatprep.subr.bf16.mxu1 %v2826_v4 }
  0x67   :  { %1015 = vmatpush1.bf16.msra.mxu0 %v2833_v5  ;;  %1297 = vmatpush1.bf16.msra.mxu1 %v2833_v5 }
  0x68   :  { %1016 = vmatprep.subr.bf16.mxu0 %v2840_v6  ;;  %1298 = vmatprep.subr.bf16.mxu1 %v2840_v6 }
  0x6b   :  { %1017 = vmatpush1.bf16.msra.mxu0 %v2847_v7  ;;  %1299 = vmatpush1.bf16.msra.mxu1 %v2847_v7 }
  0x6c   :  { %1018 = vmatprep.subr.bf16.mxu0 %v2854_v8  ;;  %1300 = vmatprep.subr.bf16.mxu1 %v2854_v8 }
  0x6f   :  { %1019 = vmatpush1.bf16.msra.mxu0 %v2861_v9  ;;  %1301 = vmatpush1.bf16.msra.mxu1 %v2861_v9 }
  0x70   :  { %1020 = vmatprep.subr.bf16.mxu0 %v2868_v10  ;;  %1302 = vmatprep.subr.bf16.mxu1 %v2868_v10 }
  0x73   :  { %1021 = vmatpush1.bf16.msra.mxu0 %v2875_v11  ;;  %1303 = vmatpush1.bf16.msra.mxu1 %v2875_v11 }
  0x74   :  { %1022 = vmatprep.subr.bf16.mxu0 %v2882_v12  ;;  %1304 = vmatprep.subr.bf16.mxu1 %v2882_v12 }
  0x77   :  { %1023 = vmatpush1.bf16.msra.mxu0 %v2889_v14  ;;  %1305 = vmatpush1.bf16.msra.mxu1 %v2889_v14 }
  0x78   :  { %1024 = vmatprep.subr.bf16.mxu0 %v2896_v15  ;;  %1306 = vmatprep.subr.bf16.mxu1 %v2896_v15 }
  0x7b   :  { %1025 = vmatpush1.bf16.msra.mxu0 %v2907_v20  ;;  %1307 = vmatpush1.bf16.msra.mxu1 %v2907_v20 }
  0x7c   :  { %1026 = vmatprep.subr.bf16.mxu0 %v2914_v19  ;;  %1308 = vmatprep.subr.bf16.mxu1 %v2914_v19 }
  0x7f   :  { %1027 = vmatpush1.bf16.msra.mxu0 %v2927_v23  ;;  %1309 = vmatpush1.bf16.msra.mxu1 %v2927_v23 }
  0x80   :  { %1037 = vmatprep.subr.bf16.mxu0 %v2934_v24  ;;  %1319 = vmatprep.subr.bf16.mxu1 %v2934_v24 }
  0x82   :  { %1029 = vmatmul.mubr.bf16.vlgmr.msra.gmra.mrb[0].mxu0 %v208_v27  ;;  %1311 = vmatmul.mubr.bf16.vlgmr.msra.gmra.mrb[0].mxu1 %v1210_v28  ;;  %v3118_v27 = vld [vmem:[%s3984_s1 + $0x2c4] ss:$8 sps:$4 sm:$0xff]   ;;  %v3125_v28 = vld [vmem:[%s3984_s1 + $0x2c0] ss:$8 sps:$4 sm:$0xff]  }
  0x83   :  { %1038 = vmatpush1.bf16.msra.mxu0 %v2949_v29  ;;  %1320 = vmatpush1.bf16.msra.mxu1 %v2949_v29  ;;  %4124 = vst [vmem:[#allocation10_spill] sm:$0xff] %v3118_v27  ;;  %4125 = vst [vmem:[#allocation11_spill] sm:$0xff] %v3125_v28 }
  0x84   :  { %1039 = vmatprep.subr.bf16.mxu0 %v2956_v30  ;;  %1321 = vmatprep.subr.bf16.mxu1 %v2956_v30 }
  0x85   :  { %1069 = vmatprep.mubr.bf16.mxu0 %v2959_v31  ;;  %1351 = vmatprep.mubr.bf16.mxu1 %v2962_v32 }
  0x87   :  { %1040 = vmatpush1.bf16.msra.mxu0 %v2969_v33  ;;  %1322 = vmatpush1.bf16.msra.mxu1 %v2969_v33 }
  0x88   :  { %1041 = vmatprep.subr.bf16.mxu0 %v2976_v34  ;;  %1323 = vmatprep.subr.bf16.mxu1 %v2976_v34 }
  0x8b   :  { %1042 = vmatpush1.bf16.msra.mxu0 %v2985_v35  ;;  %1324 = vmatpush1.bf16.msra.mxu1 %v2985_v35 }
  0x8c   :  { %1043 = vmatprep.subr.bf16.mxu0 %v2992_v36  ;;  %1325 = vmatprep.subr.bf16.mxu1 %v2992_v36 }
  0x8f   :  { %1044 = vmatpush1.bf16.msra.mxu0 %v2999_v37  ;;  %1326 = vmatpush1.bf16.msra.mxu1 %v2999_v37 }
  0x90   :  { %1045 = vmatprep.subr.bf16.mxu0 %v3006_v38  ;;  %1327 = vmatprep.subr.bf16.mxu1 %v3006_v38 }
  0x93   :  { %1046 = vmatpush1.bf16.msra.mxu0 %v3013_v39  ;;  %1328 = vmatpush1.bf16.msra.mxu1 %v3013_v39 }
  0x94   :  { %1047 = vmatprep.subr.bf16.mxu0 %v3020_v40  ;;  %1329 = vmatprep.subr.bf16.mxu1 %v3020_v40 }
  0x97   :  { %1048 = vmatpush1.bf16.msra.mxu0 %v3027_v41  ;;  %1330 = vmatpush1.bf16.msra.mxu1 %v3027_v41 }
  0x98   :  { %1049 = vmatprep.subr.bf16.mxu0 %v3034_v42  ;;  %1331 = vmatprep.subr.bf16.mxu1 %v3034_v42 }
  0x9b   :  { %1050 = vmatpush1.bf16.msra.mxu0 %v3041_v43  ;;  %1332 = vmatpush1.bf16.msra.mxu1 %v3041_v43 }
  0x9c   :  { %1051 = vmatprep.subr.bf16.mxu0 %v3048_v44  ;;  %1333 = vmatprep.subr.bf16.mxu1 %v3048_v44 }
  0x9f   :  { %1052 = vmatpush1.bf16.msra.mxu0 %v3055_v45  ;;  %1334 = vmatpush1.bf16.msra.mxu1 %v3055_v45 }
  0xa0   :  { %1053 = vmatprep.subr.bf16.mxu0 %v3062_v47  ;;  %1335 = vmatprep.subr.bf16.mxu1 %v3062_v47 }
  0xa3   :  { %1054 = vmatpush1.bf16.msra.mxu0 %v3069_v48  ;;  %1336 = vmatpush1.bf16.msra.mxu1 %v3069_v48 }
  0xa4   :  { %1055 = vmatprep.subr.bf16.mxu0 %v3076_v51  ;;  %1337 = vmatprep.subr.bf16.mxu1 %v3076_v51  ;;  %v2499_v51 = vld [vmem:[%s3984_s1 + $0x4] ss:$8 sps:$4 sm:$0xff]  }
  0xa7   :  { %1056 = vmatpush1.bf16.msra.mxu0 %v3083_v52  ;;  %1338 = vmatpush1.bf16.msra.mxu1 %v3083_v52 }
  0xa8   :  { %1057 = vmatprep.subr.bf16.mxu0 %v3090_v17  ;;  %1339 = vmatprep.subr.bf16.mxu1 %v3090_v17 }
  0xab   :  { %1058 = vmatpush1.bf16.msra.mxu0 %v3097_v18  ;;  %1340 = vmatpush1.bf16.msra.mxu1 %v3097_v18 }
  0xac   :  { %1059 = vmatprep.subr.bf16.mxu0 %v3104_v25  ;;  %1341 = vmatprep.subr.bf16.mxu1 %v3104_v25  ;;  %v3178_v25 = vrot.slane %v2917_v21, %v2590_v16  ;;  %v3196_v21 = vld [vmem:[%s3984_s1 + $0x314] ss:$8 sps:$4 sm:$0xff]  }
  0xad   :  { %4134 = vst [vmem:[#allocation20_spill] sm:$0xff] %v3196_v21 }
  0xaf   :  { %1060 = vmatpush1.bf16.msra.mxu0 %v3111_v26  ;;  %1342 = vmatpush1.bf16.msra.mxu1 %v3111_v26  ;;  %v3139_v26 = vld [vmem:[%s3984_s1 + $0x2d0] ss:$8 sps:$4 sm:$0xff]  }
  0xb0   :  { %1061 = vmatprep.subr.bf16.mxu0 %v3118_v27  ;;  %1343 = vmatprep.subr.bf16.mxu1 %v3118_v27  ;;  %4127 = vst [vmem:[#allocation13_spill] sm:$0xff] %v3139_v26  ;;  %v3146_v27 = vld [vmem:[%s3984_s1 + $0x2e4] ss:$8 sps:$4 sm:$0xff]  }
  0xb1   :  { %4128 = vst [vmem:[#allocation14_spill] sm:$0xff] %v3146_v27 }
  0xb3   :  { %1062 = vmatpush1.bf16.msra.mxu0 %v3125_v28  ;;  %1344 = vmatpush1.bf16.msra.mxu1 %v3125_v28  ;;  %v3153_v28 = vld [vmem:[%s3984_s1 + $0x2e0] ss:$8 sps:$4 sm:$0xff]  }
  0xb4   :  { %1063 = vmatprep.subr.bf16.mxu0 %v3132_v13  ;;  %1345 = vmatprep.subr.bf16.mxu1 %v3132_v13  ;;  %4129 = vst [vmem:[#allocation15_spill] sm:$0xff] %v3153_v28  ;;  %v3160_v13 = vld [vmem:[%s3984_s1 + $0x2f4] ss:$8 sps:$4 sm:$0xff]  }
  0xb5   :  { %4130 = vst [vmem:[#allocation16_spill] sm:$0xff] %v3160_v13 }
  0xb7   :  { %1064 = vmatpush1.bf16.msra.mxu0 %v3139_v26  ;;  %1346 = vmatpush1.bf16.msra.mxu1 %v3139_v26  ;;  %v3167_v26 = vld [vmem:[%s3984_s1 + $0x2f0] ss:$8 sps:$4 sm:$0xff]  }
  0xb8   :  { %1065 = vmatprep.subr.bf16.mxu0 %v3146_v27  ;;  %1347 = vmatprep.subr.bf16.mxu1 %v3146_v27  ;;  %4131 = vst [vmem:[#allocation17_spill] sm:$0xff] %v3167_v26  ;;  %v3174_v27 = vld [vmem:[%s3984_s1 + $0x304] ss:$8 sps:$4 sm:$0xff]  }
  0xb9   :  { %4132 = vst [vmem:[#allocation18_spill] sm:$0xff] %v3174_v27 }
  0xbb   :  { %1066 = vmatpush1.bf16.msra.mxu0 %v3153_v28  ;;  %1348 = vmatpush1.bf16.msra.mxu1 %v3153_v28  ;;  %v3182_v28 = vrot.slane %v2920_v22, %v2590_v16  ;;  %v211_v22 = vcombine.high %v2959_v31, %v2959_v31  ;;  %v3216_v31 = vld [vmem:[%s3984_s1 + $0x324] ss:$8 sps:$4 sm:$0xff]  }
  0xbc   :  { %1067 = vmatprep.subr.bf16.mxu0 %v3160_v13  ;;  %1349 = vmatprep.subr.bf16.mxu1 %v3160_v13  ;;  %v3189_v13 = vld [vmem:[%s3984_s1 + $0x300] ss:$8 sps:$4 sm:$0xff]   ;;  %4136 = vst [vmem:[#allocation22_spill] sm:$0xff] %v3216_v31 }
  0xbd   :  { %4133 = vst [vmem:[#allocation19_spill] sm:$0xff] %v3189_v13 }
  0xbf   :  { %1068 = vmatpush1.bf16.msra.mxu0 %v3167_v26  ;;  %1350 = vmatpush1.bf16.msra.mxu1 %v3167_v26  ;;  %v1213_v26 = vcombine.high %v2962_v32, %v2962_v32  ;;  %v3223_v32 = vld [vmem:[%s3984_s1 + $0x320] ss:$8 sps:$4 sm:$0xff]  }
  0xc0   :  { %1078 = vmatprep.subr.bf16.mxu0 %v3174_v27  ;;  %1360 = vmatprep.subr.bf16.mxu1 %v3174_v27  ;;  %v3209_v27 = vld [vmem:[%s3984_s1 + $0x310] ss:$8 sps:$4 sm:$0xff]   ;;  %4137 = vst [vmem:[#allocation23_spill] sm:$0xff] %v3223_v32 }
  0xc1   :  { %4135 = vst [vmem:[#allocation21_spill] sm:$0xff] %v3209_v27 }
  0xc2   :  { %1070 = vmatmul.mubr.bf16.vlgmr.msra.gmra.mrb[0].mxu0 %v3178_v25  ;;  %1352 = vmatmul.mubr.bf16.vlgmr.msra.gmra.mrb[0].mxu1 %v3182_v28 }
  0xc3   :  { %1079 = vmatpush1.bf16.msra.mxu0 %v3189_v13  ;;  %1361 = vmatpush1.bf16.msra.mxu1 %v3189_v13  ;;  %v2204_v13 = vld.sshfl [vmem:[%s3985_s0 + $0x11] sm:$0x1 pattern:$0x75316420] }
  0xc4   :  { %1080 = vmatprep.subr.bf16.mxu0 %v3196_v21  ;;  %1362 = vmatprep.subr.bf16.mxu1 %v3196_v21  ;;  %v3230_v21 = vld [vmem:[%s3984_s1 + $0x334] ss:$8 sps:$4 sm:$0xff]   ;;  %v1227_v52 = vrot.slane %v2204_v13, %v2590_v16  ;;  %v2500_v13 = vld [vmem:[%s3984_s1] ss:$8 sps:$4 sm:$0xff]  }
  0xc5   :  { %1110 = vmatprep.mubr.bf16.mxu0 %v211_v22  ;;  %1392 = vmatprep.mubr.bf16.mxu1 %v1213_v26  ;;  %4138 = vst [vmem:[#allocation24_spill] sm:$0xff] %v3230_v21  ;;  %v3237_v26 = vld [vmem:[%s3984_s1 + $0x330] ss:$8 sps:$4 sm:$0xff]   ;;  %v3244_v22 = vld [vmem:[%s3984_s1 + $0x344] ss:$8 sps:$4 sm:$0xff]  }
  0xc6   :  { %4139 = vst [vmem:[#allocation25_spill] sm:$0xff] %v3237_v26  ;;  %4140 = vst [vmem:[#allocation26_spill] sm:$0xff] %v3244_v22 }
  0xc7   :  { %1081 = vmatpush1.bf16.msra.mxu0 %v3209_v27  ;;  %1363 = vmatpush1.bf16.msra.mxu1 %v3209_v27  ;;  %v3423_v27 = vld [vmem:[%s3984_s1 + $0x400] ss:$8 sps:$4 sm:$0xff]  }
  0xc8   :  { %1082 = vmatprep.subr.bf16.mxu0 %v3216_v31  ;;  %1364 = vmatprep.subr.bf16.mxu1 %v3216_v31  ;;  %v209_v31 = vcombine.high %v3178_v25, %v3178_v25  ;;  %4165 = vst [vmem:[#allocation51_spill] sm:$0xff] %v3423_v27  ;;  %v3430_v25 = vld [vmem:[%s3984_s1 + $0x414] ss:$8 sps:$4 sm:$0xff]  }
  0xc9   :  { %4166 = vst [vmem:[#allocation52_spill] sm:$0xff] %v3430_v25 }
  0xcb   :  { %1083 = vmatpush1.bf16.msra.mxu0 %v3223_v32  ;;  %1365 = vmatpush1.bf16.msra.mxu1 %v3223_v32  ;;  %v3251_v32 = vld [vmem:[%s3984_s1 + $0x340] ss:$8 sps:$4 sm:$0xff]  }
  0xcc   :  { %1084 = vmatprep.subr.bf16.mxu0 %v3230_v21  ;;  %1366 = vmatprep.subr.bf16.mxu1 %v3230_v21  ;;  %4141 = vst [vmem:[#allocation27_spill] sm:$0xff] %v3251_v32  ;;  %v3258_v21 = vld [vmem:[%s3984_s1 + $0x354] ss:$8 sps:$4 sm:$0xff]  }
  0xcd   :  { %4142 = vst [vmem:[#allocation28_spill] sm:$0xff] %v3258_v21 }
  0xcf   :  { %1085 = vmatpush1.bf16.msra.mxu0 %v3237_v26  ;;  %1367 = vmatpush1.bf16.msra.mxu1 %v3237_v26  ;;  %v3265_v26 = vld [vmem:[%s3984_s1 + $0x350] ss:$8 sps:$4 sm:$0xff]  }
  0xd0   :  { %1086 = vmatprep.subr.bf16.mxu0 %v3244_v22  ;;  %1368 = vmatprep.subr.bf16.mxu1 %v3244_v22  ;;  %4143 = vst [vmem:[#allocation29_spill] sm:$0xff] %v3265_v26  ;;  %v3272_v22 = vld [vmem:[%s3984_s1 + $0x364] ss:$8 sps:$4 sm:$0xff]  }
  0xd1   :  { %4144 = vst [vmem:[#allocation30_spill] sm:$0xff] %v3272_v22 }
  0xd3   :  { %1087 = vmatpush1.bf16.msra.mxu0 %v3251_v32  ;;  %1369 = vmatpush1.bf16.msra.mxu1 %v3251_v32  ;;  %v3279_v32 = vld [vmem:[%s3984_s1 + $0x360] ss:$8 sps:$4 sm:$0xff]  }
  0xd4   :  { %1088 = vmatprep.subr.bf16.mxu0 %v3258_v21  ;;  %1370 = vmatprep.subr.bf16.mxu1 %v3258_v21  ;;  %4145 = vst [vmem:[#allocation31_spill] sm:$0xff] %v3279_v32  ;;  %v3286_v21 = vld [vmem:[%s3984_s1 + $0x374] ss:$8 sps:$4 sm:$0xff]  }
  0xd5   :  { %4146 = vst [vmem:[#allocation32_spill] sm:$0xff] %v3286_v21 }
  0xd7   :  { %1089 = vmatpush1.bf16.msra.mxu0 %v3265_v26  ;;  %1371 = vmatpush1.bf16.msra.mxu1 %v3265_v26  ;;  %v3293_v26 = vld [vmem:[%s3984_s1 + $0x370] ss:$8 sps:$4 sm:$0xff]  }
  0xd8   :  { %1090 = vmatprep.subr.bf16.mxu0 %v3272_v22  ;;  %1372 = vmatprep.subr.bf16.mxu1 %v3272_v22  ;;  %4147 = vst [vmem:[#allocation33_spill] sm:$0xff] %v3293_v26  ;;  %v3300_v22 = vld [vmem:[%s3984_s1 + $0x384] ss:$8 sps:$4 sm:$0xff]  }
  0xd9   :  { %4148 = vst [vmem:[#allocation34_spill] sm:$0xff] %v3300_v22 }
  0xdb   :  { %1091 = vmatpush1.bf16.msra.mxu0 %v3279_v32  ;;  %1373 = vmatpush1.bf16.msra.mxu1 %v3279_v32  ;;  %v3307_v32 = vld [vmem:[%s3984_s1 + $0x380] ss:$8 sps:$4 sm:$0xff]  }
  0xdc   :  { %1092 = vmatprep.subr.bf16.mxu0 %v3286_v21  ;;  %1374 = vmatprep.subr.bf16.mxu1 %v3286_v21  ;;  %4149 = vst [vmem:[#allocation35_spill] sm:$0xff] %v3307_v32  ;;  %v3314_v21 = vld [vmem:[%s3984_s1 + $0x394] ss:$8 sps:$4 sm:$0xff]  }
  0xdd   :  { %4150 = vst [vmem:[#allocation36_spill] sm:$0xff] %v3314_v21 }
  0xdf   :  { %1093 = vmatpush1.bf16.msra.mxu0 %v3293_v26  ;;  %1375 = vmatpush1.bf16.msra.mxu1 %v3293_v26  ;;  %v3321_v26 = vld [vmem:[%s3984_s1 + $0x390] ss:$8 sps:$4 sm:$0xff]  }
  0xe0   :  { %1094 = vmatprep.subr.bf16.mxu0 %v3300_v22  ;;  %1376 = vmatprep.subr.bf16.mxu1 %v3300_v22  ;;  %4151 = vst [vmem:[#allocation37_spill] sm:$0xff] %v3321_v26  ;;  %v3328_v22 = vld [vmem:[%s3984_s1 + $0x3a4] ss:$8 sps:$4 sm:$0xff]  }
  0xe1   :  { %4152 = vst [vmem:[#allocation38_spill] sm:$0xff] %v3328_v22 }
  0xe3   :  { %1095 = vmatpush1.bf16.msra.mxu0 %v3307_v32  ;;  %1377 = vmatpush1.bf16.msra.mxu1 %v3307_v32  ;;  %v3335_v32 = vld [vmem:[%s3984_s1 + $0x3a0] ss:$8 sps:$4 sm:$0xff]  }
  0xe4   :  { %1096 = vmatprep.subr.bf16.mxu0 %v3314_v21  ;;  %1378 = vmatprep.subr.bf16.mxu1 %v3314_v21  ;;  %4153 = vst [vmem:[#allocation39_spill] sm:$0xff] %v3335_v32  ;;  %v3342_v21 = vld [vmem:[%s3984_s1 + $0x3b4] ss:$8 sps:$4 sm:$0xff]  }
  0xe5   :  { %4154 = vst [vmem:[#allocation40_spill] sm:$0xff] %v3342_v21 }
  0xe7   :  { %1097 = vmatpush1.bf16.msra.mxu0 %v3321_v26  ;;  %1379 = vmatpush1.bf16.msra.mxu1 %v3321_v26  ;;  %v3349_v26 = vld [vmem:[%s3984_s1 + $0x3b0] ss:$8 sps:$4 sm:$0xff]  }
  0xe8   :  { %1098 = vmatprep.subr.bf16.mxu0 %v3328_v22  ;;  %1380 = vmatprep.subr.bf16.mxu1 %v3328_v22  ;;  %4155 = vst [vmem:[#allocation41_spill] sm:$0xff] %v3349_v26  ;;  %v3356_v22 = vld [vmem:[%s3984_s1 + $0x3c4] ss:$8 sps:$4 sm:$0xff]  }
  0xe9   :  { %4156 = vst [vmem:[#allocation42_spill] sm:$0xff] %v3356_v22 }
  0xeb   :  { %1099 = vmatpush1.bf16.msra.mxu0 %v3335_v32  ;;  %1381 = vmatpush1.bf16.msra.mxu1 %v3335_v32  ;;  %v3363_v32 = vld [vmem:[%s3984_s1 + $0x3c0] ss:$8 sps:$4 sm:$0xff]  }
  0xec   :  { %1100 = vmatprep.subr.bf16.mxu0 %v3342_v21  ;;  %1382 = vmatprep.subr.bf16.mxu1 %v3342_v21  ;;  %4157 = vst [vmem:[#allocation43_spill] sm:$0xff] %v3363_v32  ;;  %v3370_v21 = vld [vmem:[%s3984_s1 + $0x3d4] ss:$8 sps:$4 sm:$0xff]  }
  0xed   :  { %4158 = vst [vmem:[#allocation44_spill] sm:$0xff] %v3370_v21 }
  0xef   :  { %1101 = vmatpush1.bf16.msra.mxu0 %v3349_v26  ;;  %1383 = vmatpush1.bf16.msra.mxu1 %v3349_v26  ;;  %v3377_v26 = vld [vmem:[%s3984_s1 + $0x3d0] ss:$8 sps:$4 sm:$0xff]  }
  0xf0   :  { %1102 = vmatprep.subr.bf16.mxu0 %v3356_v22  ;;  %1384 = vmatprep.subr.bf16.mxu1 %v3356_v22  ;;  %4159 = vst [vmem:[#allocation45_spill] sm:$0xff] %v3377_v26  ;;  %v3384_v22 = vld [vmem:[%s3984_s1 + $0x3e4] ss:$8 sps:$4 sm:$0xff]  }
  0xf1   :  { %4160 = vst [vmem:[#allocation46_spill] sm:$0xff] %v3384_v22 }
  0xf3   :  { %1103 = vmatpush1.bf16.msra.mxu0 %v3363_v32  ;;  %1385 = vmatpush1.bf16.msra.mxu1 %v3363_v32  ;;  %v3391_v32 = vld [vmem:[%s3984_s1 + $0x3e0] ss:$8 sps:$4 sm:$0xff]  }
  0xf4   :  { %1104 = vmatprep.subr.bf16.mxu0 %v3370_v21  ;;  %1386 = vmatprep.subr.bf16.mxu1 %v3370_v21  ;;  %4161 = vst [vmem:[#allocation47_spill] sm:$0xff] %v3391_v32  ;;  %v3398_v21 = vld [vmem:[%s3984_s1 + $0x3f4] ss:$8 sps:$4 sm:$0xff]  }
  0xf5   :  { %4162 = vst [vmem:[#allocation48_spill] sm:$0xff] %v3398_v21 }
  0xf7   :  { %1105 = vmatpush1.bf16.msra.mxu0 %v3377_v26  ;;  %1387 = vmatpush1.bf16.msra.mxu1 %v3377_v26  ;;  %v3405_v26 = vld [vmem:[%s3984_s1 + $0x3f0] ss:$8 sps:$4 sm:$0xff]  }
  0xf8   :  { %1106 = vmatprep.subr.bf16.mxu0 %v3384_v22  ;;  %1388 = vmatprep.subr.bf16.mxu1 %v3384_v22  ;;  %4163 = vst [vmem:[#allocation49_spill] sm:$0xff] %v3405_v26  ;;  %v3412_v22 = vld [vmem:[%s3984_s1 + $0x404] ss:$8 sps:$4 sm:$0xff]  }
  0xf9   :  { %4164 = vst [vmem:[#allocation50_spill] sm:$0xff] %v3412_v22 }
  0xfb   :  { %1107 = vmatpush1.bf16.msra.mxu0 %v3391_v32  ;;  %1389 = vmatpush1.bf16.msra.mxu1 %v3391_v32  ;;  %v1211_v32 = vcombine.high %v3182_v28, %v3182_v28  ;;  %v3437_v28 = vld [vmem:[%s3984_s1 + $0x410] ss:$8 sps:$4 sm:$0xff]  }
  0xfc   :  { %1108 = vmatprep.subr.bf16.mxu0 %v3398_v21  ;;  %1390 = vmatprep.subr.bf16.mxu1 %v3398_v21  ;;  %4167 = vst [vmem:[#allocation53_spill] sm:$0xff] %v3437_v28  ;;  %v2057_v21 = vld.sshfl [vmem:[%s3985_s0 + $0x8] sm:$0x1 pattern:$0x75316420] }
  0xff   :  { %1109 = vmatpush1.bf16.msra.mxu0 %v3405_v26  ;;  %1391 = vmatpush1.bf16.msra.mxu1 %v3405_v26 }
 0x100   :  { %1119 = vmatprep.subr.bf16.mxu0 %v3412_v22  ;;  %1401 = vmatprep.subr.bf16.mxu1 %v3412_v22  ;;  %v3444_v22 = vld [vmem:[%s3984_s1 + $0x424] ss:$8 sps:$4 sm:$0xff]  }
 0x101   :  { %4168 = vst [vmem:[#allocation54_spill] sm:$0xff] %v3444_v22 }
 0x102   :  { %1111 = vmatmul.mubr.bf16.vlgmr.msra.gmra.mrb[0].mxu0 %v209_v31  ;;  %1393 = vmatmul.mubr.bf16.vlgmr.msra.gmra.mrb[0].mxu1 %v1211_v32  ;;  %v4072_v31 = vmov 0   ;;  %v3453_v32 = vld [vmem:[%s3984_s1 + $0x420] ss:$8 sps:$4 sm:$0xff]  }
 0x103   :  { %1120 = vmatpush1.bf16.msra.mxu0 %v3423_v27  ;;  %1402 = vmatpush1.bf16.msra.mxu1 %v3423_v27  ;;  %4169 = vst [vmem:[#allocation55_spill] sm:$0xff] %v3453_v32  ;;  %v3526_v27 = vld [vmem:[%s3984_s1 + $0x474] ss:$8 sps:$4 sm:$0xff]  }
 0x104   :  { %1121 = vmatprep.subr.bf16.mxu0 %v3430_v25  ;;  %1403 = vmatprep.subr.bf16.mxu1 %v3430_v25  ;;  %v3460_v25 = vld [vmem:[%s3984_s1 + $0x434] ss:$8 sps:$4 sm:$0xff]   ;;  %4178 = vst [vmem:[#allocation64_spill] sm:$0xff] %v3526_v27 }
 0x105   :  { %1151 = vmatprep.mubr.bf16.mxu0 %v4072_v31  ;;  %1433 = vmatprep.mubr.bf16.mxu1 %v4072_v31  ;;  %4170 = vst [vmem:[#allocation56_spill] sm:$0xff] %v3460_v25  ;;  %v3467_v31 = vld [vmem:[%s3984_s1 + $0x430] ss:$8 sps:$4 sm:$0xff]  }
 0x106   :  { %4171 = vst [vmem:[#allocation57_spill] sm:$0xff] %v3467_v31 }
 0x107   :  { %1122 = vmatpush1.bf16.msra.mxu0 %v3437_v28  ;;  %1404 = vmatpush1.bf16.msra.mxu1 %v3437_v28  ;;  %v3507_v28 = vld [vmem:[%s3985_s0 + $0x12] sm:$0xff] }
 0x108   :  { %1123 = vmatprep.subr.bf16.mxu0 %v3444_v22  ;;  %1405 = vmatprep.subr.bf16.mxu1 %v3444_v22  ;;  %v3474_v22 = vld [vmem:[%s3984_s1 + $0x444] ss:$8 sps:$4 sm:$0xff]   ;;  %v3530_v26 = vrot.slane %v3507_v28, %v2590_v16 }
 0x109   :  { %4172 = vst [vmem:[#allocation58_spill] sm:$0xff] %v3474_v22 }
 0x10a   :  { %v1464_v18 = vcombine.high %v3530_v26, %v3530_v26 }
 0x10b   :  { %1124 = vmatpush1.bf16.msra.mxu0 %v3453_v32  ;;  %1406 = vmatpush1.bf16.msra.mxu1 %v3453_v32  ;;  %v3481_v32 = vld [vmem:[%s3984_s1 + $0x440] ss:$8 sps:$4 sm:$0xff]  }
 0x10c   :  { %1125 = vmatprep.subr.bf16.mxu0 %v3460_v25  ;;  %1407 = vmatprep.subr.bf16.mxu1 %v3460_v25  ;;  %4173 = vst [vmem:[#allocation59_spill] sm:$0xff] %v3481_v32  ;;  %v3488_v25 = vld [vmem:[%s3984_s1 + $0x454] ss:$8 sps:$4 sm:$0xff]  }
 0x10d   :  { %4174 = vst [vmem:[#allocation60_spill] sm:$0xff] %v3488_v25 }
 0x10f   :  { %1126 = vmatpush1.bf16.msra.mxu0 %v3467_v31  ;;  %1408 = vmatpush1.bf16.msra.mxu1 %v3467_v31  ;;  %v3495_v31 = vld [vmem:[%s3984_s1 + $0x450] ss:$8 sps:$4 sm:$0xff]  }
 0x110   :  { %1127 = vmatprep.subr.bf16.mxu0 %v3474_v22  ;;  %1409 = vmatprep.subr.bf16.mxu1 %v3474_v22  ;;  %4175 = vst [vmem:[#allocation61_spill] sm:$0xff] %v3495_v31  ;;  %v3502_v22 = vld [vmem:[%s3984_s1 + $0x464] ss:$8 sps:$4 sm:$0xff]  }
 0x111   :  { %4176 = vst [vmem:[#allocation62_spill] sm:$0xff] %v3502_v22 }
 0x113   :  { %1128 = vmatpush1.bf16.msra.mxu0 %v3481_v32  ;;  %1410 = vmatpush1.bf16.msra.mxu1 %v3481_v32  ;;  %v3512_v32 = vld [vmem:[%s3985_s0 + $0x1b] sm:$0xff] }
 0x114   :  { %1129 = vmatprep.subr.bf16.mxu0 %v3488_v25  ;;  %1411 = vmatprep.subr.bf16.mxu1 %v3488_v25  ;;  %v3519_v25 = vld [vmem:[%s3984_s1 + $0x460] ss:$8 sps:$4 sm:$0xff]  }
 0x115   :  { %4177 = vst [vmem:[#allocation63_spill] sm:$0xff] %v3519_v25 }
 0x117   :  { %1130 = vmatpush1.bf16.msra.mxu0 %v3495_v31  ;;  %1412 = vmatpush1.bf16.msra.mxu1 %v3495_v31  ;;  %v3534_v31 = vrot.slane %v3512_v32, %v2590_v16 }
 0x118   :  { %1131 = vmatprep.subr.bf16.mxu0 %v3502_v22  ;;  %1413 = vmatprep.subr.bf16.mxu1 %v3502_v22  ;;  %v3544_v22 = vld [vmem:[%s3984_s1 + $0x470] ss:$8 sps:$4 sm:$0xff]  }
 0x119   :  { %v1748_v17 = vcombine.high %v3534_v31, %v3534_v31 }
 0x11b   :  { %1132 = vmatpush1.bf16.msra.mxu0 %v3519_v25  ;;  %1414 = vmatpush1.bf16.msra.mxu1 %v3519_v25  ;;  %v225_v25 = vrot.slane %v2057_v21, %v2590_v16  ;;  %v3566_v48 = vrot.slane %v1748_v17, %v2590_v16  ;;  %v2501_v21 = vld [vmem:[%s3984_s1 + $0x14] ss:$8 sps:$4 sm:$0xff]   ;;  %v2504_v17 = vld [vmem:[%s3984_s1 + $0x20] ss:$8 sps:$4 sm:$0xff]  }
 0x11c   :  { %1133 = vmatprep.subr.bf16.mxu0 %v3526_v27  ;;  %1415 = vmatprep.subr.bf16.mxu1 %v3526_v27  ;;  %v3563_v27 = vrot.slane %v1464_v18, %v2590_v16  ;;  %v2505_v18 = vld [vmem:[%s3984_s1 + $0x34] ss:$8 sps:$4 sm:$0xff]  }
 0x11f   :  { %1134 = vmatpush1.bf16.msra.mxu0 %v3544_v22  ;;  %1416 = vmatpush1.bf16.msra.mxu1 %v3544_v22 }
 0x120   :  { %1521 = vmatprep.subr.bf16.mxu0 %v2499_v51  ;;  %1805 = vmatprep.subr.bf16.mxu1 %v2499_v51  ;;  %v2502_v51 = vld [vmem:[%s3984_s1 + $0x10] ss:$8 sps:$4 sm:$0xff]  }
 0x122   :  { %1152 = vmatmul.mubr.bf16.vlgmr.msra.gmra.mrb[0].mxu0 %v225_v25  ;;  %1434 = vmatmul.mubr.bf16.vlgmr.msra.gmra.mrb[0].mxu1 %v1227_v52  ;;  %v2503_v52 = vld [vmem:[%s3984_s1 + $0x24] ss:$8 sps:$4 sm:$0xff]   ;;  %v2506_v25 = vld [vmem:[%s3984_s1 + $0x30] ss:$8 sps:$4 sm:$0xff]  }
 0x123   :  { %1522 = vmatpush1.bf16.msra.mxu0 %v2500_v13  ;;  %1806 = vmatpush1.bf16.msra.mxu1 %v2500_v13  ;;  %v2507_v13 = vld [vmem:[%s3984_s1 + $0x44] ss:$8 sps:$4 sm:$0xff]  }
 0x124   :  { %1523 = vmatprep.subr.bf16.mxu0 %v2501_v21  ;;  %1807 = vmatprep.subr.bf16.mxu1 %v2501_v21  ;;  %v2508_v21 = vld [vmem:[%s3984_s1 + $0x40] ss:$8 sps:$4 sm:$0xff]  }
 0x125   :  { %1553 = vmatprep.mubr.bf16.mxu0 %v3563_v27  ;;  %1837 = vmatprep.mubr.bf16.mxu1 %v3566_v48 }
 0x127   :  { %1524 = vmatpush1.bf16.msra.mxu0 %v2502_v51  ;;  %1808 = vmatpush1.bf16.msra.mxu1 %v2502_v51  ;;  %v2509_v51 = vld [vmem:[%s3984_s1 + $0x54] ss:$8 sps:$4 sm:$0xff]  }
 0x128   :  { %1525 = vmatprep.subr.bf16.mxu0 %v2503_v52  ;;  %1809 = vmatprep.subr.bf16.mxu1 %v2503_v52  ;;  %v2510_v52 = vld [vmem:[%s3984_s1 + $0x50] ss:$8 sps:$4 sm:$0xff]  }
 0x12b   :  { %1526 = vmatpush1.bf16.msra.mxu0 %v2504_v17  ;;  %1810 = vmatpush1.bf16.msra.mxu1 %v2504_v17  ;;  %v2511_v17 = vld [vmem:[%s3984_s1 + $0x64] ss:$8 sps:$4 sm:$0xff]  }
 0x12c   :  { %1527 = vmatprep.subr.bf16.mxu0 %v2505_v18  ;;  %1811 = vmatprep.subr.bf16.mxu1 %v2505_v18  ;;  %v2512_v18 = vld [vmem:[%s3984_s1 + $0x60] ss:$8 sps:$4 sm:$0xff]  }
 0x12f   :  { %1528 = vmatpush1.bf16.msra.mxu0 %v2506_v25  ;;  %1812 = vmatpush1.bf16.msra.mxu1 %v2506_v25  ;;  %v2513_v25 = vld [vmem:[%s3984_s1 + $0x74] ss:$8 sps:$4 sm:$0xff]  }
 0x130   :  { %1529 = vmatprep.subr.bf16.mxu0 %v2507_v13  ;;  %1813 = vmatprep.subr.bf16.mxu1 %v2507_v13  ;;  %v2514_v13 = vld [vmem:[%s3984_s1 + $0x70] ss:$8 sps:$4 sm:$0xff]  }
 0x133   :  { %1530 = vmatpush1.bf16.msra.mxu0 %v2508_v21  ;;  %1814 = vmatpush1.bf16.msra.mxu1 %v2508_v21  ;;  %v2515_v21 = vld [vmem:[%s3984_s1 + $0x84] ss:$8 sps:$4 sm:$0xff]  }
 0x134   :  { %1531 = vmatprep.subr.bf16.mxu0 %v2509_v51  ;;  %1815 = vmatprep.subr.bf16.mxu1 %v2509_v51  ;;  %v2516_v51 = vld [vmem:[%s3984_s1 + $0x80] ss:$8 sps:$4 sm:$0xff]  }
 0x137   :  { %1532 = vmatpush1.bf16.msra.mxu0 %v2510_v52  ;;  %1816 = vmatpush1.bf16.msra.mxu1 %v2510_v52  ;;  %v2517_v52 = vld [vmem:[%s3984_s1 + $0x94] ss:$8 sps:$4 sm:$0xff]  }
 0x138   :  { %1533 = vmatprep.subr.bf16.mxu0 %v2511_v17  ;;  %1817 = vmatprep.subr.bf16.mxu1 %v2511_v17  ;;  %v2518_v17 = vld [vmem:[%s3984_s1 + $0x90] ss:$8 sps:$4 sm:$0xff]  }
 0x13b   :  { %1534 = vmatpush1.bf16.msra.mxu0 %v2512_v18  ;;  %1818 = vmatpush1.bf16.msra.mxu1 %v2512_v18  ;;  %v2519_v18 = vld [vmem:[%s3984_s1 + $0xa4] ss:$8 sps:$4 sm:$0xff]  }
 0x13c   :  { %1535 = vmatprep.subr.bf16.mxu0 %v2513_v25  ;;  %1819 = vmatprep.subr.bf16.mxu1 %v2513_v25  ;;  %v2520_v25 = vld [vmem:[%s3984_s1 + $0xa0] ss:$8 sps:$4 sm:$0xff]  }
 0x13f   :  { %1536 = vmatpush1.bf16.msra.mxu0 %v2514_v13  ;;  %1820 = vmatpush1.bf16.msra.mxu1 %v2514_v13  ;;  %v2521_v13 = vld [vmem:[%s3984_s1 + $0xb4] ss:$8 sps:$4 sm:$0xff]  }
 0x140   :  { %1537 = vmatprep.subr.bf16.mxu0 %v2515_v21  ;;  %1821 = vmatprep.subr.bf16.mxu1 %v2515_v21  ;;  %v2522_v21 = vld [vmem:[%s3984_s1 + $0xb0] ss:$8 sps:$4 sm:$0xff]  }
 0x143   :  { %1538 = vmatpush1.bf16.msra.mxu0 %v2516_v51  ;;  %1822 = vmatpush1.bf16.msra.mxu1 %v2516_v51  ;;  %v2523_v51 = vld [vmem:[%s3984_s1 + $0xc4] ss:$8 sps:$4 sm:$0xff]  }
 0x144   :  { %1539 = vmatprep.subr.bf16.mxu0 %v2517_v52  ;;  %1823 = vmatprep.subr.bf16.mxu1 %v2517_v52  ;;  %v2524_v52 = vld [vmem:[%s3984_s1 + $0xc0] ss:$8 sps:$4 sm:$0xff]  }
 0x147   :  { %1540 = vmatpush1.bf16.msra.mxu0 %v2518_v17  ;;  %1824 = vmatpush1.bf16.msra.mxu1 %v2518_v17  ;;  %v2525_v17 = vld [vmem:[%s3984_s1 + $0xd4] ss:$8 sps:$4 sm:$0xff]  }
 0x148   :  { %1541 = vmatprep.subr.bf16.mxu0 %v2519_v18  ;;  %1825 = vmatprep.subr.bf16.mxu1 %v2519_v18  ;;  %v2526_v18 = vld [vmem:[%s3984_s1 + $0xd0] ss:$8 sps:$4 sm:$0xff]  }
 0x14b   :  { %1542 = vmatpush1.bf16.msra.mxu0 %v2520_v25  ;;  %1826 = vmatpush1.bf16.msra.mxu1 %v2520_v25  ;;  %v2527_v25 = vld [vmem:[%s3984_s1 + $0xe4] ss:$8 sps:$4 sm:$0xff]  }
 0x14c   :  { %1543 = vmatprep.subr.bf16.mxu0 %v2521_v13  ;;  %1827 = vmatprep.subr.bf16.mxu1 %v2521_v13  ;;  %v2528_v13 = vld [vmem:[%s3984_s1 + $0xe0] ss:$8 sps:$4 sm:$0xff]  }
 0x14f   :  { %1544 = vmatpush1.bf16.msra.mxu0 %v2522_v21  ;;  %1828 = vmatpush1.bf16.msra.mxu1 %v2522_v21  ;;  %v2529_v21 = vld [vmem:[%s3984_s1 + $0xf4] ss:$8 sps:$4 sm:$0xff]  }
 0x150   :  { %1545 = vmatprep.subr.bf16.mxu0 %v2523_v51  ;;  %1829 = vmatprep.subr.bf16.mxu1 %v2523_v51  ;;  %v3662_v51 = vrot.slane %v3530_v26, %v2590_v16  ;;  %v1496_v26 = vcombine.high %v3563_v27, %v3563_v27 }
 0x153   :  { %1546 = vmatpush1.bf16.msra.mxu0 %v2524_v52  ;;  %1830 = vmatpush1.bf16.msra.mxu1 %v2524_v52  ;;  %v3666_v52 = vrot.slane %v3534_v31, %v2590_v16  ;;  %v1780_v31 = vcombine.high %v3566_v48, %v3566_v48 }
 0x154   :  { %1547 = vmatprep.subr.bf16.mxu0 %v2525_v17  ;;  %1831 = vmatprep.subr.bf16.mxu1 %v2525_v17  ;;  %v2530_v17 = vld [vmem:[%s3984_s1 + $0xf0] ss:$8 sps:$4 sm:$0xff]  }
 0x157   :  { %1548 = vmatpush1.bf16.msra.mxu0 %v2526_v18  ;;  %1832 = vmatpush1.bf16.msra.mxu1 %v2526_v18  ;;  %v2531_v18 = vld [vmem:[%s3984_s1 + $0x104] ss:$8 sps:$4 sm:$0xff]  }
 0x158   :  { %1549 = vmatprep.subr.bf16.mxu0 %v2527_v25  ;;  %1833 = vmatprep.subr.bf16.mxu1 %v2527_v25  ;;  %v4208_v25 = vld [vmem:[#allocation32_spill] sm:$0xff] }
 0x15b   :  { %1550 = vmatpush1.bf16.msra.mxu0 %v2528_v13  ;;  %1834 = vmatpush1.bf16.msra.mxu1 %v2528_v13  ;;  %v4209_v13 = vld [vmem:[#allocation33_spill] sm:$0xff] }
 0x15c   :  { %1551 = vmatprep.subr.bf16.mxu0 %v2529_v21  ;;  %1835 = vmatprep.subr.bf16.mxu1 %v2529_v21  ;;  %v4210_v21 = vld [vmem:[#allocation34_spill] sm:$0xff] }
 0x15f   :  { %1552 = vmatpush1.bf16.msra.mxu0 %v2530_v17  ;;  %1836 = vmatpush1.bf16.msra.mxu1 %v2530_v17  ;;  %v4213_v17 = vld [vmem:[#allocation37_spill] sm:$0xff] }
 0x160   :  { %1562 = vmatprep.subr.bf16.mxu0 %v2688_v46  ;;  %1846 = vmatprep.subr.bf16.mxu1 %v2531_v18  ;;  %v1449_v46 = vcombine.high %v3507_v28, %v3507_v28  ;;  %v4206_v28 = vld [vmem:[#allocation30_spill] sm:$0xff] }
 0x161   :  { %v4214_v18 = vld [vmem:[#allocation38_spill] sm:$0xff] }
 0x162   :  { %1554 = vmatmul.mubr.bf16.vlgmr.msra.gmra.mrb[4].mxu0 %v3662_v51  ;;  %1838 = vmatmul.mubr.bf16.vlgmr.msra.gmra.mrb[4].mxu1 %v3666_v52 }
 0x163   :  { %1563 = vmatpush1.bf16.msra.mxu0 %v2701_v49  ;;  %1847 = vmatpush1.bf16.msra.mxu1 %v2701_v49  ;;  %v1733_v49 = vcombine.high %v3512_v32, %v3512_v32  ;;  %v4207_v32 = vld [vmem:[#allocation31_spill] sm:$0xff] }
 0x164   :  { %1564 = vmatprep.subr.bf16.mxu0 %v2708_v50  ;;  %1848 = vmatprep.subr.bf16.mxu1 %v2708_v50  ;;  %v3742_v50 = vrot.slane %v1449_v46, %v2590_v16  ;;  %v4217_v46 = vld [vmem:[#allocation41_spill] sm:$0xff] }
 0x165   :  { %1594 = vmatprep.mubr.bf16.mxu0 %v1496_v26  ;;  %1878 = vmatprep.mubr.bf16.mxu1 %v1780_v31  ;;  %v4215_v26 = vld [vmem:[#allocation39_spill] sm:$0xff]  ;;  %v4216_v31 = vld [vmem:[#allocation40_spill] sm:$0xff] }
 0x167   :  { %1565 = vmatpush1.bf16.msra.mxu0 %v2721_v53  ;;  %1849 = vmatpush1.bf16.msra.mxu1 %v2721_v53  ;;  %v3745_v53 = vrot.slane %v1733_v49, %v2590_v16  ;;  %v4218_v49 = vld [vmem:[#allocation42_spill] sm:$0xff] }
 0x168   :  { %1566 = vmatprep.subr.bf16.mxu0 %v2728_v54  ;;  %1850 = vmatprep.subr.bf16.mxu1 %v2728_v54  ;;  %v1465_v54 = vcombine.high %v3742_v50, %v3742_v50 }
 0x16b   :  { %1567 = vmatpush1.bf16.msra.mxu0 %v2735_v55  ;;  %1851 = vmatpush1.bf16.msra.mxu1 %v2735_v55  ;;  %v1749_v55 = vcombine.high %v3745_v53, %v3745_v53 }
 0x16c   :  { %1568 = vmatprep.subr.bf16.mxu0 %v2742_v56  ;;  %1852 = vmatprep.subr.bf16.mxu1 %v2742_v56  ;;  %v1494_v56 = vcombine.high %v3662_v51, %v3662_v51  ;;  %v4211_v51 = vld [vmem:[#allocation35_spill] sm:$0xff] }
 0x16f   :  { %1569 = vmatpush1.bf16.msra.mxu0 %v2749_v57  ;;  %1853 = vmatpush1.bf16.msra.mxu1 %v2749_v57  ;;  %v1778_v57 = vcombine.high %v3666_v52, %v3666_v52  ;;  %v4212_v52 = vld [vmem:[#allocation36_spill] sm:$0xff] }
 0x170   :  { %1570 = vmatprep.subr.bf16.mxu0 %v2756_v58  ;;  %1854 = vmatprep.subr.bf16.mxu1 %v2756_v58  ;;  %v3764_v58 = vrot.slane %v1465_v54, %v2590_v16  ;;  %v4221_v54 = vld [vmem:[#allocation45_spill] sm:$0xff] }
 0x173   :  { %1571 = vmatpush1.bf16.msra.mxu0 %v2763_v59  ;;  %1855 = vmatpush1.bf16.msra.mxu1 %v2763_v59  ;;  %v3767_v59 = vrot.slane %v1749_v55, %v2590_v16  ;;  %v4222_v55 = vld [vmem:[#allocation46_spill] sm:$0xff] }
 0x174   :  { %1572 = vmatprep.subr.bf16.mxu0 %v2770_v60  ;;  %1856 = vmatprep.subr.bf16.mxu1 %v2770_v60  ;;  %v4179_v60 = vld [vmem:[#allocation3_spill] sm:$0xff] }
 0x177   :  { %1573 = vmatpush1.bf16.msra.mxu0 %v2777_v61  ;;  %1857 = vmatpush1.bf16.msra.mxu1 %v2777_v61  ;;  %v4180_v61 = vld [vmem:[#allocation4_spill] sm:$0xff] }
 0x178   :  { %1574 = vmatprep.subr.bf16.mxu0 %v2784_v62  ;;  %1858 = vmatprep.subr.bf16.mxu1 %v2784_v62  ;;  %v4181_v62 = vld [vmem:[#allocation5_spill] sm:$0xff] }
 0x17b   :  { %1575 = vmatpush1.bf16.msra.mxu0 %v2791_v63  ;;  %1859 = vmatpush1.bf16.msra.mxu1 %v2791_v63  ;;  %v4182_v63 = vld [vmem:[#allocation6_spill] sm:$0xff] }
 0x17c   :  { %1576 = vmatprep.subr.bf16.mxu0 %v2798_v0  ;;  %1860 = vmatprep.subr.bf16.mxu1 %v2798_v0  ;;  %v4183_v0 = vld [vmem:[#allocation7_spill] sm:$0xff] }
 0x17f   :  { %1577 = vmatpush1.bf16.msra.mxu0 %v2805_v1  ;;  %1861 = vmatpush1.bf16.msra.mxu1 %v2805_v1  ;;  %v4184_v1 = vld [vmem:[#allocation8_spill] sm:$0xff] }
 0x180   :  { %1578 = vmatprep.subr.bf16.mxu0 %v2812_v2  ;;  %1862 = vmatprep.subr.bf16.mxu1 %v2812_v2  ;;  %v4185_v2 = vld [vmem:[#allocation9_spill] sm:$0xff] }
 0x183   :  { %1579 = vmatpush1.bf16.msra.mxu0 %v2819_v3  ;;  %1863 = vmatpush1.bf16.msra.mxu1 %v2819_v3  ;;  %v4186_v3 = vld [vmem:[#allocation10_spill] sm:$0xff] }
 0x184   :  { %1580 = vmatprep.subr.bf16.mxu0 %v2826_v4  ;;  %1864 = vmatprep.subr.bf16.mxu1 %v2826_v4  ;;  %v4187_v4 = vld [vmem:[#allocation11_spill] sm:$0xff] }
 0x187   :  { %1581 = vmatpush1.bf16.msra.mxu0 %v2833_v5  ;;  %1865 = vmatpush1.bf16.msra.mxu1 %v2833_v5  ;;  %v4188_v5 = vld [vmem:[#allocation12_spill] sm:$0xff] }
 0x188   :  { %1582 = vmatprep.subr.bf16.mxu0 %v2840_v6  ;;  %1866 = vmatprep.subr.bf16.mxu1 %v2840_v6  ;;  %v4189_v6 = vld [vmem:[#allocation13_spill] sm:$0xff] }
 0x18b   :  { %1583 = vmatpush1.bf16.msra.mxu0 %v2847_v7  ;;  %1867 = vmatpush1.bf16.msra.mxu1 %v2847_v7  ;;  %v4190_v7 = vld [vmem:[#allocation14_spill] sm:$0xff] }
 0x18c   :  { %1584 = vmatprep.subr.bf16.mxu0 %v2854_v8  ;;  %1868 = vmatprep.subr.bf16.mxu1 %v2854_v8  ;;  %v4191_v8 = vld [vmem:[#allocation15_spill] sm:$0xff] }
 0x18f   :  { %1585 = vmatpush1.bf16.msra.mxu0 %v2861_v9  ;;  %1869 = vmatpush1.bf16.msra.mxu1 %v2861_v9  ;;  %v4192_v9 = vld [vmem:[#allocation16_spill] sm:$0xff] }
 0x190   :  { %1586 = vmatprep.subr.bf16.mxu0 %v2868_v10  ;;  %1870 = vmatprep.subr.bf16.mxu1 %v2868_v10  ;;  %v3833_v10 = vrot.slane %v3742_v50, %v2590_v16  ;;  %v4219_v50 = vld [vmem:[#allocation43_spill] sm:$0xff] }
 0x193   :  { %1587 = vmatpush1.bf16.msra.mxu0 %v2875_v11  ;;  %1871 = vmatpush1.bf16.msra.mxu1 %v2875_v11  ;;  %v3837_v11 = vrot.slane %v3745_v53, %v2590_v16  ;;  %v4220_v53 = vld [vmem:[#allocation44_spill] sm:$0xff] }
 0x194   :  { %1588 = vmatprep.subr.bf16.mxu0 %v2882_v12  ;;  %1872 = vmatprep.subr.bf16.mxu1 %v2882_v12  ;;  %v4193_v12 = vld [vmem:[#allocation17_spill] sm:$0xff] }
 0x197   :  { %1589 = vmatpush1.bf16.msra.mxu0 %v2889_v14  ;;  %1873 = vmatpush1.bf16.msra.mxu1 %v2889_v14  ;;  %v4194_v14 = vld [vmem:[#allocation18_spill] sm:$0xff] }
 0x198   :  { %1590 = vmatprep.subr.bf16.mxu0 %v2896_v15  ;;  %1874 = vmatprep.subr.bf16.mxu1 %v2896_v15  ;;  %v1497_v15 = vcombine.high %v3764_v58, %v3764_v58 }
 0x19b   :  { %1591 = vmatpush1.bf16.msra.mxu0 %v2907_v20  ;;  %1875 = vmatpush1.bf16.msra.mxu1 %v2907_v20  ;;  %v1781_v20 = vcombine.high %v3767_v59, %v3767_v59 }
 0x19c   :  { %1592 = vmatprep.subr.bf16.mxu0 %v2914_v19  ;;  %1876 = vmatprep.subr.bf16.mxu1 %v2914_v19  ;;  %v4195_v19 = vld [vmem:[#allocation19_spill] sm:$0xff] }
 0x19f   :  { %1593 = vmatpush1.bf16.msra.mxu0 %v2927_v23  ;;  %1877 = vmatpush1.bf16.msra.mxu1 %v2927_v23  ;;  %v4196_v23 = vld [vmem:[#allocation20_spill] sm:$0xff] }
 0x1a0   :  { %1603 = vmatprep.subr.bf16.mxu0 %v2934_v24  ;;  %1887 = vmatprep.subr.bf16.mxu1 %v2934_v24  ;;  %v4197_v24 = vld [vmem:[#allocation21_spill] sm:$0xff] }
 0x1a2   :  { %1595 = vmatmul.mubr.bf16.vlgmr.msra.gmra.mrb[4].mxu0 %v1494_v56  ;;  %1879 = vmatmul.mubr.bf16.vlgmr.msra.gmra.mrb[4].mxu1 %v1778_v57  ;;  %v4223_v56 = vld [vmem:[#allocation47_spill] sm:$0xff]  ;;  %v4224_v57 = vld [vmem:[#allocation48_spill] sm:$0xff] }
 0x1a3   :  { %1604 = vmatpush1.bf16.msra.mxu0 %v2949_v29  ;;  %1888 = vmatpush1.bf16.msra.mxu1 %v2949_v29  ;;  %v4198_v29 = vld [vmem:[#allocation22_spill] sm:$0xff] }
 0x1a4   :  { %1605 = vmatprep.subr.bf16.mxu0 %v2956_v30  ;;  %1889 = vmatprep.subr.bf16.mxu1 %v2956_v30  ;;  %v4199_v30 = vld [vmem:[#allocation23_spill] sm:$0xff] }
 0x1a5   :  { %1635 = vmatprep.mubr.bf16.mxu0 %v3764_v58  ;;  %1919 = vmatprep.mubr.bf16.mxu1 %v3767_v59  ;;  %v1495_v58 = vcombine.high %v3833_v10, %v3833_v10  ;;  %v1779_v59 = vcombine.high %v3837_v11, %v3837_v11 }
 0x1a7   :  { %1606 = vmatpush1.bf16.msra.mxu0 %v2969_v33  ;;  %1890 = vmatpush1.bf16.msra.mxu1 %v2969_v33  ;;  %v4200_v33 = vld [vmem:[#allocation24_spill] sm:$0xff] }
 0x1a8   :  { %1607 = vmatprep.subr.bf16.mxu0 %v2976_v34  ;;  %1891 = vmatprep.subr.bf16.mxu1 %v2976_v34  ;;  %v4201_v34 = vld [vmem:[#allocation25_spill] sm:$0xff] }
 0x1ab   :  { %1608 = vmatpush1.bf16.msra.mxu0 %v2985_v35  ;;  %1892 = vmatpush1.bf16.msra.mxu1 %v2985_v35  ;;  %v4202_v35 = vld [vmem:[#allocation26_spill] sm:$0xff] }
 0x1ac   :  { %1609 = vmatprep.subr.bf16.mxu0 %v2992_v36  ;;  %1893 = vmatprep.subr.bf16.mxu1 %v2992_v36  ;;  %v4203_v36 = vld [vmem:[#allocation27_spill] sm:$0xff] }
 0x1af   :  { %1610 = vmatpush1.bf16.msra.mxu0 %v2999_v37  ;;  %1894 = vmatpush1.bf16.msra.mxu1 %v2999_v37  ;;  %v4204_v37 = vld [vmem:[#allocation28_spill] sm:$0xff] }
 0x1b0   :  { %1611 = vmatprep.subr.bf16.mxu0 %v3006_v38  ;;  %1895 = vmatprep.subr.bf16.mxu1 %v3006_v38 }
 0x1b3   :  { %1612 = vmatpush1.bf16.msra.mxu0 %v3013_v39  ;;  %1896 = vmatpush1.bf16.msra.mxu1 %v3013_v39 }
 0x1b4   :  { %1613 = vmatprep.subr.bf16.mxu0 %v3020_v40  ;;  %1897 = vmatprep.subr.bf16.mxu1 %v3020_v40 }
 0x1b7   :  { %1614 = vmatpush1.bf16.msra.mxu0 %v3027_v41  ;;  %1898 = vmatpush1.bf16.msra.mxu1 %v3027_v41 }
 0x1b8   :  { %1615 = vmatprep.subr.bf16.mxu0 %v3034_v42  ;;  %1899 = vmatprep.subr.bf16.mxu1 %v3034_v42 }
 0x1bb   :  { %1616 = vmatpush1.bf16.msra.mxu0 %v3041_v43  ;;  %1900 = vmatpush1.bf16.msra.mxu1 %v3041_v43 }
 0x1bc   :  { %1617 = vmatprep.subr.bf16.mxu0 %v3048_v44  ;;  %1901 = vmatprep.subr.bf16.mxu1 %v3048_v44 }
 0x1bf   :  { %1618 = vmatpush1.bf16.msra.mxu0 %v3055_v45  ;;  %1902 = vmatpush1.bf16.msra.mxu1 %v3055_v45 }
 0x1c0   :  { %1619 = vmatprep.subr.bf16.mxu0 %v3062_v47  ;;  %1903 = vmatprep.subr.bf16.mxu1 %v3062_v47  ;;  %v4205_v47 = vld [vmem:[#allocation29_spill] sm:$0xff] }
 0x1c3   :  { %1620 = vmatpush1.bf16.msra.mxu0 %v4179_v60  ;;  %1904 = vmatpush1.bf16.msra.mxu1 %v4179_v60  ;;  %v4225_v60 = vld [vmem:[#allocation49_spill] sm:$0xff] }
 0x1c4   :  { %1621 = vmatprep.subr.bf16.mxu0 %v4180_v61  ;;  %1905 = vmatprep.subr.bf16.mxu1 %v4180_v61  ;;  %v4226_v61 = vld [vmem:[#allocation50_spill] sm:$0xff] }
 0x1c7   :  { %1622 = vmatpush1.bf16.msra.mxu0 %v4181_v62  ;;  %1906 = vmatpush1.bf16.msra.mxu1 %v4181_v62  ;;  %v4227_v62 = vld [vmem:[#allocation51_spill] sm:$0xff] }
 0x1c8   :  { %1623 = vmatprep.subr.bf16.mxu0 %v4182_v63  ;;  %1907 = vmatprep.subr.bf16.mxu1 %v4182_v63  ;;  %v4228_v63 = vld [vmem:[#allocation52_spill] sm:$0xff] }
 0x1cb   :  { %1624 = vmatpush1.bf16.msra.mxu0 %v4183_v0  ;;  %1908 = vmatpush1.bf16.msra.mxu1 %v4183_v0  ;;  %v4229_v0 = vmov 0  }
 0x1cc   :  { %1625 = vmatprep.subr.bf16.mxu0 %v4184_v1  ;;  %1909 = vmatprep.subr.bf16.mxu1 %v4184_v1  ;;  %v4230_v1 = vld [vmem:[#allocation53_spill] sm:$0xff] }
 0x1cf   :  { %1626 = vmatpush1.bf16.msra.mxu0 %v4185_v2  ;;  %1910 = vmatpush1.bf16.msra.mxu1 %v4185_v2  ;;  %v4231_v2 = vld [vmem:[#allocation54_spill] sm:$0xff] }
 0x1d0   :  { %1627 = vmatprep.subr.bf16.mxu0 %v4186_v3  ;;  %1911 = vmatprep.subr.bf16.mxu1 %v4186_v3  ;;  %v4232_v3 = vld [vmem:[#allocation55_spill] sm:$0xff] }
 0x1d3   :  { %1628 = vmatpush1.bf16.msra.mxu0 %v4187_v4  ;;  %1912 = vmatpush1.bf16.msra.mxu1 %v4187_v4  ;;  %v4233_v4 = vld [vmem:[#allocation56_spill] sm:$0xff] }
 0x1d4   :  { %1629 = vmatprep.subr.bf16.mxu0 %v4188_v5  ;;  %1913 = vmatprep.subr.bf16.mxu1 %v4188_v5  ;;  %v4234_v5 = vld [vmem:[#allocation57_spill] sm:$0xff] }
 0x1d7   :  { %1630 = vmatpush1.bf16.msra.mxu0 %v4189_v6  ;;  %1914 = vmatpush1.bf16.msra.mxu1 %v4189_v6  ;;  %v4235_v6 = vld [vmem:[#allocation58_spill] sm:$0xff] }
 0x1d8   :  { %1631 = vmatprep.subr.bf16.mxu0 %v4190_v7  ;;  %1915 = vmatprep.subr.bf16.mxu1 %v4190_v7  ;;  %v4236_v7 = vld [vmem:[#allocation59_spill] sm:$0xff] }
 0x1db   :  { %1632 = vmatpush1.bf16.msra.mxu0 %v4191_v8  ;;  %1916 = vmatpush1.bf16.msra.mxu1 %v4191_v8  ;;  %v4237_v8 = vld [vmem:[#allocation60_spill] sm:$0xff] }
 0x1dc   :  { %1633 = vmatprep.subr.bf16.mxu0 %v4192_v9  ;;  %1917 = vmatprep.subr.bf16.mxu1 %v4192_v9  ;;  %v4238_v9 = vld [vmem:[#allocation61_spill] sm:$0xff] }
 0x1df   :  { %1634 = vmatpush1.bf16.msra.mxu0 %v4193_v12  ;;  %1918 = vmatpush1.bf16.msra.mxu1 %v4193_v12  ;;  %v4240_v12 = vld [vmem:[#allocation63_spill] sm:$0xff] }
 0x1e0   :  { %1644 = vmatprep.subr.bf16.mxu0 %v4194_v14  ;;  %1928 = vmatprep.subr.bf16.mxu1 %v4194_v14  ;;  %v2210_v14 = vld.sshfl [vmem:[%s3985_s0 + $0x23] sm:$0x1 pattern:$0x75316420] }
 0x1e2   :  { %1636 = vmatmul.mubr.bf16.vlgmr.msra.gmra.mrb[4].mxu0 %v3833_v10  ;;  %1920 = vmatmul.mubr.bf16.vlgmr.msra.gmra.mrb[4].mxu1 %v3837_v11  ;;  %v4239_v10 = vld [vmem:[#allocation62_spill] sm:$0xff]  ;;  %v2207_v11 = vld.sshfl [vmem:[%s3985_s0 + $0x1a] sm:$0x1 pattern:$0x75316420] }
 0x1e3   :  { %1645 = vmatpush1.bf16.msra.mxu0 %v4195_v19  ;;  %1929 = vmatpush1.bf16.msra.mxu1 %v4195_v19  ;;  %v1795_v19 = vrot.slane %v2210_v14, %v2590_v16 }
 0x1e4   :  { %1646 = vmatprep.subr.bf16.mxu0 %v4196_v23  ;;  %1930 = vmatprep.subr.bf16.mxu1 %v4196_v23  ;;  %v4242_v23 = vld [vmem:[#allocation2_spill] sm:$0xff] }
 0x1e5   :  { %1676 = vmatprep.mubr.bf16.mxu0 %v1497_v15  ;;  %1960 = vmatprep.mubr.bf16.mxu1 %v1781_v20  ;;  %v4241_v15 = vld [vmem:[#allocation64_spill] sm:$0xff]  ;;  %v1511_v20 = vrot.slane %v2207_v11, %v2590_v16 }
 0x1e7   :  { %1647 = vmatpush1.bf16.msra.mxu0 %v4197_v24  ;;  %1931 = vmatpush1.bf16.msra.mxu1 %v4197_v24  ;;  %v2016_v24 = vsub.s32 0, %v4242_v23 }
 0x1e8   :  { %1648 = vmatprep.subr.bf16.mxu0 %v4198_v29  ;;  %1932 = vmatprep.subr.bf16.mxu1 %v4198_v29  ;;  %v2012_v29 = vld [vmem:[%s3986_s2] sm:$0x3] }
 0x1eb   :  { %1649 = vmatpush1.bf16.msra.mxu0 %v4199_v30  ;;  %1933 = vmatpush1.bf16.msra.mxu1 %v4199_v30  ;;  %v2020_v30 = vsub.s32 1, %v4242_v23 }
 0x1ec   :  { %1650 = vmatprep.subr.bf16.mxu0 %v4200_v33  ;;  %1934 = vmatprep.subr.bf16.mxu1 %v4200_v33 }
 0x1ef   :  { %1651 = vmatpush1.bf16.msra.mxu0 %v4201_v34  ;;  %1935 = vmatpush1.bf16.msra.mxu1 %v4201_v34 }
 0x1f0   :  { %1652 = vmatprep.subr.bf16.mxu0 %v4202_v35  ;;  %1936 = vmatprep.subr.bf16.mxu1 %v4202_v35 }
 0x1f3   :  { %1653 = vmatpush1.bf16.msra.mxu0 %v4203_v36  ;;  %1937 = vmatpush1.bf16.msra.mxu1 %v4203_v36  ;;  %v2017_v36 = vrot.slane %v2012_v29, %v2016_v24 }
 0x1f4   :  { %1654 = vmatprep.subr.bf16.mxu0 %v4204_v37  ;;  %1938 = vmatprep.subr.bf16.mxu1 %v4204_v37 }
 0x1f5   :  { %v3869_v38 = vpop.f32.mrb[0].mxu0  ;;  %v3871_v39 = vpop.f32.mrb[0].mxu1 }
 0x1f6   :  { %v1442_v40 = vmax.f32 %v3869_v38, %v3871_v39  ;;  %v3875_v41 = vpop.f32.mrb[1].mxu0  ;;  %v3877_v42 = vpop.f32.mrb[1].mxu1 }
 0x1f7   :  { %v1443_v43 = vmax.f32 %v3875_v41, %v3877_v42  ;;  %v1157_v44 = vpop.f32.mrb[2].mxu0  ;;  %v1439_v45 = vpop.f32.mrb[2].mxu1  ;;  %1655 = vmatpush1.bf16.msra.mxu0 %v4205_v47  ;;  %1939 = vmatpush1.bf16.msra.mxu1 %v4205_v47 }
 0x1f8   :  { %v1158_v48 = vpop.f32.mrb[3].mxu0  ;;  %v1440_v27 = vpop.f32.mrb[3].mxu1  ;;  %1656 = vmatprep.subr.bf16.mxu0 %v4206_v28  ;;  %1940 = vmatprep.subr.bf16.mxu1 %v4206_v28  ;;  %v2021_v45 = vrot.slane %v2012_v29, %v2020_v30 }
 0x1fb   :  { %1657 = vmatpush1.bf16.msra.mxu0 %v4207_v32  ;;  %1941 = vmatpush1.bf16.msra.mxu1 %v4207_v32 }
 0x1fc   :  { %1658 = vmatprep.subr.bf16.mxu0 %v4208_v25  ;;  %1942 = vmatprep.subr.bf16.mxu1 %v4208_v25 }
 0x1ff   :  { %1659 = vmatpush1.bf16.msra.mxu0 %v4209_v13  ;;  %1943 = vmatpush1.bf16.msra.mxu1 %v4209_v13 }
 0x200   :  { %1660 = vmatprep.subr.bf16.mxu0 %v4210_v21  ;;  %1944 = vmatprep.subr.bf16.mxu1 %v4210_v21 }
 0x203   :  { %1661 = vmatpush1.bf16.msra.mxu0 %v4211_v51  ;;  %1945 = vmatpush1.bf16.msra.mxu1 %v4211_v51 }
 0x204   :  { %1662 = vmatprep.subr.bf16.mxu0 %v4212_v52  ;;  %1946 = vmatprep.subr.bf16.mxu1 %v4212_v52 }
 0x207   :  { %1663 = vmatpush1.bf16.msra.mxu0 %v4213_v17  ;;  %1947 = vmatpush1.bf16.msra.mxu1 %v4213_v17 }
 0x208   :  { %1664 = vmatprep.subr.bf16.mxu0 %v4214_v18  ;;  %1948 = vmatprep.subr.bf16.mxu1 %v4214_v18 }
 0x20b   :  { %1665 = vmatpush1.bf16.msra.mxu0 %v4215_v26  ;;  %1949 = vmatpush1.bf16.msra.mxu1 %v4215_v26 }
 0x20c   :  { %1666 = vmatprep.subr.bf16.mxu0 %v4216_v31  ;;  %1950 = vmatprep.subr.bf16.mxu1 %v4216_v31 }
 0x20f   :  { %1667 = vmatpush1.bf16.msra.mxu0 %v4217_v46  ;;  %1951 = vmatpush1.bf16.msra.mxu1 %v4217_v46 }
 0x210   :  { %1668 = vmatprep.subr.bf16.mxu0 %v4218_v49  ;;  %1952 = vmatprep.subr.bf16.mxu1 %v4218_v49 }
 0x213   :  { %1669 = vmatpush1.bf16.msra.mxu0 %v4219_v50  ;;  %1953 = vmatpush1.bf16.msra.mxu1 %v4219_v50 }
 0x214   :  { %1670 = vmatprep.subr.bf16.mxu0 %v4220_v53  ;;  %1954 = vmatprep.subr.bf16.mxu1 %v4220_v53 }
 0x217   :  { %1671 = vmatpush1.bf16.msra.mxu0 %v4221_v54  ;;  %1955 = vmatpush1.bf16.msra.mxu1 %v4221_v54 }
 0x218   :  { %1672 = vmatprep.subr.bf16.mxu0 %v4222_v55  ;;  %1956 = vmatprep.subr.bf16.mxu1 %v4222_v55 }
 0x21b   :  { %1673 = vmatpush1.bf16.msra.mxu0 %v4223_v56  ;;  %1957 = vmatpush1.bf16.msra.mxu1 %v4223_v56 }
 0x21c   :  { %1674 = vmatprep.subr.bf16.mxu0 %v4224_v57  ;;  %1958 = vmatprep.subr.bf16.mxu1 %v4224_v57 }
 0x21f   :  { %1675 = vmatpush1.bf16.msra.mxu0 %v4225_v60  ;;  %1959 = vmatpush1.bf16.msra.mxu1 %v4225_v60 }
 0x220   :  { %1685 = vmatprep.subr.bf16.mxu0 %v4226_v61  ;;  %1969 = vmatprep.subr.bf16.mxu1 %v4226_v61 }
 0x222   :  { %1677 = vmatmul.mubr.bf16.vlgmr.msra.gmra.mrb[4].mxu0 %v1495_v58  ;;  %1961 = vmatmul.mubr.bf16.vlgmr.msra.gmra.mrb[4].mxu1 %v1779_v59 }
 0x223   :  { %1686 = vmatpush1.bf16.msra.mxu0 %v4227_v62  ;;  %1970 = vmatpush1.bf16.msra.mxu1 %v4227_v62 }
 0x224   :  { %1687 = vmatprep.subr.bf16.mxu0 %v4228_v63  ;;  %1971 = vmatprep.subr.bf16.mxu1 %v4228_v63 }
 0x225   :  { %1717 = vmatprep.mubr.bf16.mxu0 %v4229_v0  ;;  %2001 = vmatprep.mubr.bf16.mxu1 %v4229_v0 }
 0x227   :  { %1688 = vmatpush1.bf16.msra.mxu0 %v4230_v1  ;;  %1972 = vmatpush1.bf16.msra.mxu1 %v4230_v1 }
 0x228   :  { %1689 = vmatprep.subr.bf16.mxu0 %v4231_v2  ;;  %1973 = vmatprep.subr.bf16.mxu1 %v4231_v2 }
 0x22b   :  { %1690 = vmatpush1.bf16.msra.mxu0 %v4232_v3  ;;  %1974 = vmatpush1.bf16.msra.mxu1 %v4232_v3 }
 0x22c   :  { %1691 = vmatprep.subr.bf16.mxu0 %v4233_v4  ;;  %1975 = vmatprep.subr.bf16.mxu1 %v4233_v4 }
 0x22f   :  { %1692 = vmatpush1.bf16.msra.mxu0 %v4234_v5  ;;  %1976 = vmatpush1.bf16.msra.mxu1 %v4234_v5 }
 0x230   :  { %1693 = vmatprep.subr.bf16.mxu0 %v4235_v6  ;;  %1977 = vmatprep.subr.bf16.mxu1 %v4235_v6 }
 0x233   :  { %1694 = vmatpush1.bf16.msra.mxu0 %v4236_v7  ;;  %1978 = vmatpush1.bf16.msra.mxu1 %v4236_v7 }
 0x234   :  { %1695 = vmatprep.subr.bf16.mxu0 %v4237_v8  ;;  %1979 = vmatprep.subr.bf16.mxu1 %v4237_v8 }
 0x237   :  { %1696 = vmatpush1.bf16.msra.mxu0 %v4238_v9  ;;  %1980 = vmatpush1.bf16.msra.mxu1 %v4238_v9 }
 0x238   :  { %1697 = vmatprep.subr.bf16.mxu0 %v4239_v10  ;;  %1981 = vmatprep.subr.bf16.mxu1 %v4239_v10 }
 0x23b   :  { %1698 = vmatpush1.bf16.msra.mxu0 %v4240_v12  ;;  %1982 = vmatpush1.bf16.msra.mxu1 %v4240_v12 }
 0x23c   :  { %1699 = vmatprep.subr.bf16.mxu0 %v4241_v15  ;;  %1983 = vmatprep.subr.bf16.mxu1 %v4241_v15 }
 0x23f   :  { %1700 = vmatpush1.bf16.msra.mxu0 %v3544_v22  ;;  %1984 = vmatpush1.bf16.msra.mxu1 %v3544_v22 }
 0x242   :  { %1718 = vmatmul.mubr.bf16.vlgmr.msra.gmra.mrb[4].mxu0 %v1511_v20  ;;  %2002 = vmatmul.mubr.bf16.vlgmr.msra.gmra.mrb[4].mxu1 %v1795_v19 }
 0x315   :  { %v1719_v33 = vpop.f32.mrb[4].mxu0  ;;  %v2003_v34 = vpop.f32.mrb[4].mxu1 }
 0x316   :  { %v1726_v35 = vmax.f32 %v1442_v40, %v1719_v33  ;;  %v1721_v37 = vpop.f32.mrb[5].mxu0  ;;  %v2005_v44 = vpop.f32.mrb[5].mxu1 }
 0x317   :  { %v1727_v22 = vmax.f32 %v1443_v43, %v1721_v37  ;;  %v1723_v47 = vpop.f32.mrb[6].mxu0  ;;  %v2007_v48 = vpop.f32.mrb[6].mxu1 }
 0x318   :  { %v2010_v27 = vmax.f32 %v1726_v35, %v2003_v34  ;;  %v1724_v28 = vpop.f32.mrb[7].mxu0  ;;  %v2008_v32 = vpop.f32.mrb[7].mxu1 }
 0x319   :  { %v2011_v25 = vmax.f32 %v1727_v22, %v2005_v44 }
 0x31a   :  { %v2024_v13 = vadd.f32 %v2017_v36, %v2010_v27 }
 0x31b   :  { %v2025_v21 = vadd.f32 %v2021_v45, %v2011_v25 }
 0x31c   :  { %vm2026_vm0 = vcmp.ge.f32.partialorder %v2024_v13, 0.0  ;;  %v2028_v51 = vmul.f32 0.01, %v2024_v13 }
 0x31d   :  { %vm2027_vm1 = vcmp.ge.f32.partialorder %v2025_v21, 0.0  ;;  %v2029_v38 = vmul.f32 0.01, %v2025_v21 }
 0x31e   :  { %v2030_v39 = vsel %vm2026_vm0, %v2024_v13, %v2028_v51 }
 0x31f   :  { %v2031_v40 = vsel %vm2027_vm1, %v2025_v21, %v2029_v38 }
 0x320   :  { %v2211_v52 = vpack.c.bf16 %v2031_v40, %v2030_v39 }
 0x322   :  { %v2043_v17 = vrot.slane %v2211_v52, %v2590_v16 }
 0x324   :  { %2212 = vst.sshfl [vmem:[%s3987_s3] sm:$0x5 pattern:$0x73625140] %v2043_v17 }

</bundles_post_ra>
